<compile_context>
chip_gen: v7x
topology: tpu7x:2x2x1
jax: 0.10.0
libtpu: 0.0.40
codegen_flags: <defaults>
</compile_context>

<pallas_src>
import jax
import jax.numpy as jnp
from jax.experimental import pallas as pl
from jax.experimental.pallas import tpu as pltpu

# ---- model dims (match the PyTorch module defaults, small seq/batch) --------
B = 2            # real batch
BP = 8           # batch padded to one full sublane tile
S = 8            # seq_len
D_BERT = 768     # bert_embedding_dim
E = 256          # embedding_dim (== 2*H, so wi1 and [wh1;wh2] share row count)
H = 128          # hidden_dim
OUT = 6          # output_dim
OUT_PAD = 128    # lane-dense classifier width (sliced back to OUT outside)
LN_EPS = 1e-5    # nn.LayerNorm default eps


def mygru_kernel(x_ref, wp_ref, bp_ref, gamma_ref, beta_ref,
                 bi1_ref, bh1n_ref, bi2c_ref, bh2n_ref, bc_ref,
                 slab1_hbm, slab2_hbm,
                 out_ref,
                 slab1_v, slab2_v, sems):
    # ---- kick off the two packed weight-slab DMAs; they overlap proj + LN ---
    cp1 = pltpu.make_async_copy(slab1_hbm, slab1_v, sems.at[0])
    cp2 = pltpu.make_async_copy(slab2_hbm, slab2_v, sems.at[1])
    cp1.start()
    cp2.start()

    # ---- embedding projection: (S*BP, Db) @ (Db, E) + b ---------------------
    # x_ref is already flattened/padded 2-D in the wrapper (no in-kernel reshape)
    proj = (jnp.dot(x_ref[...], wp_ref[...],
                    preferred_element_type=jnp.float32) + bp_ref[...])

    # ---- LayerNorm over the feature dim --------------------------------------
    mean = jnp.mean(proj, axis=-1, keepdims=True)
    var = jnp.mean((proj - mean) ** 2, axis=-1, keepdims=True)
    xn = (proj - mean) * jax.lax.rsqrt(var + LN_EPS)
    xn = xn * gamma_ref[...] + beta_ref[...]
    # input_dropout: identity (eval mode)

    # ---- hoisted layer-1 input gates: one (S*BP, 3H) matmul, time-major ------
    cp1.wait()                         # wi1 and [wh1;wh2] live in slab1
    gi1_all = (jnp.dot(xn, slab1_v[:, 0:3 * H],
                       preferred_element_type=jnp.float32)
               + bi1_ref[...])         # bias already has bh1_{r,z} folded in

    # small pre-tiled biases (exact shapes: no broadcast in the loop)
    bh1n = bh1n_ref[...]               # (BP, H)   layer-1 b_hn
    bi2c = bi2c_ref[...]               # (BP, 3H)  layer-2 b_i (+ b_h for r,z)
    bh2n = bh2n_ref[...]               # (BP, H)   layer-2 b_hn

    zeros_bh = jnp.zeros((BP, H), jnp.float32)
    h1 = zeros_bh
    h2 = zeros_bh

    # ---- fully unrolled 2-layer GRU recurrence (batch_first, h0 = 0) ---------
    for t in range(S):                 # S is static -> unrolled
        gi1 = gi1_all[t * BP:(t + 1) * BP, :]      # tile-aligned (8, 3H) slice

        # merged recurrence matmul: block-diag [h1|0 ; 0|h2] @ [wh1;wh2]
        lhs = jnp.concatenate(
            [jnp.concatenate([h1, zeros_bh], axis=1),
             jnp.concatenate([zeros_bh, h2], axis=1)], axis=0)   # (2*BP, 2H)
        gh = jnp.dot(lhs, slab1_v[:, 3 * H:6 * H],
                     preferred_element_type=jnp.float32)          # (2*BP, 3H)
        gh1 = gh[0:BP, :]              # uses previous h1
        gh2 = gh[BP:2 * BP, :]         # uses previous h2

        r1 = jax.nn.sigmoid(gi1[:, 0:H] + gh1[:, 0:H])
        z1 = jax.nn.sigmoid(gi1[:, H:2 * H] + gh1[:, H:2 * H])
        n1 = jnp.tanh(gi1[:, 2 * H:] + r1 * (gh1[:, 2 * H:] + bh1n))
        h1 = (1.0 - z1) * n1 + z1 * h1
        # GRU inter-layer dropout: identity (eval mode)

        if t == 0:
            cp2.wait()                 # defer slab2 (wi2 | wc) wait to 1st use
        gi2 = (jnp.dot(h1, slab2_v[:, 0:3 * H],
                       preferred_element_type=jnp.float32) + bi2c)
        r2 = jax.nn.sigmoid(gi2[:, 0:H] + gh2[:, 0:H])
        z2 = jax.nn.sigmoid(gi2[:, H:2 * H] + gh2[:, H:2 * H])
        n2 = jnp.tanh(gi2[:, 2 * H:] + r2 * (gh2[:, 2 * H:] + bh2n))
        h2 = (1.0 - z2) * n2 + z2 * h2

    # ---- fc_dropout (identity) + lane-dense classifier ------------------------
    out_ref[...] = (jnp.dot(h2, slab2_v[:, 3 * H:3 * H + OUT_PAD],
                            preferred_element_type=jnp.float32)
                    + bc_ref[...])


@jax.jit
def mygru_forward(emb, kp):
    # layout plumbing in the wrapper: time-major, batch padded to BP, flat 2-D
    emb_tm = jnp.transpose(emb, (1, 0, 2))                        # (S, B, Db)
    emb_p = jnp.zeros((S, BP, D_BERT), jnp.float32).at[:, :B, :].set(emb_tm)
    x2d = emb_p.reshape(S * BP, D_BERT)                           # (S*BP, Db)

    vmem = pl.BlockSpec(memory_space=pltpu.MemorySpace.VMEM)
    hbm = pl.BlockSpec(memory_space=pl.ANY)

    args = (x2d,
            kp["wp_t"], kp["bp"], kp["gamma"], kp["beta"],
            kp["bi1_full"], kp["bh1n"], kp["bi2c"], kp["bh2n"], kp["bc_pad"],
            kp["slab1"], kp["slab2"])
    in_specs = [vmem] * 10 + [hbm] * 2

    flops = (2 * S * BP * D_BERT * E                 # projection
             + 2 * S * BP * E * 3 * H                # hoisted layer-1 gates
             + S * (2 * 2 * BP * 2 * H * 3 * H)      # merged gh1/gh2 per step
             + S * (2 * BP * H * 3 * H)              # gi2 per step
             + 2 * BP * H * OUT_PAD)                 # classifier
    transcendentals = S * BP * 2 * 3 * H             # sigmoids + tanh, 2 layers
    bytes_accessed = (sum(int(a.size) * a.dtype.itemsize for a in args)
                      + BP * OUT_PAD * 4)

    out_pad = pl.pallas_call(
        mygru_kernel,
        out_shape=jax.ShapeDtypeStruct((BP, OUT_PAD), jnp.float32),
        in_specs=in_specs,
        out_specs=vmem,
        scratch_shapes=[
            pltpu.VMEM((2 * H, 6 * H), jnp.float32),           # slab1: wi1 | [wh1;wh2]
            pltpu.VMEM((H, 3 * H + OUT_PAD), jnp.float32),     # slab2: wi2 | wc_pad
            pltpu.SemaphoreType.DMA((2,)),
        ],
        cost_estimate=pl.CostEstimate(flops=flops,
                                      transcendentals=transcendentals,
                                      bytes_accessed=bytes_accessed),
    )(*args)
    return out_pad[:B, :OUT]


def init_params(key):
    ks = jax.random.split(key, 16)

    def u(k, shape, fan_in):
        bound = 1.0 / jnp.sqrt(fan_in)
        return jax.random.uniform(k, shape, jnp.float32, -bound, bound)

    # Weights stored pre-transposed as (in_features, out_features); biases (1, N).
    return {
        "wp_t":  u(ks[0], (D_BERT, E), D_BERT),
        "bp":    u(ks[1], (1, E), D_BERT),
        "gamma": jnp.ones((1, E), jnp.float32),
        "beta":  jnp.zeros((1, E), jnp.float32),
        # GRU layer 0: input E -> hidden H, gates packed [r|z|n] (3H)
        "wi1_t": u(ks[2], (E, 3 * H), H),
        "wh1_t": u(ks[3], (H, 3 * H), H),
        "bi1":   u(ks[4], (1, 3 * H), H),
        "bh1":   u(ks[5], (1, 3 * H), H),
        # GRU layer 1: input H -> hidden H
        "wi2_t": u(ks[6], (H, 3 * H), H),
        "wh2_t": u(ks[7], (H, 3 * H), H),
        "bi2":   u(ks[8], (1, 3 * H), H),
        "bh2":   u(ks[9], (1, 3 * H), H),
        # classifier
        "wc_t":  u(ks[10], (H, OUT), H),
        "bc":    u(ks[11], (1, OUT), H),
    }


def pack_params(p):
    """Pre-combine / pre-tile biases, pad the classifier, and pack the GRU +
    classifier weights into two contiguous HBM slabs for single-DMA streaming."""
    bi1, bh1 = p["bi1"][0], p["bh1"][0]
    bi2, bh2 = p["bi2"][0], p["bh2"][0]
    # r,z gates only ever see bi+bh summed; n gate keeps bh_n separate.
    bi1_comb = jnp.concatenate([bi1[:H] + bh1[:H],
                                bi1[H:2 * H] + bh1[H:2 * H],
                                bi1[2 * H:]])
    bi2_comb = jnp.concatenate([bi2[:H] + bh2[:H],
                                bi2[H:2 * H] + bh2[H:2 * H],
                                bi2[2 * H:]])
    wc_pad = jnp.zeros((H, OUT_PAD), jnp.float32).at[:, :OUT].set(p["wc_t"])
    bc_pad = jnp.zeros((OUT_PAD,), jnp.float32).at[:OUT].set(p["bc"][0])

    # Packed HBM slabs (all column boundaries are multiples of 128 lanes).
    wh_stack = jnp.concatenate([p["wh1_t"], p["wh2_t"]], axis=0)   # (2H, 3H)
    slab1 = jnp.concatenate([p["wi1_t"], wh_stack], axis=1)        # (2H, 6H)
    slab2 = jnp.concatenate([p["wi2_t"], wc_pad], axis=1)          # (H, 3H+128)

    return {
        "wp_t": p["wp_t"], "bp": p["bp"],
        "gamma": p["gamma"], "beta": p["beta"],
        "bi1_full": jnp.tile(bi1_comb[None, :], (S * BP, 1)),      # (S*BP, 3H)
        "bh1n": jnp.tile(bh1[2 * H:][None, :], (BP, 1)),           # (BP, H)
        "bi2c": jnp.tile(bi2_comb[None, :], (BP, 1)),              # (BP, 3H)
        "bh2n": jnp.tile(bh2[2 * H:][None, :], (BP, 1)),           # (BP, H)
        "bc_pad": jnp.tile(bc_pad[None, :], (BP, 1)),              # (BP, OUT_PAD)
        "slab1": slab1, "slab2": slab2,
    }


def mygru_reference(emb, p):
    """Pure-JAX reference mirroring the PyTorch forward (eval mode)."""
    x = emb @ p["wp_t"] + p["bp"]                       # (B, S, E)
    mu = x.mean(-1, keepdims=True)
    var = ((x - mu) ** 2).mean(-1, keepdims=True)
    x = (x - mu) / jnp.sqrt(var + LN_EPS) * p["gamma"] + p["beta"]

    def cell(x_t, h_prev, wi, wh, bi, bh):
        gi = x_t @ wi + bi
        gh = h_prev @ wh + bh
        r = jax.nn.sigmoid(gi[:, :H] + gh[:, :H])
        z = jax.nn.sigmoid(gi[:, H:2 * H] + gh[:, H:2 * H])
        n = jnp.tanh(gi[:, 2 * H:] + r * gh[:, 2 * H:])
        return (1.0 - z) * n + z * h_prev

    h1 = jnp.zeros((B, H), jnp.float32)
    h2 = jnp.zeros((B, H), jnp.float32)
    for t in range(S):
        h1 = cell(x[:, t, :], h1, p["wi1_t"], p["wh1_t"], p["bi1"], p["bh1"])
        h2 = cell(h1, h2, p["wi2_t"], p["wh2_t"], p["bi2"], p["bh2"])
    return h2 @ p["wc_t"] + p["bc"]


if __name__ == "__main__":
    key = jax.random.PRNGKey(0)
    k_emb, k_par = jax.random.split(key)
    emb = jax.random.normal(k_emb, (B, S, D_BERT), jnp.float32)
    params = init_params(k_par)
    kparams = pack_params(params)

    out = mygru_forward(emb, kparams)
    out = jax.block_until_ready(out)

    ref = mygru_reference(emb, params)
    assert out.shape == (B, OUT)
    # Tolerance loosened slightly vs 2e-5 per review: the f32 projection's MXU
    # precision mode (multi-pass bf16) makes a razor-thin tolerance fragile.
    err = jnp.max(jnp.abs(out - ref))
    assert jnp.allclose(out, ref, atol=2e-4, rtol=2e-4), f"max err {err}"
    print("KERNEL_OK")
</pallas_src>

<mosaic_0001>
module attributes {stable_mosaic.version = 11 : i64} {
  func.func @mygru_kernel(%arg0: memref<64x768xf32, #tpu.memory_space<vmem>>, %arg1: memref<768x256xf32, #tpu.memory_space<vmem>>, %arg2: memref<1x256xf32, #tpu.memory_space<vmem>>, %arg3: memref<1x256xf32, #tpu.memory_space<vmem>>, %arg4: memref<1x256xf32, #tpu.memory_space<vmem>>, %arg5: memref<64x384xf32, #tpu.memory_space<vmem>>, %arg6: memref<8x128xf32, #tpu.memory_space<vmem>>, %arg7: memref<8x384xf32, #tpu.memory_space<vmem>>, %arg8: memref<8x128xf32, #tpu.memory_space<vmem>>, %arg9: memref<8x128xf32, #tpu.memory_space<vmem>>, %arg10: memref<256x768xf32, #tpu.memory_space<any>>, %arg11: memref<128x512xf32, #tpu.memory_space<any>>, %arg12: memref<8x128xf32, #tpu.memory_space<vmem>>, %arg13: memref<256x768xf32, #tpu.memory_space<vmem>>, %arg14: memref<128x512xf32, #tpu.memory_space<vmem>>, %arg15: memref<2x!tpu.dma_semaphore, #tpu.memory_space<semaphore_mem>>) attributes {dimension_semantics = [], scalar_prefetch = 0 : i64, scratch_operands = 3 : i64, tpu.core_type = #tpu.core_type<tc>} {
    %c0_i32 = arith.constant 0 : i32
    %0 = tpu.memref_slice %arg15[%c0_i32] : memref<2x!tpu.dma_semaphore, #tpu.memory_space<semaphore_mem>> -> memref<1x!tpu.dma_semaphore, #tpu.memory_space<semaphore_mem>>
    %1 = tpu.memref_squeeze %0 : memref<1x!tpu.dma_semaphore, #tpu.memory_space<semaphore_mem>> -> memref<!tpu.dma_semaphore, #tpu.memory_space<semaphore_mem>>
    tpu.enqueue_dma source(%arg10 : memref<256x768xf32, #tpu.memory_space<any>>) target(%arg13 : memref<256x768xf32, #tpu.memory_space<vmem>>) target_semaphore(%1 : memref<!tpu.dma_semaphore, #tpu.memory_space<semaphore_mem>>)
    %c1_i32 = arith.constant 1 : i32
    %2 = tpu.memref_slice %arg15[%c1_i32] : memref<2x!tpu.dma_semaphore, #tpu.memory_space<semaphore_mem>> -> memref<1x!tpu.dma_semaphore, #tpu.memory_space<semaphore_mem>>
    %3 = tpu.memref_squeeze %2 : memref<1x!tpu.dma_semaphore, #tpu.memory_space<semaphore_mem>> -> memref<!tpu.dma_semaphore, #tpu.memory_space<semaphore_mem>>
    tpu.enqueue_dma source(%arg11 : memref<128x512xf32, #tpu.memory_space<any>>) target(%arg14 : memref<128x512xf32, #tpu.memory_space<vmem>>) target_semaphore(%3 : memref<!tpu.dma_semaphore, #tpu.memory_space<semaphore_mem>>)
    %c0 = arith.constant 0 : index
    %c0_0 = arith.constant 0 : index
    %4 = vector.load %arg0[%c0, %c0_0] : memref<64x768xf32, #tpu.memory_space<vmem>>, vector<64x768xf32>
    %c0_1 = arith.constant 0 : index
    %c0_2 = arith.constant 0 : index
    %5 = vector.load %arg1[%c0_1, %c0_2] : memref<768x256xf32, #tpu.memory_space<vmem>>, vector<768x256xf32>
    %cst = arith.constant dense<0.000000e+00> : vector<64x256xf32>
    %6 = tpu.matmul %4, %5, %cst {dimension_numbers = #tpu.dot_dimension_numbers<[1], [0], [0], [1], [0, 0, 1, 1], [], []>} : vector<64x768xf32>, vector<768x256xf32>, vector<64x256xf32> -> vector<64x256xf32>
    %c0_3 = arith.constant 0 : index
    %c0_4 = arith.constant 0 : index
    %7 = vector.load %arg2[%c0_3, %c0_4] : memref<1x256xf32, #tpu.memory_space<vmem>>, vector<1x256xf32>
    %8 = vector.broadcast %7 : vector<1x256xf32> to vector<64x256xf32>
    %9 = arith.addf %6, %8 : vector<64x256xf32>
    %cst_5 = arith.constant dense<0.000000e+00> : vector<64xf32>
    %10 = vector.multi_reduction <add>, %9, %cst_5 [1] : vector<64x256xf32> to vector<64xf32>
    %11 = vector.shape_cast %10 : vector<64xf32> to vector<64x1xf32>
    %cst_6 = arith.constant 2.560000e+02 : f32
    %12 = vector.broadcast %cst_6 : f32 to vector<64x1xf32>
    %13 = arith.divf %11, %12 : vector<64x1xf32>
    %14 = vector.broadcast %13 : vector<64x1xf32> to vector<64x256xf32>
    %15 = arith.subf %9, %14 : vector<64x256xf32>
    %16 = arith.mulf %15, %15 : vector<64x256xf32>
    %cst_7 = arith.constant dense<0.000000e+00> : vector<64xf32>
    %17 = vector.multi_reduction <add>, %16, %cst_7 [1] : vector<64x256xf32> to vector<64xf32>
    %18 = vector.shape_cast %17 : vector<64xf32> to vector<64x1xf32>
    %cst_8 = arith.constant 2.560000e+02 : f32
    %19 = vector.broadcast %cst_8 : f32 to vector<64x1xf32>
    %20 = arith.divf %18, %19 : vector<64x1xf32>
    %21 = vector.broadcast %13 : vector<64x1xf32> to vector<64x256xf32>
    %22 = arith.subf %9, %21 : vector<64x256xf32>
    %cst_9 = arith.constant 9.99999974E-6 : f32
    %23 = vector.broadcast %cst_9 : f32 to vector<64x1xf32>
    %24 = arith.addf %20, %23 : vector<64x1xf32>
    %25 = math.rsqrt %24 : vector<64x1xf32>
    %26 = vector.broadcast %25 : vector<64x1xf32> to vector<64x256xf32>
    %27 = arith.mulf %22, %26 : vector<64x256xf32>
    %c0_10 = arith.constant 0 : index
    %c0_11 = arith.constant 0 : index
    %28 = vector.load %arg3[%c0_10, %c0_11] : memref<1x256xf32, #tpu.memory_space<vmem>>, vector<1x256xf32>
    %29 = vector.broadcast %28 : vector<1x256xf32> to vector<64x256xf32>
    %30 = arith.mulf %27, %29 : vector<64x256xf32>
    %c0_12 = arith.constant 0 : index
    %c0_13 = arith.constant 0 : index
    %31 = vector.load %arg4[%c0_12, %c0_13] : memref<1x256xf32, #tpu.memory_space<vmem>>, vector<1x256xf32>
    %32 = vector.broadcast %31 : vector<1x256xf32> to vector<64x256xf32>
    %33 = arith.addf %30, %32 : vector<64x256xf32>
    %c0_i32_14 = arith.constant 0 : i32
    %34 = tpu.memref_slice %arg15[%c0_i32_14] : memref<2x!tpu.dma_semaphore, #tpu.memory_space<semaphore_mem>> -> memref<1x!tpu.dma_semaphore, #tpu.memory_space<semaphore_mem>>
    %35 = tpu.memref_squeeze %34 : memref<1x!tpu.dma_semaphore, #tpu.memory_space<semaphore_mem>> -> memref<!tpu.dma_semaphore, #tpu.memory_space<semaphore_mem>>
    tpu.wait_dma2 semaphore(%35 : memref<!tpu.dma_semaphore, #tpu.memory_space<semaphore_mem>>) src(%arg10 : memref<256x768xf32, #tpu.memory_space<any>>) dst(%arg13 : memref<256x768xf32, #tpu.memory_space<vmem>>)
    %c0_15 = arith.constant 0 : index
    %c0_16 = arith.constant 0 : index
    %36 = vector.load %arg13[%c0_15, %c0_16] : memref<256x768xf32, #tpu.memory_space<vmem>>, vector<256x384xf32>
    %cst_17 = arith.constant dense<0.000000e+00> : vector<64x384xf32>
    %37 = tpu.matmul %33, %36, %cst_17 {dimension_numbers = #tpu.dot_dimension_numbers<[1], [0], [0], [1], [0, 0, 1, 1], [], []>} : vector<64x256xf32>, vector<256x384xf32>, vector<64x384xf32> -> vector<64x384xf32>
    %c0_18 = arith.constant 0 : index
    %c0_19 = arith.constant 0 : index
    %38 = vector.load %arg5[%c0_18, %c0_19] : memref<64x384xf32, #tpu.memory_space<vmem>>, vector<64x384xf32>
    %39 = arith.addf %37, %38 : vector<64x384xf32>
    %c0_20 = arith.constant 0 : index
    %c0_21 = arith.constant 0 : index
    %40 = vector.load %arg6[%c0_20, %c0_21] : memref<8x128xf32, #tpu.memory_space<vmem>>, vector<8x128xf32>
    %c0_22 = arith.constant 0 : index
    %c0_23 = arith.constant 0 : index
    %41 = vector.load %arg7[%c0_22, %c0_23] : memref<8x384xf32, #tpu.memory_space<vmem>>, vector<8x384xf32>
    %c0_24 = arith.constant 0 : index
    %c0_25 = arith.constant 0 : index
    %42 = vector.load %arg8[%c0_24, %c0_25] : memref<8x128xf32, #tpu.memory_space<vmem>>, vector<8x128xf32>
    %cst_26 = arith.constant 0.000000e+00 : f32
    %43 = vector.broadcast %cst_26 : f32 to vector<8x128xf32>
    %44 = vector.extract_strided_slice %39 {offsets = [0, 0], sizes = [8, 384], strides = [1, 1]} : vector<64x384xf32> to vector<8x384xf32>
    %45 = tpu.concatenate %43, %43 in 1 : vector<8x128xf32>, vector<8x128xf32> -> vector<8x256xf32>
    %46 = tpu.concatenate %43, %43 in 1 : vector<8x128xf32>, vector<8x128xf32> -> vector<8x256xf32>
    %47 = tpu.concatenate %45, %46 in 0 : vector<8x256xf32>, vector<8x256xf32> -> vector<16x256xf32>
    %c0_27 = arith.constant 0 : index
    %c384 = arith.constant 384 : index
    %48 = vector.load %arg13[%c0_27, %c384] : memref<256x768xf32, #tpu.memory_space<vmem>>, vector<256x384xf32>
    %cst_28 = arith.constant dense<0.000000e+00> : vector<16x384xf32>
    %49 = tpu.matmul %47, %48, %cst_28 {dimension_numbers = #tpu.dot_dimension_numbers<[1], [0], [0], [1], [0, 0, 1, 1], [], []>} : vector<16x256xf32>, vector<256x384xf32>, vector<16x384xf32> -> vector<16x384xf32>
    %50 = vector.extract_strided_slice %49 {offsets = [0, 0], sizes = [8, 384], strides = [1, 1]} : vector<16x384xf32> to vector<8x384xf32>
    %51 = vector.extract_strided_slice %49 {offsets = [8, 0], sizes = [8, 384], strides = [1, 1]} : vector<16x384xf32> to vector<8x384xf32>
    %52 = vector.extract_strided_slice %44 {offsets = [0, 0], sizes = [8, 128], strides = [1, 1]} : vector<8x384xf32> to vector<8x128xf32>
    %53 = vector.extract_strided_slice %50 {offsets = [0, 0], sizes = [8, 128], strides = [1, 1]} : vector<8x384xf32> to vector<8x128xf32>
    %54 = arith.addf %52, %53 : vector<8x128xf32>
    %55 = arith.negf %54 : vector<8x128xf32>
    %56 = math.exp %55 : vector<8x128xf32>
    %cst_29 = arith.constant 1.000000e+00 : f32
    %57 = vector.broadcast %cst_29 : f32 to vector<8x128xf32>
    %58 = arith.addf %57, %56 : vector<8x128xf32>
    %59 = arith.divf %57, %58 : vector<8x128xf32>
    %60 = vector.extract_strided_slice %44 {offsets = [0, 128], sizes = [8, 128], strides = [1, 1]} : vector<8x384xf32> to vector<8x128xf32>
    %61 = vector.extract_strided_slice %50 {offsets = [0, 128], sizes = [8, 128], strides = [1, 1]} : vector<8x384xf32> to vector<8x128xf32>
    %62 = arith.addf %60, %61 : vector<8x128xf32>
    %63 = arith.negf %62 : vector<8x128xf32>
    %64 = math.exp %63 : vector<8x128xf32>
    %cst_30 = arith.constant 1.000000e+00 : f32
    %65 = vector.broadcast %cst_30 : f32 to vector<8x128xf32>
    %66 = arith.addf %65, %64 : vector<8x128xf32>
    %67 = arith.divf %65, %66 : vector<8x128xf32>
    %68 = vector.extract_strided_slice %44 {offsets = [0, 256], sizes = [8, 128], strides = [1, 1]} : vector<8x384xf32> to vector<8x128xf32>
    %69 = vector.extract_strided_slice %50 {offsets = [0, 256], sizes = [8, 128], strides = [1, 1]} : vector<8x384xf32> to vector<8x128xf32>
    %70 = arith.addf %69, %40 : vector<8x128xf32>
    %71 = arith.mulf %59, %70 : vector<8x128xf32>
    %72 = arith.addf %68, %71 : vector<8x128xf32>
    %73 = math.tanh %72 : vector<8x128xf32>
    %cst_31 = arith.constant 1.000000e+00 : f32
    %74 = vector.broadcast %cst_31 : f32 to vector<8x128xf32>
    %75 = arith.subf %74, %67 : vector<8x128xf32>
    %76 = arith.mulf %75, %73 : vector<8x128xf32>
    %77 = arith.mulf %67, %43 : vector<8x128xf32>
    %78 = arith.addf %76, %77 : vector<8x128xf32>
    %c1_i32_32 = arith.constant 1 : i32
    %79 = tpu.memref_slice %arg15[%c1_i32_32] : memref<2x!tpu.dma_semaphore, #tpu.memory_space<semaphore_mem>> -> memref<1x!tpu.dma_semaphore, #tpu.memory_space<semaphore_mem>>
    %80 = tpu.memref_squeeze %79 : memref<1x!tpu.dma_semaphore, #tpu.memory_space<semaphore_mem>> -> memref<!tpu.dma_semaphore, #tpu.memory_space<semaphore_mem>>
    tpu.wait_dma2 semaphore(%80 : memref<!tpu.dma_semaphore, #tpu.memory_space<semaphore_mem>>) src(%arg11 : memref<128x512xf32, #tpu.memory_space<any>>) dst(%arg14 : memref<128x512xf32, #tpu.memory_space<vmem>>)
    %c0_33 = arith.constant 0 : index
    %c0_34 = arith.constant 0 : index
    %81 = vector.load %arg14[%c0_33, %c0_34] : memref<128x512xf32, #tpu.memory_space<vmem>>, vector<128x384xf32>
    %cst_35 = arith.constant dense<0.000000e+00> : vector<8x384xf32>
    %82 = tpu.matmul %78, %81, %cst_35 {dimension_numbers = #tpu.dot_dimension_numbers<[1], [0], [0], [1], [0, 0, 1, 1], [], []>} : vector<8x128xf32>, vector<128x384xf32>, vector<8x384xf32> -> vector<8x384xf32>
    %83 = arith.addf %82, %41 : vector<8x384xf32>
    %84 = vector.extract_strided_slice %83 {offsets = [0, 0], sizes = [8, 128], strides = [1, 1]} : vector<8x384xf32> to vector<8x128xf32>
    %85 = vector.extract_strided_slice %51 {offsets = [0, 0], sizes = [8, 128], strides = [1, 1]} : vector<8x384xf32> to vector<8x128xf32>
    %86 = arith.addf %84, %85 : vector<8x128xf32>
    %87 = arith.negf %86 : vector<8x128xf32>
    %88 = math.exp %87 : vector<8x128xf32>
    %cst_36 = arith.constant 1.000000e+00 : f32
    %89 = vector.broadcast %cst_36 : f32 to vector<8x128xf32>
    %90 = arith.addf %89, %88 : vector<8x128xf32>
    %91 = arith.divf %89, %90 : vector<8x128xf32>
    %92 = vector.extract_strided_slice %83 {offsets = [0, 128], sizes = [8, 128], strides = [1, 1]} : vector<8x384xf32> to vector<8x128xf32>
    %93 = vector.extract_strided_slice %51 {offsets = [0, 128], sizes = [8, 128], strides = [1, 1]} : vector<8x384xf32> to vector<8x128xf32>
    %94 = arith.addf %92, %93 : vector<8x128xf32>
    %95 = arith.negf %94 : vector<8x128xf32>
    %96 = math.exp %95 : vector<8x128xf32>
    %cst_37 = arith.constant 1.000000e+00 : f32
    %97 = vector.broadcast %cst_37 : f32 to vector<8x128xf32>
    %98 = arith.addf %97, %96 : vector<8x128xf32>
    %99 = arith.divf %97, %98 : vector<8x128xf32>
    %100 = vector.extract_strided_slice %83 {offsets = [0, 256], sizes = [8, 128], strides = [1, 1]} : vector<8x384xf32> to vector<8x128xf32>
    %101 = vector.extract_strided_slice %51 {offsets = [0, 256], sizes = [8, 128], strides = [1, 1]} : vector<8x384xf32> to vector<8x128xf32>
    %102 = arith.addf %101, %42 : vector<8x128xf32>
    %103 = arith.mulf %91, %102 : vector<8x128xf32>
    %104 = arith.addf %100, %103 : vector<8x128xf32>
    %105 = math.tanh %104 : vector<8x128xf32>
    %cst_38 = arith.constant 1.000000e+00 : f32
    %106 = vector.broadcast %cst_38 : f32 to vector<8x128xf32>
    %107 = arith.subf %106, %99 : vector<8x128xf32>
    %108 = arith.mulf %107, %105 : vector<8x128xf32>
    %109 = arith.mulf %99, %43 : vector<8x128xf32>
    %110 = arith.addf %108, %109 : vector<8x128xf32>
    %111 = vector.extract_strided_slice %39 {offsets = [8, 0], sizes = [8, 384], strides = [1, 1]} : vector<64x384xf32> to vector<8x384xf32>
    %112 = tpu.concatenate %78, %43 in 1 : vector<8x128xf32>, vector<8x128xf32> -> vector<8x256xf32>
    %113 = tpu.concatenate %43, %110 in 1 : vector<8x128xf32>, vector<8x128xf32> -> vector<8x256xf32>
    %114 = tpu.concatenate %112, %113 in 0 : vector<8x256xf32>, vector<8x256xf32> -> vector<16x256xf32>
    %c0_39 = arith.constant 0 : index
    %c384_40 = arith.constant 384 : index
    %115 = vector.load %arg13[%c0_39, %c384_40] : memref<256x768xf32, #tpu.memory_space<vmem>>, vector<256x384xf32>
    %cst_41 = arith.constant dense<0.000000e+00> : vector<16x384xf32>
    %116 = tpu.matmul %114, %115, %cst_41 {dimension_numbers = #tpu.dot_dimension_numbers<[1], [0], [0], [1], [0, 0, 1, 1], [], []>} : vector<16x256xf32>, vector<256x384xf32>, vector<16x384xf32> -> vector<16x384xf32>
    %117 = vector.extract_strided_slice %116 {offsets = [0, 0], sizes = [8, 384], strides = [1, 1]} : vector<16x384xf32> to vector<8x384xf32>
    %118 = vector.extract_strided_slice %116 {offsets = [8, 0], sizes = [8, 384], strides = [1, 1]} : vector<16x384xf32> to vector<8x384xf32>
    %119 = vector.extract_strided_slice %111 {offsets = [0, 0], sizes = [8, 128], strides = [1, 1]} : vector<8x384xf32> to vector<8x128xf32>
    %120 = vector.extract_strided_slice %117 {offsets = [0, 0], sizes = [8, 128], strides = [1, 1]} : vector<8x384xf32> to vector<8x128xf32>
    %121 = arith.addf %119, %120 : vector<8x128xf32>
    %122 = arith.negf %121 : vector<8x128xf32>
    %123 = math.exp %122 : vector<8x128xf32>
    %cst_42 = arith.constant 1.000000e+00 : f32
    %124 = vector.broadcast %cst_42 : f32 to vector<8x128xf32>
    %125 = arith.addf %124, %123 : vector<8x128xf32>
    %126 = arith.divf %124, %125 : vector<8x128xf32>
    %127 = vector.extract_strided_slice %111 {offsets = [0, 128], sizes = [8, 128], strides = [1, 1]} : vector<8x384xf32> to vector<8x128xf32>
    %128 = vector.extract_strided_slice %117 {offsets = [0, 128], sizes = [8, 128], strides = [1, 1]} : vector<8x384xf32> to vector<8x128xf32>
    %129 = arith.addf %127, %128 : vector<8x128xf32>
    %130 = arith.negf %129 : vector<8x128xf32>
    %131 = math.exp %130 : vector<8x128xf32>
    %cst_43 = arith.constant 1.000000e+00 : f32
    %132 = vector.broadcast %cst_43 : f32 to vector<8x128xf32>
    %133 = arith.addf %132, %131 : vector<8x128xf32>
    %134 = arith.divf %132, %133 : vector<8x128xf32>
    %135 = vector.extract_strided_slice %111 {offsets = [0, 256], sizes = [8, 128], strides = [1, 1]} : vector<8x384xf32> to vector<8x128xf32>
    %136 = vector.extract_strided_slice %117 {offsets = [0, 256], sizes = [8, 128], strides = [1, 1]} : vector<8x384xf32> to vector<8x128xf32>
    %137 = arith.addf %136, %40 : vector<8x128xf32>
    %138 = arith.mulf %126, %137 : vector<8x128xf32>
    %139 = arith.addf %135, %138 : vector<8x128xf32>
    %140 = math.tanh %139 : vector<8x128xf32>
    %cst_44 = arith.constant 1.000000e+00 : f32
    %141 = vector.broadcast %cst_44 : f32 to vector<8x128xf32>
    %142 = arith.subf %141, %134 : vector<8x128xf32>
    %143 = arith.mulf %142, %140 : vector<8x128xf32>
    %144 = arith.mulf %134, %78 : vector<8x128xf32>
    %145 = arith.addf %143, %144 : vector<8x128xf32>
    %c0_45 = arith.constant 0 : index
    %c0_46 = arith.constant 0 : index
    %146 = vector.load %arg14[%c0_45, %c0_46] : memref<128x512xf32, #tpu.memory_space<vmem>>, vector<128x384xf32>
    %cst_47 = arith.constant dense<0.000000e+00> : vector<8x384xf32>
    %147 = tpu.matmul %145, %146, %cst_47 {dimension_numbers = #tpu.dot_dimension_numbers<[1], [0], [0], [1], [0, 0, 1, 1], [], []>} : vector<8x128xf32>, vector<128x384xf32>, vector<8x384xf32> -> vector<8x384xf32>
    %148 = arith.addf %147, %41 : vector<8x384xf32>
    %149 = vector.extract_strided_slice %148 {offsets = [0, 0], sizes = [8, 128], strides = [1, 1]} : vector<8x384xf32> to vector<8x128xf32>
    %150 = vector.extract_strided_slice %118 {offsets = [0, 0], sizes = [8, 128], strides = [1, 1]} : vector<8x384xf32> to vector<8x128xf32>
    %151 = arith.addf %149, %150 : vector<8x128xf32>
    %152 = arith.negf %151 : vector<8x128xf32>
    %153 = math.exp %152 : vector<8x128xf32>
    %cst_48 = arith.constant 1.000000e+00 : f32
    %154 = vector.broadcast %cst_48 : f32 to vector<8x128xf32>
    %155 = arith.addf %154, %153 : vector<8x128xf32>
    %156 = arith.divf %154, %155 : vector<8x128xf32>
    %157 = vector.extract_strided_slice %148 {offsets = [0, 128], sizes = [8, 128], strides = [1, 1]} : vector<8x384xf32> to vector<8x128xf32>
    %158 = vector.extract_strided_slice %118 {offsets = [0, 128], sizes = [8, 128], strides = [1, 1]} : vector<8x384xf32> to vector<8x128xf32>
    %159 = arith.addf %157, %158 : vector<8x128xf32>
    %160 = arith.negf %159 : vector<8x128xf32>
    %161 = math.exp %160 : vector<8x128xf32>
    %cst_49 = arith.constant 1.000000e+00 : f32
    %162 = vector.broadcast %cst_49 : f32 to vector<8x128xf32>
    %163 = arith.addf %162, %161 : vector<8x128xf32>
    %164 = arith.divf %162, %163 : vector<8x128xf32>
    %165 = vector.extract_strided_slice %148 {offsets = [0, 256], sizes = [8, 128], strides = [1, 1]} : vector<8x384xf32> to vector<8x128xf32>
    %166 = vector.extract_strided_slice %118 {offsets = [0, 256], sizes = [8, 128], strides = [1, 1]} : vector<8x384xf32> to vector<8x128xf32>
    %167 = arith.addf %166, %42 : vector<8x128xf32>
    %168 = arith.mulf %156, %167 : vector<8x128xf32>
    %169 = arith.addf %165, %168 : vector<8x128xf32>
    %170 = math.tanh %169 : vector<8x128xf32>
    %cst_50 = arith.constant 1.000000e+00 : f32
    %171 = vector.broadcast %cst_50 : f32 to vector<8x128xf32>
    %172 = arith.subf %171, %164 : vector<8x128xf32>
    %173 = arith.mulf %172, %170 : vector<8x128xf32>
    %174 = arith.mulf %164, %110 : vector<8x128xf32>
    %175 = arith.addf %173, %174 : vector<8x128xf32>
    %176 = vector.extract_strided_slice %39 {offsets = [16, 0], sizes = [8, 384], strides = [1, 1]} : vector<64x384xf32> to vector<8x384xf32>
    %177 = tpu.concatenate %145, %43 in 1 : vector<8x128xf32>, vector<8x128xf32> -> vector<8x256xf32>
    %178 = tpu.concatenate %43, %175 in 1 : vector<8x128xf32>, vector<8x128xf32> -> vector<8x256xf32>
    %179 = tpu.concatenate %177, %178 in 0 : vector<8x256xf32>, vector<8x256xf32> -> vector<16x256xf32>
    %c0_51 = arith.constant 0 : index
    %c384_52 = arith.constant 384 : index
    %180 = vector.load %arg13[%c0_51, %c384_52] : memref<256x768xf32, #tpu.memory_space<vmem>>, vector<256x384xf32>
    %cst_53 = arith.constant dense<0.000000e+00> : vector<16x384xf32>
    %181 = tpu.matmul %179, %180, %cst_53 {dimension_numbers = #tpu.dot_dimension_numbers<[1], [0], [0], [1], [0, 0, 1, 1], [], []>} : vector<16x256xf32>, vector<256x384xf32>, vector<16x384xf32> -> vector<16x384xf32>
    %182 = vector.extract_strided_slice %181 {offsets = [0, 0], sizes = [8, 384], strides = [1, 1]} : vector<16x384xf32> to vector<8x384xf32>
    %183 = vector.extract_strided_slice %181 {offsets = [8, 0], sizes = [8, 384], strides = [1, 1]} : vector<16x384xf32> to vector<8x384xf32>
    %184 = vector.extract_strided_slice %176 {offsets = [0, 0], sizes = [8, 128], strides = [1, 1]} : vector<8x384xf32> to vector<8x128xf32>
    %185 = vector.extract_strided_slice %182 {offsets = [0, 0], sizes = [8, 128], strides = [1, 1]} : vector<8x384xf32> to vector<8x128xf32>
    %186 = arith.addf %184, %185 : vector<8x128xf32>
    %187 = arith.negf %186 : vector<8x128xf32>
    %188 = math.exp %187 : vector<8x128xf32>
    %cst_54 = arith.constant 1.000000e+00 : f32
    %189 = vector.broadcast %cst_54 : f32 to vector<8x128xf32>
    %190 = arith.addf %189, %188 : vector<8x128xf32>
    %191 = arith.divf %189, %190 : vector<8x128xf32>
    %192 = vector.extract_strided_slice %176 {offsets = [0, 128], sizes = [8, 128], strides = [1, 1]} : vector<8x384xf32> to vector<8x128xf32>
    %193 = vector.extract_strided_slice %182 {offsets = [0, 128], sizes = [8, 128], strides = [1, 1]} : vector<8x384xf32> to vector<8x128xf32>
    %194 = arith.addf %192, %193 : vector<8x128xf32>
    %195 = arith.negf %194 : vector<8x128xf32>
    %196 = math.exp %195 : vector<8x128xf32>
    %cst_55 = arith.constant 1.000000e+00 : f32
    %197 = vector.broadcast %cst_55 : f32 to vector<8x128xf32>
    %198 = arith.addf %197, %196 : vector<8x128xf32>
    %199 = arith.divf %197, %198 : vector<8x128xf32>
    %200 = vector.extract_strided_slice %176 {offsets = [0, 256], sizes = [8, 128], strides = [1, 1]} : vector<8x384xf32> to vector<8x128xf32>
    %201 = vector.extract_strided_slice %182 {offsets = [0, 256], sizes = [8, 128], strides = [1, 1]} : vector<8x384xf32> to vector<8x128xf32>
    %202 = arith.addf %201, %40 : vector<8x128xf32>
    %203 = arith.mulf %191, %202 : vector<8x128xf32>
    %204 = arith.addf %200, %203 : vector<8x128xf32>
    %205 = math.tanh %204 : vector<8x128xf32>
    %cst_56 = arith.constant 1.000000e+00 : f32
    %206 = vector.broadcast %cst_56 : f32 to vector<8x128xf32>
    %207 = arith.subf %206, %199 : vector<8x128xf32>
    %208 = arith.mulf %207, %205 : vector<8x128xf32>
    %209 = arith.mulf %199, %145 : vector<8x128xf32>
    %210 = arith.addf %208, %209 : vector<8x128xf32>
    %c0_57 = arith.constant 0 : index
    %c0_58 = arith.constant 0 : index
    %211 = vector.load %arg14[%c0_57, %c0_58] : memref<128x512xf32, #tpu.memory_space<vmem>>, vector<128x384xf32>
    %cst_59 = arith.constant dense<0.000000e+00> : vector<8x384xf32>
    %212 = tpu.matmul %210, %211, %cst_59 {dimension_numbers = #tpu.dot_dimension_numbers<[1], [0], [0], [1], [0, 0, 1, 1], [], []>} : vector<8x128xf32>, vector<128x384xf32>, vector<8x384xf32> -> vector<8x384xf32>
    %213 = arith.addf %212, %41 : vector<8x384xf32>
    %214 = vector.extract_strided_slice %213 {offsets = [0, 0], sizes = [8, 128], strides = [1, 1]} : vector<8x384xf32> to vector<8x128xf32>
    %215 = vector.extract_strided_slice %183 {offsets = [0, 0], sizes = [8, 128], strides = [1, 1]} : vector<8x384xf32> to vector<8x128xf32>
    %216 = arith.addf %214, %215 : vector<8x128xf32>
    %217 = arith.negf %216 : vector<8x128xf32>
    %218 = math.exp %217 : vector<8x128xf32>
    %cst_60 = arith.constant 1.000000e+00 : f32
    %219 = vector.broadcast %cst_60 : f32 to vector<8x128xf32>
    %220 = arith.addf %219, %218 : vector<8x128xf32>
    %221 = arith.divf %219, %220 : vector<8x128xf32>
    %222 = vector.extract_strided_slice %213 {offsets = [0, 128], sizes = [8, 128], strides = [1, 1]} : vector<8x384xf32> to vector<8x128xf32>
    %223 = vector.extract_strided_slice %183 {offsets = [0, 128], sizes = [8, 128], strides = [1, 1]} : vector<8x384xf32> to vector<8x128xf32>
    %224 = arith.addf %222, %223 : vector<8x128xf32>
    %225 = arith.negf %224 : vector<8x128xf32>
    %226 = math.exp %225 : vector<8x128xf32>
    %cst_61 = arith.constant 1.000000e+00 : f32
    %227 = vector.broadcast %cst_61 : f32 to vector<8x128xf32>
    %228 = arith.addf %227, %226 : vector<8x128xf32>
    %229 = arith.divf %227, %228 : vector<8x128xf32>
    %230 = vector.extract_strided_slice %213 {offsets = [0, 256], sizes = [8, 128], strides = [1, 1]} : vector<8x384xf32> to vector<8x128xf32>
    %231 = vector.extract_strided_slice %183 {offsets = [0, 256], sizes = [8, 128], strides = [1, 1]} : vector<8x384xf32> to vector<8x128xf32>
    %232 = arith.addf %231, %42 : vector<8x128xf32>
    %233 = arith.mulf %221, %232 : vector<8x128xf32>
    %234 = arith.addf %230, %233 : vector<8x128xf32>
    %235 = math.tanh %234 : vector<8x128xf32>
    %cst_62 = arith.constant 1.000000e+00 : f32
    %236 = vector.broadcast %cst_62 : f32 to vector<8x128xf32>
    %237 = arith.subf %236, %229 : vector<8x128xf32>
    %238 = arith.mulf %237, %235 : vector<8x128xf32>
    %239 = arith.mulf %229, %175 : vector<8x128xf32>
    %240 = arith.addf %238, %239 : vector<8x128xf32>
    %241 = vector.extract_strided_slice %39 {offsets = [24, 0], sizes = [8, 384], strides = [1, 1]} : vector<64x384xf32> to vector<8x384xf32>
    %242 = tpu.concatenate %210, %43 in 1 : vector<8x128xf32>, vector<8x128xf32> -> vector<8x256xf32>
    %243 = tpu.concatenate %43, %240 in 1 : vector<8x128xf32>, vector<8x128xf32> -> vector<8x256xf32>
    %244 = tpu.concatenate %242, %243 in 0 : vector<8x256xf32>, vector<8x256xf32> -> vector<16x256xf32>
    %c0_63 = arith.constant 0 : index
    %c384_64 = arith.constant 384 : index
    %245 = vector.load %arg13[%c0_63, %c384_64] : memref<256x768xf32, #tpu.memory_space<vmem>>, vector<256x384xf32>
    %cst_65 = arith.constant dense<0.000000e+00> : vector<16x384xf32>
    %246 = tpu.matmul %244, %245, %cst_65 {dimension_numbers = #tpu.dot_dimension_numbers<[1], [0], [0], [1], [0, 0, 1, 1], [], []>} : vector<16x256xf32>, vector<256x384xf32>, vector<16x384xf32> -> vector<16x384xf32>
    %247 = vector.extract_strided_slice %246 {offsets = [0, 0], sizes = [8, 384], strides = [1, 1]} : vector<16x384xf32> to vector<8x384xf32>
    %248 = vector.extract_strided_slice %246 {offsets = [8, 0], sizes = [8, 384], strides = [1, 1]} : vector<16x384xf32> to vector<8x384xf32>
    %249 = vector.extract_strided_slice %241 {offsets = [0, 0], sizes = [8, 128], strides = [1, 1]} : vector<8x384xf32> to vector<8x128xf32>
    %250 = vector.extract_strided_slice %247 {offsets = [0, 0], sizes = [8, 128], strides = [1, 1]} : vector<8x384xf32> to vector<8x128xf32>
    %251 = arith.addf %249, %250 : vector<8x128xf32>
    %252 = arith.negf %251 : vector<8x128xf32>
    %253 = math.exp %252 : vector<8x128xf32>
    %cst_66 = arith.constant 1.000000e+00 : f32
    %254 = vector.broadcast %cst_66 : f32 to vector<8x128xf32>
    %255 = arith.addf %254, %253 : vector<8x128xf32>
    %256 = arith.divf %254, %255 : vector<8x128xf32>
    %257 = vector.extract_strided_slice %241 {offsets = [0, 128], sizes = [8, 128], strides = [1, 1]} : vector<8x384xf32> to vector<8x128xf32>
    %258 = vector.extract_strided_slice %247 {offsets = [0, 128], sizes = [8, 128], strides = [1, 1]} : vector<8x384xf32> to vector<8x128xf32>
    %259 = arith.addf %257, %258 : vector<8x128xf32>
    %260 = arith.negf %259 : vector<8x128xf32>
    %261 = math.exp %260 : vector<8x128xf32>
    %cst_67 = arith.constant 1.000000e+00 : f32
    %262 = vector.broadcast %cst_67 : f32 to vector<8x128xf32>
    %263 = arith.addf %262, %261 : vector<8x128xf32>
    %264 = arith.divf %262, %263 : vector<8x128xf32>
    %265 = vector.extract_strided_slice %241 {offsets = [0, 256], sizes = [8, 128], strides = [1, 1]} : vector<8x384xf32> to vector<8x128xf32>
    %266 = vector.extract_strided_slice %247 {offsets = [0, 256], sizes = [8, 128], strides = [1, 1]} : vector<8x384xf32> to vector<8x128xf32>
    %267 = arith.addf %266, %40 : vector<8x128xf32>
    %268 = arith.mulf %256, %267 : vector<8x128xf32>
    %269 = arith.addf %265, %268 : vector<8x128xf32>
    %270 = math.tanh %269 : vector<8x128xf32>
    %cst_68 = arith.constant 1.000000e+00 : f32
    %271 = vector.broadcast %cst_68 : f32 to vector<8x128xf32>
    %272 = arith.subf %271, %264 : vector<8x128xf32>
    %273 = arith.mulf %272, %270 : vector<8x128xf32>
    %274 = arith.mulf %264, %210 : vector<8x128xf32>
    %275 = arith.addf %273, %274 : vector<8x128xf32>
    %c0_69 = arith.constant 0 : index
    %c0_70 = arith.constant 0 : index
    %276 = vector.load %arg14[%c0_69, %c0_70] : memref<128x512xf32, #tpu.memory_space<vmem>>, vector<128x384xf32>
    %cst_71 = arith.constant dense<0.000000e+00> : vector<8x384xf32>
    %277 = tpu.matmul %275, %276, %cst_71 {dimension_numbers = #tpu.dot_dimension_numbers<[1], [0], [0], [1], [0, 0, 1, 1], [], []>} : vector<8x128xf32>, vector<128x384xf32>, vector<8x384xf32> -> vector<8x384xf32>
    %278 = arith.addf %277, %41 : vector<8x384xf32>
    %279 = vector.extract_strided_slice %278 {offsets = [0, 0], sizes = [8, 128], strides = [1, 1]} : vector<8x384xf32> to vector<8x128xf32>
    %280 = vector.extract_strided_slice %248 {offsets = [0, 0], sizes = [8, 128], strides = [1, 1]} : vector<8x384xf32> to vector<8x128xf32>
    %281 = arith.addf %279, %280 : vector<8x128xf32>
    %282 = arith.negf %281 : vector<8x128xf32>
    %283 = math.exp %282 : vector<8x128xf32>
    %cst_72 = arith.constant 1.000000e+00 : f32
    %284 = vector.broadcast %cst_72 : f32 to vector<8x128xf32>
    %285 = arith.addf %284, %283 : vector<8x128xf32>
    %286 = arith.divf %284, %285 : vector<8x128xf32>
    %287 = vector.extract_strided_slice %278 {offsets = [0, 128], sizes = [8, 128], strides = [1, 1]} : vector<8x384xf32> to vector<8x128xf32>
    %288 = vector.extract_strided_slice %248 {offsets = [0, 128], sizes = [8, 128], strides = [1, 1]} : vector<8x384xf32> to vector<8x128xf32>
    %289 = arith.addf %287, %288 : vector<8x128xf32>
    %290 = arith.negf %289 : vector<8x128xf32>
    %291 = math.exp %290 : vector<8x128xf32>
    %cst_73 = arith.constant 1.000000e+00 : f32
    %292 = vector.broadcast %cst_73 : f32 to vector<8x128xf32>
    %293 = arith.addf %292, %291 : vector<8x128xf32>
    %294 = arith.divf %292, %293 : vector<8x128xf32>
    %295 = vector.extract_strided_slice %278 {offsets = [0, 256], sizes = [8, 128], strides = [1, 1]} : vector<8x384xf32> to vector<8x128xf32>
    %296 = vector.extract_strided_slice %248 {offsets = [0, 256], sizes = [8, 128], strides = [1, 1]} : vector<8x384xf32> to vector<8x128xf32>
    %297 = arith.addf %296, %42 : vector<8x128xf32>
    %298 = arith.mulf %286, %297 : vector<8x128xf32>
    %299 = arith.addf %295, %298 : vector<8x128xf32>
    %300 = math.tanh %299 : vector<8x128xf32>
    %cst_74 = arith.constant 1.000000e+00 : f32
    %301 = vector.broadcast %cst_74 : f32 to vector<8x128xf32>
    %302 = arith.subf %301, %294 : vector<8x128xf32>
    %303 = arith.mulf %302, %300 : vector<8x128xf32>
    %304 = arith.mulf %294, %240 : vector<8x128xf32>
    %305 = arith.addf %303, %304 : vector<8x128xf32>
    %306 = vector.extract_strided_slice %39 {offsets = [32, 0], sizes = [8, 384], strides = [1, 1]} : vector<64x384xf32> to vector<8x384xf32>
    %307 = tpu.concatenate %275, %43 in 1 : vector<8x128xf32>, vector<8x128xf32> -> vector<8x256xf32>
    %308 = tpu.concatenate %43, %305 in 1 : vector<8x128xf32>, vector<8x128xf32> -> vector<8x256xf32>
    %309 = tpu.concatenate %307, %308 in 0 : vector<8x256xf32>, vector<8x256xf32> -> vector<16x256xf32>
    %c0_75 = arith.constant 0 : index
    %c384_76 = arith.constant 384 : index
    %310 = vector.load %arg13[%c0_75, %c384_76] : memref<256x768xf32, #tpu.memory_space<vmem>>, vector<256x384xf32>
    %cst_77 = arith.constant dense<0.000000e+00> : vector<16x384xf32>
    %311 = tpu.matmul %309, %310, %cst_77 {dimension_numbers = #tpu.dot_dimension_numbers<[1], [0], [0], [1], [0, 0, 1, 1], [], []>} : vector<16x256xf32>, vector<256x384xf32>, vector<16x384xf32> -> vector<16x384xf32>
    %312 = vector.extract_strided_slice %311 {offsets = [0, 0], sizes = [8, 384], strides = [1, 1]} : vector<16x384xf32> to vector<8x384xf32>
    %313 = vector.extract_strided_slice %311 {offsets = [8, 0], sizes = [8, 384], strides = [1, 1]} : vector<16x384xf32> to vector<8x384xf32>
    %314 = vector.extract_strided_slice %306 {offsets = [0, 0], sizes = [8, 128], strides = [1, 1]} : vector<8x384xf32> to vector<8x128xf32>
    %315 = vector.extract_strided_slice %312 {offsets = [0, 0], sizes = [8, 128], strides = [1, 1]} : vector<8x384xf32> to vector<8x128xf32>
    %316 = arith.addf %314, %315 : vector<8x128xf32>
    %317 = arith.negf %316 : vector<8x128xf32>
    %318 = math.exp %317 : vector<8x128xf32>
    %cst_78 = arith.constant 1.000000e+00 : f32
    %319 = vector.broadcast %cst_78 : f32 to vector<8x128xf32>
    %320 = arith.addf %319, %318 : vector<8x128xf32>
    %321 = arith.divf %319, %320 : vector<8x128xf32>
    %322 = vector.extract_strided_slice %306 {offsets = [0, 128], sizes = [8, 128], strides = [1, 1]} : vector<8x384xf32> to vector<8x128xf32>
    %323 = vector.extract_strided_slice %312 {offsets = [0, 128], sizes = [8, 128], strides = [1, 1]} : vector<8x384xf32> to vector<8x128xf32>
    %324 = arith.addf %322, %323 : vector<8x128xf32>
    %325 = arith.negf %324 : vector<8x128xf32>
    %326 = math.exp %325 : vector<8x128xf32>
    %cst_79 = arith.constant 1.000000e+00 : f32
    %327 = vector.broadcast %cst_79 : f32 to vector<8x128xf32>
    %328 = arith.addf %327, %326 : vector<8x128xf32>
    %329 = arith.divf %327, %328 : vector<8x128xf32>
    %330 = vector.extract_strided_slice %306 {offsets = [0, 256], sizes = [8, 128], strides = [1, 1]} : vector<8x384xf32> to vector<8x128xf32>
    %331 = vector.extract_strided_slice %312 {offsets = [0, 256], sizes = [8, 128], strides = [1, 1]} : vector<8x384xf32> to vector<8x128xf32>
    %332 = arith.addf %331, %40 : vector<8x128xf32>
    %333 = arith.mulf %321, %332 : vector<8x128xf32>
    %334 = arith.addf %330, %333 : vector<8x128xf32>
    %335 = math.tanh %334 : vector<8x128xf32>
    %cst_80 = arith.constant 1.000000e+00 : f32
    %336 = vector.broadcast %cst_80 : f32 to vector<8x128xf32>
    %337 = arith.subf %336, %329 : vector<8x128xf32>
    %338 = arith.mulf %337, %335 : vector<8x128xf32>
    %339 = arith.mulf %329, %275 : vector<8x128xf32>
    %340 = arith.addf %338, %339 : vector<8x128xf32>
    %c0_81 = arith.constant 0 : index
    %c0_82 = arith.constant 0 : index
    %341 = vector.load %arg14[%c0_81, %c0_82] : memref<128x512xf32, #tpu.memory_space<vmem>>, vector<128x384xf32>
    %cst_83 = arith.constant dense<0.000000e+00> : vector<8x384xf32>
    %342 = tpu.matmul %340, %341, %cst_83 {dimension_numbers = #tpu.dot_dimension_numbers<[1], [0], [0], [1], [0, 0, 1, 1], [], []>} : vector<8x128xf32>, vector<128x384xf32>, vector<8x384xf32> -> vector<8x384xf32>
    %343 = arith.addf %342, %41 : vector<8x384xf32>
    %344 = vector.extract_strided_slice %343 {offsets = [0, 0], sizes = [8, 128], strides = [1, 1]} : vector<8x384xf32> to vector<8x128xf32>
    %345 = vector.extract_strided_slice %313 {offsets = [0, 0], sizes = [8, 128], strides = [1, 1]} : vector<8x384xf32> to vector<8x128xf32>
    %346 = arith.addf %344, %345 : vector<8x128xf32>
    %347 = arith.negf %346 : vector<8x128xf32>
    %348 = math.exp %347 : vector<8x128xf32>
    %cst_84 = arith.constant 1.000000e+00 : f32
    %349 = vector.broadcast %cst_84 : f32 to vector<8x128xf32>
    %350 = arith.addf %349, %348 : vector<8x128xf32>
    %351 = arith.divf %349, %350 : vector<8x128xf32>
    %352 = vector.extract_strided_slice %343 {offsets = [0, 128], sizes = [8, 128], strides = [1, 1]} : vector<8x384xf32> to vector<8x128xf32>
    %353 = vector.extract_strided_slice %313 {offsets = [0, 128], sizes = [8, 128], strides = [1, 1]} : vector<8x384xf32> to vector<8x128xf32>
    %354 = arith.addf %352, %353 : vector<8x128xf32>
    %355 = arith.negf %354 : vector<8x128xf32>
    %356 = math.exp %355 : vector<8x128xf32>
    %cst_85 = arith.constant 1.000000e+00 : f32
    %357 = vector.broadcast %cst_85 : f32 to vector<8x128xf32>
    %358 = arith.addf %357, %356 : vector<8x128xf32>
    %359 = arith.divf %357, %358 : vector<8x128xf32>
    %360 = vector.extract_strided_slice %343 {offsets = [0, 256], sizes = [8, 128], strides = [1, 1]} : vector<8x384xf32> to vector<8x128xf32>
    %361 = vector.extract_strided_slice %313 {offsets = [0, 256], sizes = [8, 128], strides = [1, 1]} : vector<8x384xf32> to vector<8x128xf32>
    %362 = arith.addf %361, %42 : vector<8x128xf32>
    %363 = arith.mulf %351, %362 : vector<8x128xf32>
    %364 = arith.addf %360, %363 : vector<8x128xf32>
    %365 = math.tanh %364 : vector<8x128xf32>
    %cst_86 = arith.constant 1.000000e+00 : f32
    %366 = vector.broadcast %cst_86 : f32 to vector<8x128xf32>
    %367 = arith.subf %366, %359 : vector<8x128xf32>
    %368 = arith.mulf %367, %365 : vector<8x128xf32>
    %369 = arith.mulf %359, %305 : vector<8x128xf32>
    %370 = arith.addf %368, %369 : vector<8x128xf32>
    %371 = vector.extract_strided_slice %39 {offsets = [40, 0], sizes = [8, 384], strides = [1, 1]} : vector<64x384xf32> to vector<8x384xf32>
    %372 = tpu.concatenate %340, %43 in 1 : vector<8x128xf32>, vector<8x128xf32> -> vector<8x256xf32>
    %373 = tpu.concatenate %43, %370 in 1 : vector<8x128xf32>, vector<8x128xf32> -> vector<8x256xf32>
    %374 = tpu.concatenate %372, %373 in 0 : vector<8x256xf32>, vector<8x256xf32> -> vector<16x256xf32>
    %c0_87 = arith.constant 0 : index
    %c384_88 = arith.constant 384 : index
    %375 = vector.load %arg13[%c0_87, %c384_88] : memref<256x768xf32, #tpu.memory_space<vmem>>, vector<256x384xf32>
    %cst_89 = arith.constant dense<0.000000e+00> : vector<16x384xf32>
    %376 = tpu.matmul %374, %375, %cst_89 {dimension_numbers = #tpu.dot_dimension_numbers<[1], [0], [0], [1], [0, 0, 1, 1], [], []>} : vector<16x256xf32>, vector<256x384xf32>, vector<16x384xf32> -> vector<16x384xf32>
    %377 = vector.extract_strided_slice %376 {offsets = [0, 0], sizes = [8, 384], strides = [1, 1]} : vector<16x384xf32> to vector<8x384xf32>
    %378 = vector.extract_strided_slice %376 {offsets = [8, 0], sizes = [8, 384], strides = [1, 1]} : vector<16x384xf32> to vector<8x384xf32>
    %379 = vector.extract_strided_slice %371 {offsets = [0, 0], sizes = [8, 128], strides = [1, 1]} : vector<8x384xf32> to vector<8x128xf32>
    %380 = vector.extract_strided_slice %377 {offsets = [0, 0], sizes = [8, 128], strides = [1, 1]} : vector<8x384xf32> to vector<8x128xf32>
    %381 = arith.addf %379, %380 : vector<8x128xf32>
    %382 = arith.negf %381 : vector<8x128xf32>
    %383 = math.exp %382 : vector<8x128xf32>
    %cst_90 = arith.constant 1.000000e+00 : f32
    %384 = vector.broadcast %cst_90 : f32 to vector<8x128xf32>
    %385 = arith.addf %384, %383 : vector<8x128xf32>
    %386 = arith.divf %384, %385 : vector<8x128xf32>
    %387 = vector.extract_strided_slice %371 {offsets = [0, 128], sizes = [8, 128], strides = [1, 1]} : vector<8x384xf32> to vector<8x128xf32>
    %388 = vector.extract_strided_slice %377 {offsets = [0, 128], sizes = [8, 128], strides = [1, 1]} : vector<8x384xf32> to vector<8x128xf32>
    %389 = arith.addf %387, %388 : vector<8x128xf32>
    %390 = arith.negf %389 : vector<8x128xf32>
    %391 = math.exp %390 : vector<8x128xf32>
    %cst_91 = arith.constant 1.000000e+00 : f32
    %392 = vector.broadcast %cst_91 : f32 to vector<8x128xf32>
    %393 = arith.addf %392, %391 : vector<8x128xf32>
    %394 = arith.divf %392, %393 : vector<8x128xf32>
    %395 = vector.extract_strided_slice %371 {offsets = [0, 256], sizes = [8, 128], strides = [1, 1]} : vector<8x384xf32> to vector<8x128xf32>
    %396 = vector.extract_strided_slice %377 {offsets = [0, 256], sizes = [8, 128], strides = [1, 1]} : vector<8x384xf32> to vector<8x128xf32>
    %397 = arith.addf %396, %40 : vector<8x128xf32>
    %398 = arith.mulf %386, %397 : vector<8x128xf32>
    %399 = arith.addf %395, %398 : vector<8x128xf32>
    %400 = math.tanh %399 : vector<8x128xf32>
    %cst_92 = arith.constant 1.000000e+00 : f32
    %401 = vector.broadcast %cst_92 : f32 to vector<8x128xf32>
    %402 = arith.subf %401, %394 : vector<8x128xf32>
    %403 = arith.mulf %402, %400 : vector<8x128xf32>
    %404 = arith.mulf %394, %340 : vector<8x128xf32>
    %405 = arith.addf %403, %404 : vector<8x128xf32>
    %c0_93 = arith.constant 0 : index
    %c0_94 = arith.constant 0 : index
    %406 = vector.load %arg14[%c0_93, %c0_94] : memref<128x512xf32, #tpu.memory_space<vmem>>, vector<128x384xf32>
    %cst_95 = arith.constant dense<0.000000e+00> : vector<8x384xf32>
    %407 = tpu.matmul %405, %406, %cst_95 {dimension_numbers = #tpu.dot_dimension_numbers<[1], [0], [0], [1], [0, 0, 1, 1], [], []>} : vector<8x128xf32>, vector<128x384xf32>, vector<8x384xf32> -> vector<8x384xf32>
    %408 = arith.addf %407, %41 : vector<8x384xf32>
    %409 = vector.extract_strided_slice %408 {offsets = [0, 0], sizes = [8, 128], strides = [1, 1]} : vector<8x384xf32> to vector<8x128xf32>
    %410 = vector.extract_strided_slice %378 {offsets = [0, 0], sizes = [8, 128], strides = [1, 1]} : vector<8x384xf32> to vector<8x128xf32>
    %411 = arith.addf %409, %410 : vector<8x128xf32>
    %412 = arith.negf %411 : vector<8x128xf32>
    %413 = math.exp %412 : vector<8x128xf32>
    %cst_96 = arith.constant 1.000000e+00 : f32
    %414 = vector.broadcast %cst_96 : f32 to vector<8x128xf32>
    %415 = arith.addf %414, %413 : vector<8x128xf32>
    %416 = arith.divf %414, %415 : vector<8x128xf32>
    %417 = vector.extract_strided_slice %408 {offsets = [0, 128], sizes = [8, 128], strides = [1, 1]} : vector<8x384xf32> to vector<8x128xf32>
    %418 = vector.extract_strided_slice %378 {offsets = [0, 128], sizes = [8, 128], strides = [1, 1]} : vector<8x384xf32> to vector<8x128xf32>
    %419 = arith.addf %417, %418 : vector<8x128xf32>
    %420 = arith.negf %419 : vector<8x128xf32>
    %421 = math.exp %420 : vector<8x128xf32>
    %cst_97 = arith.constant 1.000000e+00 : f32
    %422 = vector.broadcast %cst_97 : f32 to vector<8x128xf32>
    %423 = arith.addf %422, %421 : vector<8x128xf32>
    %424 = arith.divf %422, %423 : vector<8x128xf32>
    %425 = vector.extract_strided_slice %408 {offsets = [0, 256], sizes = [8, 128], strides = [1, 1]} : vector<8x384xf32> to vector<8x128xf32>
    %426 = vector.extract_strided_slice %378 {offsets = [0, 256], sizes = [8, 128], strides = [1, 1]} : vector<8x384xf32> to vector<8x128xf32>
    %427 = arith.addf %426, %42 : vector<8x128xf32>
    %428 = arith.mulf %416, %427 : vector<8x128xf32>
    %429 = arith.addf %425, %428 : vector<8x128xf32>
    %430 = math.tanh %429 : vector<8x128xf32>
    %cst_98 = arith.constant 1.000000e+00 : f32
    %431 = vector.broadcast %cst_98 : f32 to vector<8x128xf32>
    %432 = arith.subf %431, %424 : vector<8x128xf32>
    %433 = arith.mulf %432, %430 : vector<8x128xf32>
    %434 = arith.mulf %424, %370 : vector<8x128xf32>
    %435 = arith.addf %433, %434 : vector<8x128xf32>
    %436 = vector.extract_strided_slice %39 {offsets = [48, 0], sizes = [8, 384], strides = [1, 1]} : vector<64x384xf32> to vector<8x384xf32>
    %437 = tpu.concatenate %405, %43 in 1 : vector<8x128xf32>, vector<8x128xf32> -> vector<8x256xf32>
    %438 = tpu.concatenate %43, %435 in 1 : vector<8x128xf32>, vector<8x128xf32> -> vector<8x256xf32>
    %439 = tpu.concatenate %437, %438 in 0 : vector<8x256xf32>, vector<8x256xf32> -> vector<16x256xf32>
    %c0_99 = arith.constant 0 : index
    %c384_100 = arith.constant 384 : index
    %440 = vector.load %arg13[%c0_99, %c384_100] : memref<256x768xf32, #tpu.memory_space<vmem>>, vector<256x384xf32>
    %cst_101 = arith.constant dense<0.000000e+00> : vector<16x384xf32>
    %441 = tpu.matmul %439, %440, %cst_101 {dimension_numbers = #tpu.dot_dimension_numbers<[1], [0], [0], [1], [0, 0, 1, 1], [], []>} : vector<16x256xf32>, vector<256x384xf32>, vector<16x384xf32> -> vector<16x384xf32>
    %442 = vector.extract_strided_slice %441 {offsets = [0, 0], sizes = [8, 384], strides = [1, 1]} : vector<16x384xf32> to vector<8x384xf32>
    %443 = vector.extract_strided_slice %441 {offsets = [8, 0], sizes = [8, 384], strides = [1, 1]} : vector<16x384xf32> to vector<8x384xf32>
    %444 = vector.extract_strided_slice %436 {offsets = [0, 0], sizes = [8, 128], strides = [1, 1]} : vector<8x384xf32> to vector<8x128xf32>
    %445 = vector.extract_strided_slice %442 {offsets = [0, 0], sizes = [8, 128], strides = [1, 1]} : vector<8x384xf32> to vector<8x128xf32>
    %446 = arith.addf %444, %445 : vector<8x128xf32>
    %447 = arith.negf %446 : vector<8x128xf32>
    %448 = math.exp %447 : vector<8x128xf32>
    %cst_102 = arith.constant 1.000000e+00 : f32
    %449 = vector.broadcast %cst_102 : f32 to vector<8x128xf32>
    %450 = arith.addf %449, %448 : vector<8x128xf32>
    %451 = arith.divf %449, %450 : vector<8x128xf32>
    %452 = vector.extract_strided_slice %436 {offsets = [0, 128], sizes = [8, 128], strides = [1, 1]} : vector<8x384xf32> to vector<8x128xf32>
    %453 = vector.extract_strided_slice %442 {offsets = [0, 128], sizes = [8, 128], strides = [1, 1]} : vector<8x384xf32> to vector<8x128xf32>
    %454 = arith.addf %452, %453 : vector<8x128xf32>
    %455 = arith.negf %454 : vector<8x128xf32>
    %456 = math.exp %455 : vector<8x128xf32>
    %cst_103 = arith.constant 1.000000e+00 : f32
    %457 = vector.broadcast %cst_103 : f32 to vector<8x128xf32>
    %458 = arith.addf %457, %456 : vector<8x128xf32>
    %459 = arith.divf %457, %458 : vector<8x128xf32>
    %460 = vector.extract_strided_slice %436 {offsets = [0, 256], sizes = [8, 128], strides = [1, 1]} : vector<8x384xf32> to vector<8x128xf32>
    %461 = vector.extract_strided_slice %442 {offsets = [0, 256], sizes = [8, 128], strides = [1, 1]} : vector<8x384xf32> to vector<8x128xf32>
    %462 = arith.addf %461, %40 : vector<8x128xf32>
    %463 = arith.mulf %451, %462 : vector<8x128xf32>
    %464 = arith.addf %460, %463 : vector<8x128xf32>
    %465 = math.tanh %464 : vector<8x128xf32>
    %cst_104 = arith.constant 1.000000e+00 : f32
    %466 = vector.broadcast %cst_104 : f32 to vector<8x128xf32>
    %467 = arith.subf %466, %459 : vector<8x128xf32>
    %468 = arith.mulf %467, %465 : vector<8x128xf32>
    %469 = arith.mulf %459, %405 : vector<8x128xf32>
    %470 = arith.addf %468, %469 : vector<8x128xf32>
    %c0_105 = arith.constant 0 : index
    %c0_106 = arith.constant 0 : index
    %471 = vector.load %arg14[%c0_105, %c0_106] : memref<128x512xf32, #tpu.memory_space<vmem>>, vector<128x384xf32>
    %cst_107 = arith.constant dense<0.000000e+00> : vector<8x384xf32>
    %472 = tpu.matmul %470, %471, %cst_107 {dimension_numbers = #tpu.dot_dimension_numbers<[1], [0], [0], [1], [0, 0, 1, 1], [], []>} : vector<8x128xf32>, vector<128x384xf32>, vector<8x384xf32> -> vector<8x384xf32>
    %473 = arith.addf %472, %41 : vector<8x384xf32>
    %474 = vector.extract_strided_slice %473 {offsets = [0, 0], sizes = [8, 128], strides = [1, 1]} : vector<8x384xf32> to vector<8x128xf32>
    %475 = vector.extract_strided_slice %443 {offsets = [0, 0], sizes = [8, 128], strides = [1, 1]} : vector<8x384xf32> to vector<8x128xf32>
    %476 = arith.addf %474, %475 : vector<8x128xf32>
    %477 = arith.negf %476 : vector<8x128xf32>
    %478 = math.exp %477 : vector<8x128xf32>
    %cst_108 = arith.constant 1.000000e+00 : f32
    %479 = vector.broadcast %cst_108 : f32 to vector<8x128xf32>
    %480 = arith.addf %479, %478 : vector<8x128xf32>
    %481 = arith.divf %479, %480 : vector<8x128xf32>
    %482 = vector.extract_strided_slice %473 {offsets = [0, 128], sizes = [8, 128], strides = [1, 1]} : vector<8x384xf32> to vector<8x128xf32>
    %483 = vector.extract_strided_slice %443 {offsets = [0, 128], sizes = [8, 128], strides = [1, 1]} : vector<8x384xf32> to vector<8x128xf32>
    %484 = arith.addf %482, %483 : vector<8x128xf32>
    %485 = arith.negf %484 : vector<8x128xf32>
    %486 = math.exp %485 : vector<8x128xf32>
    %cst_109 = arith.constant 1.000000e+00 : f32
    %487 = vector.broadcast %cst_109 : f32 to vector<8x128xf32>
    %488 = arith.addf %487, %486 : vector<8x128xf32>
    %489 = arith.divf %487, %488 : vector<8x128xf32>
    %490 = vector.extract_strided_slice %473 {offsets = [0, 256], sizes = [8, 128], strides = [1, 1]} : vector<8x384xf32> to vector<8x128xf32>
    %491 = vector.extract_strided_slice %443 {offsets = [0, 256], sizes = [8, 128], strides = [1, 1]} : vector<8x384xf32> to vector<8x128xf32>
    %492 = arith.addf %491, %42 : vector<8x128xf32>
    %493 = arith.mulf %481, %492 : vector<8x128xf32>
    %494 = arith.addf %490, %493 : vector<8x128xf32>
    %495 = math.tanh %494 : vector<8x128xf32>
    %cst_110 = arith.constant 1.000000e+00 : f32
    %496 = vector.broadcast %cst_110 : f32 to vector<8x128xf32>
    %497 = arith.subf %496, %489 : vector<8x128xf32>
    %498 = arith.mulf %497, %495 : vector<8x128xf32>
    %499 = arith.mulf %489, %435 : vector<8x128xf32>
    %500 = arith.addf %498, %499 : vector<8x128xf32>
    %501 = vector.extract_strided_slice %39 {offsets = [56, 0], sizes = [8, 384], strides = [1, 1]} : vector<64x384xf32> to vector<8x384xf32>
    %502 = tpu.concatenate %470, %43 in 1 : vector<8x128xf32>, vector<8x128xf32> -> vector<8x256xf32>
    %503 = tpu.concatenate %43, %500 in 1 : vector<8x128xf32>, vector<8x128xf32> -> vector<8x256xf32>
    %504 = tpu.concatenate %502, %503 in 0 : vector<8x256xf32>, vector<8x256xf32> -> vector<16x256xf32>
    %c0_111 = arith.constant 0 : index
    %c384_112 = arith.constant 384 : index
    %505 = vector.load %arg13[%c0_111, %c384_112] : memref<256x768xf32, #tpu.memory_space<vmem>>, vector<256x384xf32>
    %cst_113 = arith.constant dense<0.000000e+00> : vector<16x384xf32>
    %506 = tpu.matmul %504, %505, %cst_113 {dimension_numbers = #tpu.dot_dimension_numbers<[1], [0], [0], [1], [0, 0, 1, 1], [], []>} : vector<16x256xf32>, vector<256x384xf32>, vector<16x384xf32> -> vector<16x384xf32>
    %507 = vector.extract_strided_slice %506 {offsets = [0, 0], sizes = [8, 384], strides = [1, 1]} : vector<16x384xf32> to vector<8x384xf32>
    %508 = vector.extract_strided_slice %506 {offsets = [8, 0], sizes = [8, 384], strides = [1, 1]} : vector<16x384xf32> to vector<8x384xf32>
    %509 = vector.extract_strided_slice %501 {offsets = [0, 0], sizes = [8, 128], strides = [1, 1]} : vector<8x384xf32> to vector<8x128xf32>
    %510 = vector.extract_strided_slice %507 {offsets = [0, 0], sizes = [8, 128], strides = [1, 1]} : vector<8x384xf32> to vector<8x128xf32>
    %511 = arith.addf %509, %510 : vector<8x128xf32>
    %512 = arith.negf %511 : vector<8x128xf32>
    %513 = math.exp %512 : vector<8x128xf32>
    %cst_114 = arith.constant 1.000000e+00 : f32
    %514 = vector.broadcast %cst_114 : f32 to vector<8x128xf32>
    %515 = arith.addf %514, %513 : vector<8x128xf32>
    %516 = arith.divf %514, %515 : vector<8x128xf32>
    %517 = vector.extract_strided_slice %501 {offsets = [0, 128], sizes = [8, 128], strides = [1, 1]} : vector<8x384xf32> to vector<8x128xf32>
    %518 = vector.extract_strided_slice %507 {offsets = [0, 128], sizes = [8, 128], strides = [1, 1]} : vector<8x384xf32> to vector<8x128xf32>
    %519 = arith.addf %517, %518 : vector<8x128xf32>
    %520 = arith.negf %519 : vector<8x128xf32>
    %521 = math.exp %520 : vector<8x128xf32>
    %cst_115 = arith.constant 1.000000e+00 : f32
    %522 = vector.broadcast %cst_115 : f32 to vector<8x128xf32>
    %523 = arith.addf %522, %521 : vector<8x128xf32>
    %524 = arith.divf %522, %523 : vector<8x128xf32>
    %525 = vector.extract_strided_slice %501 {offsets = [0, 256], sizes = [8, 128], strides = [1, 1]} : vector<8x384xf32> to vector<8x128xf32>
    %526 = vector.extract_strided_slice %507 {offsets = [0, 256], sizes = [8, 128], strides = [1, 1]} : vector<8x384xf32> to vector<8x128xf32>
    %527 = arith.addf %526, %40 : vector<8x128xf32>
    %528 = arith.mulf %516, %527 : vector<8x128xf32>
    %529 = arith.addf %525, %528 : vector<8x128xf32>
    %530 = math.tanh %529 : vector<8x128xf32>
    %cst_116 = arith.constant 1.000000e+00 : f32
    %531 = vector.broadcast %cst_116 : f32 to vector<8x128xf32>
    %532 = arith.subf %531, %524 : vector<8x128xf32>
    %533 = arith.mulf %532, %530 : vector<8x128xf32>
    %534 = arith.mulf %524, %470 : vector<8x128xf32>
    %535 = arith.addf %533, %534 : vector<8x128xf32>
    %c0_117 = arith.constant 0 : index
    %c0_118 = arith.constant 0 : index
    %536 = vector.load %arg14[%c0_117, %c0_118] : memref<128x512xf32, #tpu.memory_space<vmem>>, vector<128x384xf32>
    %cst_119 = arith.constant dense<0.000000e+00> : vector<8x384xf32>
    %537 = tpu.matmul %535, %536, %cst_119 {dimension_numbers = #tpu.dot_dimension_numbers<[1], [0], [0], [1], [0, 0, 1, 1], [], []>} : vector<8x128xf32>, vector<128x384xf32>, vector<8x384xf32> -> vector<8x384xf32>
    %538 = arith.addf %537, %41 : vector<8x384xf32>
    %539 = vector.extract_strided_slice %538 {offsets = [0, 0], sizes = [8, 128], strides = [1, 1]} : vector<8x384xf32> to vector<8x128xf32>
    %540 = vector.extract_strided_slice %508 {offsets = [0, 0], sizes = [8, 128], strides = [1, 1]} : vector<8x384xf32> to vector<8x128xf32>
    %541 = arith.addf %539, %540 : vector<8x128xf32>
    %542 = arith.negf %541 : vector<8x128xf32>
    %543 = math.exp %542 : vector<8x128xf32>
    %cst_120 = arith.constant 1.000000e+00 : f32
    %544 = vector.broadcast %cst_120 : f32 to vector<8x128xf32>
    %545 = arith.addf %544, %543 : vector<8x128xf32>
    %546 = arith.divf %544, %545 : vector<8x128xf32>
    %547 = vector.extract_strided_slice %538 {offsets = [0, 128], sizes = [8, 128], strides = [1, 1]} : vector<8x384xf32> to vector<8x128xf32>
    %548 = vector.extract_strided_slice %508 {offsets = [0, 128], sizes = [8, 128], strides = [1, 1]} : vector<8x384xf32> to vector<8x128xf32>
    %549 = arith.addf %547, %548 : vector<8x128xf32>
    %550 = arith.negf %549 : vector<8x128xf32>
    %551 = math.exp %550 : vector<8x128xf32>
    %cst_121 = arith.constant 1.000000e+00 : f32
    %552 = vector.broadcast %cst_121 : f32 to vector<8x128xf32>
    %553 = arith.addf %552, %551 : vector<8x128xf32>
    %554 = arith.divf %552, %553 : vector<8x128xf32>
    %555 = vector.extract_strided_slice %538 {offsets = [0, 256], sizes = [8, 128], strides = [1, 1]} : vector<8x384xf32> to vector<8x128xf32>
    %556 = vector.extract_strided_slice %508 {offsets = [0, 256], sizes = [8, 128], strides = [1, 1]} : vector<8x384xf32> to vector<8x128xf32>
    %557 = arith.addf %556, %42 : vector<8x128xf32>
    %558 = arith.mulf %546, %557 : vector<8x128xf32>
    %559 = arith.addf %555, %558 : vector<8x128xf32>
    %560 = math.tanh %559 : vector<8x128xf32>
    %cst_122 = arith.constant 1.000000e+00 : f32
    %561 = vector.broadcast %cst_122 : f32 to vector<8x128xf32>
    %562 = arith.subf %561, %554 : vector<8x128xf32>
    %563 = arith.mulf %562, %560 : vector<8x128xf32>
    %564 = arith.mulf %554, %500 : vector<8x128xf32>
    %565 = arith.addf %563, %564 : vector<8x128xf32>
    %c0_123 = arith.constant 0 : index
    %c384_124 = arith.constant 384 : index
    %566 = vector.load %arg14[%c0_123, %c384_124] : memref<128x512xf32, #tpu.memory_space<vmem>>, vector<128x128xf32>
    %cst_125 = arith.constant dense<0.000000e+00> : vector<8x128xf32>
    %567 = tpu.matmul %565, %566, %cst_125 {dimension_numbers = #tpu.dot_dimension_numbers<[1], [0], [0], [1], [0, 0, 1, 1], [], []>} : vector<8x128xf32>, vector<128x128xf32>, vector<8x128xf32> -> vector<8x128xf32>
    %c0_126 = arith.constant 0 : index
    %c0_127 = arith.constant 0 : index
    %568 = vector.load %arg9[%c0_126, %c0_127] : memref<8x128xf32, #tpu.memory_space<vmem>>, vector<8x128xf32>
    %569 = arith.addf %567, %568 : vector<8x128xf32>
    %c0_128 = arith.constant 0 : index
    %c0_129 = arith.constant 0 : index
    %570 = vector.load %arg12[%c0_128, %c0_129] : memref<8x128xf32, #tpu.memory_space<vmem>>, vector<8x128xf32>
    tpu.vector_store %arg12[%c0_128, %c0_129], %569 {strides = array<i32>} : memref<8x128xf32, #tpu.memory_space<vmem>>, vector<8x128xf32>,
    return
  }
}

</mosaic_0001>

<bundles_post_ra>
// kernel: mygru_forward.1
= control target key start
LH: loop header
LB: loop body
LE: loop exit
PB: predicated region body
PF: predicated region fallthrough
CT: control target
= control target key end

     0   :  { %17 = vsyncpa [#allocation6], 0  ;;  %s9346_s0 = inlined_call_operand.vmem [shape: f32[64,768], index: 0, kind: input, shape index: {}]   ;;  %s9347_s1 = inlined_call_operand.hbm [shape: f32[768,256], index: 1, kind: input, shape index: {}]   ;;  %s9348_s2 = inlined_call_operand.hbm [shape: f32[1,256], index: 2, kind: input, shape index: {}]   ;;  %s9349_s3 = inlined_call_operand.hbm [shape: f32[1,256], index: 3, kind: input, shape index: {}]   ;;  %s9350_s4 = inlined_call_operand.hbm [shape: f32[1,256], index: 4, kind: input, shape index: {}]   ;;  %s9351_s5 = inlined_call_operand.vmem [shape: f32[64,384], index: 5, kind: input, shape index: {}]   ;;  %s9352_s6 = inlined_call_operand.vmem [shape: f32[8,128], index: 6, kind: input, shape index: {}]   ;;  %s9353_s7 = inlined_call_operand.hbm [shape: f32[8,384], index: 7, kind: input, shape index: {}]   ;;  %s9354_s8 = inlined_call_operand.hbm [shape: f32[8,128], index: 8, kind: input, shape index: {}]   ;;  %s9355_s9 = inlined_call_operand.hbm [shape: f32[8,128], index: 9, kind: input, shape index: {}]   ;;  %s9356_s10 = inlined_call_operand.hbm [shape: f32[256,768], index: 10, kind: input, shape index: {}]   ;;  %s9357_s11 = inlined_call_operand.vmem [shape: f32[128,512], index: 11, kind: input, shape index: {}]   ;;  %s9358_s12 = inlined_call_operand.vmem [shape: f32[8,128], index: 12, kind: output, shape index: {}]  }
   0x1   :  { %18 = vsyncpa [#allocation8], 0 }
   0x2   :  { %19 = vsyncpa [#allocation11], 0 }
   0x3   :  { %20 = vsyncpa [#allocation14], 0  ;;  %s7359_s21 = smov [#allocation7]   ;;  %s7360_s23 = smov [#allocation10]  }
   0x4   :  { %s41_s22 = sshll.u32 %s7359_s21, 4  ;;  %s61_s24 = sshll.u32 %s7360_s23, 4  ;;  %s42_s22 = int_to_ptr.vmem [resolvable:$true] %s41_s22  ;;  %s62_s24 = int_to_ptr.vmem [resolvable:$true] %s61_s24 }
   0x5   :  { %s7171_s27 = scalar_lea.hbm %s9348_s2, 32 }
   0x6   :  { %p7172_p0 = scmp.ne.s32.totalorder %s9348_s2, %s7171_s27  ;;  %p7175_p1 = scmp.lt.u32.totalorder %s7171_s27, %s9348_s2 }
   0x8   :  { %p7177_p2 = pnand %p7175_p1, %p7172_p0 }
   0xa   :  { %7180 = shalt.err (!%p7177_p2)
}
   0xb   :  { %s7181_s14 = scalar_lea.vmem %s42_s22, 32  ;;  %p7186_p4 = scmp.lt.s32.totalorder %s42_s22, %s42_s22 }
   0xc   :  { %p7182_p3 = scmp.ne.s32.totalorder %s42_s22, %s7181_s14  ;;  %p7187_p5 = scmp.lt.s32.totalorder %s7181_s14, %s7181_s14 }
   0xe   :  { %p7188_p6 = por %p7187_p5, %p7186_p4 }
  0x10   :  { %p7189_p7 = pnand %p7188_p6, %p7182_p3 }
  0x12   :  { %7192 = shalt.err (!%p7189_p7)
}
  0x13   :  { %44 = dma.hbm_to_vmem [thread:$0]  %s9348_s2, 32, %s42_s22, [#allocation8]  }
  0x14   :  { %s7193_s19 = scalar_lea.hbm %s9350_s4, 32 }
  0x15   :  { %p7194_p8 = scmp.ne.s32.totalorder %s9350_s4, %s7193_s19  ;;  %p7197_p9 = scmp.lt.u32.totalorder %s7193_s19, %s9350_s4 }
  0x17   :  { %p7199_p10 = pnand %p7197_p9, %p7194_p8 }
  0x19   :  { %7202 = shalt.err (!%p7199_p10)
}
  0x1a   :  { %s7203_s26 = scalar_lea.vmem %s62_s24, 32  ;;  %p7208_p12 = scmp.lt.s32.totalorder %s62_s24, %s62_s24 }
  0x1b   :  { %p7204_p11 = scmp.ne.s32.totalorder %s62_s24, %s7203_s26  ;;  %p7209_p13 = scmp.lt.s32.totalorder %s7203_s26, %s7203_s26 }
  0x1d   :  { %p7210_p0 = por %p7209_p13, %p7208_p12 }
  0x1f   :  { %p7211_p1 = pnand %p7210_p0, %p7204_p11 }
  0x21   :  { %7214 = shalt.err (!%p7211_p1)
}
  0x22   :  { %64 = dma.hbm_to_vmem [thread:$0]  %s9350_s4, 32, %s62_s24, [#allocation11]  }
  0x23   :  { %s7361_s27 = smov [#allocation13]   ;;  %s7362_s29 = smov [#allocation5]  }
  0x24   :  { %s85_s28 = sshll.u32 %s7361_s27, 4  ;;  %s28_s30 = sshll.u32 %s7362_s29, 4  ;;  %s86_s28 = int_to_ptr.vmem [resolvable:$true] %s85_s28  ;;  %s7461_s30 = int_to_ptr.vmem [resolvable:$true] %s28_s30 }
  0x25   :  { %s7215_s15 = scalar_lea.hbm %s9354_s8, 128 }
  0x26   :  { %p7216_p2 = scmp.ne.s32.totalorder %s9354_s8, %s7215_s15  ;;  %p7219_p3 = scmp.lt.u32.totalorder %s7215_s15, %s9354_s8 }
  0x28   :  { %p7221_p4 = pnand %p7219_p3, %p7216_p2 }
  0x2a   :  { %7224 = shalt.err (!%p7221_p4)
}
  0x2b   :  { %s7225_s4 = scalar_lea.vmem %s86_s28, 128  ;;  %p7230_p6 = scmp.lt.s32.totalorder %s86_s28, %s86_s28 }
  0x2c   :  { %p7226_p5 = scmp.ne.s32.totalorder %s86_s28, %s7225_s4  ;;  %p7231_p7 = scmp.lt.s32.totalorder %s7225_s4, %s7225_s4 }
  0x2e   :  { %p7232_p8 = por %p7231_p7, %p7230_p6 }
  0x30   :  { %p7233_p9 = pnand %p7232_p8, %p7226_p5 }
  0x32   :  { %7236 = shalt.err (!%p7233_p9)
}
  0x33   :  { %88 = dma.hbm_to_vmem [thread:$0]  %s9354_s8, 128, %s86_s28, [#allocation14]  }
  0x34   :  { %s7237_s25 = scalar_lea.hbm %s9347_s1, 24576 }
  0x35   :  { %p7238_p10 = scmp.ne.s32.totalorder %s9347_s1, %s7237_s25  ;;  %p7241_p11 = scmp.lt.u32.totalorder %s7237_s25, %s9347_s1 }
  0x37   :  { %p7243_p12 = pnand %p7241_p11, %p7238_p10 }
  0x39   :  { %7246 = shalt.err (!%p7243_p12)
}
  0x3a   :  { %s7247_s29 = scalar_lea.vmem %s7461_s30, 24576  ;;  %p7252_p0 = scmp.lt.s32.totalorder %s7461_s30, %s7461_s30 }
  0x3b   :  { %p7248_p13 = scmp.ne.s32.totalorder %s7461_s30, %s7247_s29  ;;  %p7253_p1 = scmp.lt.s32.totalorder %s7247_s29, %s7247_s29 }
  0x3d   :  { %p7254_p2 = por %p7253_p1, %p7252_p0 }
  0x3f   :  { %p7255_p3 = pnand %p7254_p2, %p7248_p13 }
  0x41   :  { %7258 = shalt.err (!%p7255_p3)
}
  0x42   :  { %s7363_s8 = smov 256   ;;  %s7364_s28 = smov 16  }
  0x43   :  { %34 = dma.hbm_to_vmem [thread:$0]  %s9347_s1, 24576, %s7461_s30, [#allocation6], %s7363_s8, %s7363_s8, %s7364_s28  }
  0x44   :  { %s7365_s15 = smov [#allocation9]   ;;  %s7366_s17 = smov [#allocation12]  }
  0x45   :  { %s51_s16 = sshll.u32 %s7365_s15, 4  ;;  %s75_s18 = sshll.u32 %s7366_s17, 4  ;;  %s52_s16 = int_to_ptr.vmem [resolvable:$true] %s51_s16  ;;  %s76_s18 = int_to_ptr.vmem [resolvable:$true] %s75_s18 }
  0x46   :  { %s7259_s24 = scalar_lea.hbm %s9349_s3, 32 }
  0x47   :  { %p7260_p4 = scmp.ne.s32.totalorder %s9349_s3, %s7259_s24  ;;  %p7263_p5 = scmp.lt.u32.totalorder %s7259_s24, %s9349_s3 }
  0x49   :  { %p7265_p6 = pnand %p7263_p5, %p7260_p4 }
  0x4b   :  { %7268 = shalt.err (!%p7265_p6)
}
  0x4c   :  { %s7269_s1 = scalar_lea.vmem %s52_s16, 32  ;;  %p7274_p8 = scmp.lt.s32.totalorder %s52_s16, %s52_s16 }
  0x4d   :  { %p7270_p7 = scmp.ne.s32.totalorder %s52_s16, %s7269_s1  ;;  %p7275_p9 = scmp.lt.s32.totalorder %s7269_s1, %s7269_s1 }
  0x4f   :  { %p7276_p10 = por %p7275_p9, %p7274_p8 }
  0x51   :  { %p7277_p11 = pnand %p7276_p10, %p7270_p7 }
  0x53   :  { %7280 = shalt.err (!%p7277_p11)
}
  0x54   :  { %54 = dma.hbm_to_vmem [thread:$0]  %s9349_s3, 32, %s52_s16, [#allocation8]  }
  0x55   :  { %s7281_s27 = scalar_lea.hbm %s9353_s7, 384 }
  0x56   :  { %p7282_p12 = scmp.ne.s32.totalorder %s9353_s7, %s7281_s27  ;;  %p7285_p13 = scmp.lt.u32.totalorder %s7281_s27, %s9353_s7 }
  0x58   :  { %p7287_p0 = pnand %p7285_p13, %p7282_p12 }
  0x5a   :  { %7290 = shalt.err (!%p7287_p0)
}
  0x5b   :  { %s7291_s14 = scalar_lea.vmem %s76_s18, 384  ;;  %p7296_p2 = scmp.lt.s32.totalorder %s76_s18, %s76_s18 }
  0x5c   :  { %p7292_p1 = scmp.ne.s32.totalorder %s76_s18, %s7291_s14  ;;  %p7297_p3 = scmp.lt.s32.totalorder %s7291_s14, %s7291_s14 }
  0x5e   :  { %p7298_p4 = por %p7297_p3, %p7296_p2 }
  0x60   :  { %p7299_p5 = pnand %p7298_p4, %p7292_p1 }
  0x62   :  { %7302 = shalt.err (!%p7299_p5)
}
  0x63   :  { %78 = dma.hbm_to_vmem [thread:$0]  %s9353_s7, 384, %s76_s18, [#allocation11]  }
  0x64   :  { %s7367_s16 = smov [#allocation15]   ;;  %s7303_s24 = scalar_lea.hbm %s9355_s9, 128 }
  0x65   :  { %s95_s17 = sshll.u32 %s7367_s16, 4  ;;  %p7304_p6 = scmp.ne.s32.totalorder %s9355_s9, %s7303_s24  ;;  %s96_s17 = int_to_ptr.vmem [resolvable:$true] %s95_s17 }
  0x66   :  { %p7307_p7 = scmp.lt.u32.totalorder %s7303_s24, %s9355_s9 }
  0x68   :  { %p7309_p8 = pnand %p7307_p7, %p7304_p6 }
  0x6a   :  { %7312 = shalt.err (!%p7309_p8)
}
  0x6b   :  { %s7313_s1 = scalar_lea.vmem %s96_s17, 128  ;;  %p7318_p10 = scmp.lt.s32.totalorder %s96_s17, %s96_s17 }
  0x6c   :  { %p7314_p9 = scmp.ne.s32.totalorder %s96_s17, %s7313_s1  ;;  %p7319_p11 = scmp.lt.s32.totalorder %s7313_s1, %s7313_s1 }
  0x6e   :  { %p7320_p12 = por %p7319_p11, %p7318_p10 }
  0x70   :  { %p7321_p13 = pnand %p7320_p12, %p7314_p9 }
  0x72   :  { %7324 = shalt.err (!%p7321_p13)
}
  0x73   :  { %98 = dma.hbm_to_vmem [thread:$0]  %s9355_s9, 128, %s96_s17, [#allocation14]  }
  0x74   :  { %7347 = dma.done.wait [#allocation6], 24576  }
  0x75   :  { %7348 = vsyncadd [#allocation6], 4294942720 }
  0x76   :  { %7349 = dma.done.wait [#allocation8], 64  }
  0x77   :  { %7350 = vsyncadd [#allocation8], 4294967232 }
  0x78   :  { %7351 = dma.done.wait [#allocation11], 416  }
  0x79   :  { %7352 = vsyncadd [#allocation11], 4294966880 }
  0x7a   :  { %7353 = dma.done.wait [#allocation14], 256  }
  0x7b   :  { %7354 = vsyncadd [#allocation14], 4294967040  ;;  %s7368_s30 = smov [#allocation2]   ;;  %s7325_s27 = scalar_lea.hbm %s9356_s10, 24576 }
  0x7c   :  { %s127_s26 = sshll.u32 %s7368_s30, 4  ;;  %p7326_p0 = scmp.ne.s32.totalorder %s9356_s10, %s7325_s27  ;;  %s128_s26 = int_to_ptr.vmem [resolvable:$true] %s127_s26 }
  0x7d   :  { %p7329_p1 = scmp.lt.u32.totalorder %s7325_s27, %s9356_s10 }
  0x7f   :  { %p7331_p2 = pnand %p7329_p1, %p7326_p0 }
  0x81   :  { %7334 = shalt.err (!%p7331_p2)  }
  0x82   :  { %s7335_s13 = scalar_lea.vmem %s128_s26, 24576  ;;  %p7340_p4 = scmp.lt.s32.totalorder %s128_s26, %s128_s26 }
  0x83   :  { %p7336_p3 = scmp.ne.s32.totalorder %s128_s26, %s7335_s13  ;;  %p7341_p5 = scmp.lt.s32.totalorder %s7335_s13, %s7335_s13 }
  0x85   :  { %p7342_p6 = por %p7341_p5, %p7340_p4 }
  0x87   :  { %p7343_p7 = pnand %p7342_p6, %p7336_p3 }
  0x89   :  { %7346 = shalt.err (!%p7343_p7)  }
  0x8a   :  { %130 = dma.hbm_to_vmem [thread:$0]  %s9356_s10, 24576, %s128_s26, [#allocation4]  ;;  %v7543_v0 = vld [vmem:[%s9357_s11] sm:$0xff]  ;;  %v7548_v1 = vld [vmem:[%s9357_s11 + $0x8] sm:$0xff]  ;;  %v7553_v2 = vld [vmem:[%s9357_s11 + $0x10] sm:$0xff] }
  0x8b   :  { %v7558_v3 = vld [vmem:[%s9357_s11 + $0x18] sm:$0xff]  ;;  %v7563_v4 = vld [vmem:[%s9357_s11 + $0x20] sm:$0xff]  ;;  %v7568_v5 = vld [vmem:[%s9357_s11 + $0x28] sm:$0xff] }
  0x8c   :  { %9477 = vst [vmem:[#allocation27_spill] sm:$0xff] %v7558_v3  ;;  %v7573_v6 = vld [vmem:[%s9357_s11 + $0x30] sm:$0xff]  ;;  %v7578_v7 = vld [vmem:[%s9357_s11 + $0x38] sm:$0xff]  ;;  %v7583_v8 = vld [vmem:[%s9357_s11 + $0x40] sm:$0xff] }
  0x8d   :  { %9478 = vst [vmem:[#allocation28_spill] sm:$0xff] %v7578_v7  ;;  %v7588_v9 = vld [vmem:[%s9357_s11 + $0x48] sm:$0xff]  ;;  %v7593_v10 = vld [vmem:[%s9357_s11 + $0x50] sm:$0xff]  ;;  %v7598_v11 = vld [vmem:[%s9357_s11 + $0x58] sm:$0xff] }
  0x8e   :  { %9479 = vst [vmem:[#allocation29_spill] sm:$0xff] %v7598_v11  ;;  %v7603_v12 = vld [vmem:[%s9357_s11 + $0x60] sm:$0xff]  ;;  %v7608_v13 = vld [vmem:[%s9357_s11 + $0x68] sm:$0xff]  ;;  %v7613_v14 = vld [vmem:[%s9357_s11 + $0x70] sm:$0xff] }
  0x8f   :  { %v7618_v15 = vld [vmem:[%s9357_s11 + $0x78] sm:$0xff]  ;;  %v7623_v16 = vld [vmem:[%s9357_s11 + $0x80] sm:$0xff]  ;;  %v7628_v17 = vld [vmem:[%s9357_s11 + $0x88] sm:$0xff] }
  0x90   :  { %9480 = vst [vmem:[#allocation30_spill] sm:$0xff] %v7618_v15  ;;  %v7633_v18 = vld [vmem:[%s9357_s11 + $0x90] sm:$0xff]  ;;  %v7638_v19 = vld [vmem:[%s9357_s11 + $0x98] sm:$0xff]  ;;  %v7643_v20 = vld [vmem:[%s9357_s11 + $0xa0] sm:$0xff] }
  0x91   :  { %9481 = vst [vmem:[#allocation31_spill] sm:$0xff] %v7638_v19  ;;  %v7648_v21 = vld [vmem:[%s9357_s11 + $0xa8] sm:$0xff]  ;;  %v7653_v22 = vld [vmem:[%s9357_s11 + $0xb0] sm:$0xff]  ;;  %v7658_v23 = vld [vmem:[%s9357_s11 + $0xb8] sm:$0xff] }
  0x92   :  { %9482 = vst [vmem:[#allocation32_spill] sm:$0xff] %v7658_v23  ;;  %v7663_v24 = vld [vmem:[%s9357_s11 + $0xc0] sm:$0xff]  ;;  %v7668_v25 = vld [vmem:[%s9357_s11 + $0xc8] sm:$0xff]  ;;  %v7673_v26 = vld [vmem:[%s9357_s11 + $0xd0] sm:$0xff] }
  0x93   :  { %9483 = vst [vmem:[#allocation33_spill] sm:$0xff] %v7673_v26  ;;  %v7678_v27 = vld [vmem:[%s9357_s11 + $0xd8] sm:$0xff]  ;;  %v7683_v28 = vld [vmem:[%s9357_s11 + $0xe0] sm:$0xff]  ;;  %v7688_v29 = vld [vmem:[%s9357_s11 + $0xe8] sm:$0xff] }
  0x94   :  { %9484 = vst [vmem:[#allocation34_spill] sm:$0xff] %v7678_v27  ;;  %v7693_v30 = vld [vmem:[%s9357_s11 + $0xf0] sm:$0xff]  ;;  %v7698_v31 = vld [vmem:[%s9357_s11 + $0xf8] sm:$0xff]  ;;  %v7703_v32 = vld [vmem:[%s9357_s11 + $0x100] sm:$0xff] }
  0x95   :  { %9485 = vst [vmem:[#allocation35_spill] sm:$0xff] %v7693_v30  ;;  %9486 = vst [vmem:[#allocation36_spill] sm:$0xff] %v7698_v31  ;;  %v7708_v33 = vld [vmem:[%s9357_s11 + $0x108] sm:$0xff]  ;;  %v7713_v34 = vld [vmem:[%s9357_s11 + $0x110] sm:$0xff] }
  0x96   :  { %9487 = vst [vmem:[#allocation37_spill] sm:$0xff] %v7703_v32  ;;  %9488 = vst [vmem:[#allocation38_spill] sm:$0xff] %v7708_v33  ;;  %v7718_v35 = vld [vmem:[%s9357_s11 + $0x118] sm:$0xff]  ;;  %v7723_v36 = vld [vmem:[%s9357_s11 + $0x120] sm:$0xff] }
  0x97   :  { %9489 = vst [vmem:[#allocation39_spill] sm:$0xff] %v7713_v34  ;;  %9490 = vst [vmem:[#allocation40_spill] sm:$0xff] %v7718_v35  ;;  %v7728_v37 = vld [vmem:[%s9357_s11 + $0x128] sm:$0xff]  ;;  %v7733_v38 = vld [vmem:[%s9357_s11 + $0x130] sm:$0xff] }
  0x98   :  { %9491 = vst [vmem:[#allocation41_spill] sm:$0xff] %v7723_v36  ;;  %9492 = vst [vmem:[#allocation42_spill] sm:$0xff] %v7728_v37  ;;  %v7738_v39 = vld [vmem:[%s9357_s11 + $0x138] sm:$0xff]  ;;  %v7743_v40 = vld [vmem:[%s9357_s11 + $0x140] sm:$0xff] }
  0x99   :  { %9493 = vst [vmem:[#allocation43_spill] sm:$0xff] %v7733_v38  ;;  %9494 = vst [vmem:[#allocation44_spill] sm:$0xff] %v7738_v39  ;;  %v7748_v41 = vld [vmem:[%s9357_s11 + $0x148] sm:$0xff]  ;;  %v7753_v42 = vld [vmem:[%s9357_s11 + $0x150] sm:$0xff] }
  0x9a   :  { %9495 = vst [vmem:[#allocation45_spill] sm:$0xff] %v7743_v40  ;;  %9496 = vst [vmem:[#allocation46_spill] sm:$0xff] %v7748_v41  ;;  %v7758_v43 = vld [vmem:[%s9357_s11 + $0x158] sm:$0xff]  ;;  %v7763_v44 = vld [vmem:[%s9357_s11 + $0x160] sm:$0xff] }
  0x9b   :  { %9497 = vst [vmem:[#allocation47_spill] sm:$0xff] %v7753_v42  ;;  %9498 = vst [vmem:[#allocation48_spill] sm:$0xff] %v7758_v43  ;;  %v7768_v45 = vld [vmem:[%s9357_s11 + $0x168] sm:$0xff]  ;;  %v7773_v46 = vld [vmem:[%s9357_s11 + $0x170] sm:$0xff] }
  0x9c   :  { %9499 = vst [vmem:[#allocation49_spill] sm:$0xff] %v7763_v44  ;;  %9500 = vst [vmem:[#allocation50_spill] sm:$0xff] %v7768_v45  ;;  %v7778_v47 = vld [vmem:[%s9357_s11 + $0x178] sm:$0xff]  ;;  %v7783_v48 = vld [vmem:[%s9357_s11 + $0x180] sm:$0xff] }
  0x9d   :  { %9501 = vst [vmem:[#allocation51_spill] sm:$0xff] %v7773_v46  ;;  %9502 = vst [vmem:[#allocation52_spill] sm:$0xff] %v7778_v47  ;;  %v7788_v49 = vld [vmem:[%s9357_s11 + $0x188] sm:$0xff]  ;;  %v7793_v50 = vld [vmem:[%s9357_s11 + $0x190] sm:$0xff] }
  0x9e   :  { %9503 = vst [vmem:[#allocation53_spill] sm:$0xff] %v7783_v48  ;;  %9504 = vst [vmem:[#allocation54_spill] sm:$0xff] %v7788_v49  ;;  %v7798_v51 = vld [vmem:[%s9357_s11 + $0x198] sm:$0xff]  ;;  %v7803_v52 = vld [vmem:[%s9357_s11 + $0x1a0] sm:$0xff] }
  0x9f   :  { %9505 = vst [vmem:[#allocation55_spill] sm:$0xff] %v7793_v50  ;;  %9506 = vst [vmem:[#allocation56_spill] sm:$0xff] %v7798_v51  ;;  %v7808_v53 = vld [vmem:[%s9357_s11 + $0x1a8] sm:$0xff]  ;;  %v7813_v54 = vld [vmem:[%s9357_s11 + $0x1b0] sm:$0xff] }
  0xa0   :  { %9507 = vst [vmem:[#allocation57_spill] sm:$0xff] %v7803_v52  ;;  %9508 = vst [vmem:[#allocation58_spill] sm:$0xff] %v7808_v53  ;;  %v7818_v55 = vld [vmem:[%s9357_s11 + $0x1b8] sm:$0xff]  ;;  %v7823_v56 = vld [vmem:[%s9357_s11 + $0x1c0] sm:$0xff] }
  0xa1   :  { %9509 = vst [vmem:[#allocation59_spill] sm:$0xff] %v7813_v54  ;;  %9510 = vst [vmem:[#allocation60_spill] sm:$0xff] %v7818_v55  ;;  %v7828_v57 = vld [vmem:[%s9357_s11 + $0x1c8] sm:$0xff]  ;;  %v7833_v58 = vld [vmem:[%s9357_s11 + $0x1d0] sm:$0xff] }
  0xa2   :  { %9511 = vst [vmem:[#allocation61_spill] sm:$0xff] %v7823_v56  ;;  %9512 = vst [vmem:[#allocation62_spill] sm:$0xff] %v7828_v57  ;;  %v7838_v59 = vld [vmem:[%s9357_s11 + $0x1d8] sm:$0xff]  ;;  %v7843_v60 = vld [vmem:[%s9357_s11 + $0x1e0] sm:$0xff] }
  0xa3   :  { %9513 = vst [vmem:[#allocation63_spill] sm:$0xff] %v7833_v58  ;;  %9514 = vst [vmem:[#allocation64_spill] sm:$0xff] %v7838_v59  ;;  %v7848_v61 = vld [vmem:[%s9357_s11 + $0x1e8] sm:$0xff]  ;;  %v7853_v62 = vld [vmem:[%s9357_s11 + $0x1f0] sm:$0xff] }
  0xa4   :  { %9515 = vst [vmem:[#allocation65_spill] sm:$0xff] %v7843_v60  ;;  %9516 = vst [vmem:[#allocation66_spill] sm:$0xff] %v7848_v61  ;;  %v7858_v63 = vld [vmem:[%s9357_s11 + $0x1f8] sm:$0xff] }
  0xa5   :  { %9517 = vst [vmem:[#allocation67_spill] sm:$0xff] %v7853_v62  ;;  %9518 = vst [vmem:[#allocation68_spill] sm:$0xff] %v7858_v63 }
  0xa6   :  { %299 = vsyncadd [#allocation4 + $0x1], 8192  ;;  %v349_v59 = vld [vmem:[#allocation5 + $0x8] sm:$0xff]  ;;  %v351_v55 = vld [vmem:[#allocation5 + $0x18] sm:$0xff] }
  0xa7   :  { %v5342_v51 = vpack.c.bf16 %v351_v55, %v349_v59  ;;  %v348_v47 = vld [vmem:[#allocation5] sm:$0xff]  ;;  %v350_v43 = vld [vmem:[#allocation5 + $0x10] sm:$0xff]  ;;  %v353_v39 = vld [vmem:[#allocation5 + $0x28] sm:$0xff] }
  0xa8   :  { %v5344_v35 = vpack.c.bf16 %v350_v43, %v348_v47  ;;  %v355_v31 = vld [vmem:[#allocation5 + $0x38] sm:$0xff]  ;;  %v352_v27 = vld [vmem:[#allocation5 + $0x20] sm:$0xff]  ;;  %v354_v23 = vld [vmem:[#allocation5 + $0x30] sm:$0xff] }
  0xa9   :  { %5343 = vmatprep.subr.bf16.mxu0 %v5342_v51  ;;  %v5346_v19 = vpack.c.bf16 %v355_v31, %v353_v39  ;;  %v357_v15 = vld [vmem:[#allocation5 + $0x48] sm:$0xff]  ;;  %v359_v11 = vld [vmem:[#allocation5 + $0x58] sm:$0xff]  ;;  %v5348_v7 = vpack.c.bf16 %v354_v23, %v352_v27  ;;  %v356_v63 = vld [vmem:[#allocation5 + $0x40] sm:$0xff] }
  0xaa   :  { %5345 = vmatpush1.bf16.msra.mxu0 %v5344_v35  ;;  %v5350_v3 = vpack.c.bf16 %v359_v11, %v357_v15  ;;  %v358_v62 = vld [vmem:[#allocation5 + $0x50] sm:$0xff]  ;;  %v361_v58 = vld [vmem:[#allocation5 + $0x68] sm:$0xff]  ;;  %v363_v60 = vld [vmem:[#allocation5 + $0x78] sm:$0xff] }
  0xab   :  { %5347 = vmatprep.subr.bf16.mxu0 %v5346_v19  ;;  %v5352_v55 = vpack.c.bf16 %v358_v62, %v356_v63  ;;  %v5354_v59 = vpack.c.bf16 %v363_v60, %v361_v58  ;;  %v360_v43 = vld [vmem:[#allocation5 + $0x60] sm:$0xff]  ;;  %v362_v47 = vld [vmem:[#allocation5 + $0x70] sm:$0xff]  ;;  %v365_v56 = vld [vmem:[#allocation5 + $0x88] sm:$0xff] }
  0xac   :  { %v367_v54 = vld [vmem:[#allocation5 + $0x98] sm:$0xff]  ;;  %v5356_v31 = vpack.c.bf16 %v362_v47, %v360_v43  ;;  %v364_v35 = vld [vmem:[#allocation5 + $0x80] sm:$0xff]  ;;  %v366_v23 = vld [vmem:[#allocation5 + $0x90] sm:$0xff] }
  0xad   :  { %v5358_v39 = vpack.c.bf16 %v367_v54, %v365_v56  ;;  %v369_v19 = vld [vmem:[#allocation5 + $0xa8] sm:$0xff]  ;;  %v371_v11 = vld [vmem:[#allocation5 + $0xb8] sm:$0xff]  ;;  %v5360_v15 = vpack.c.bf16 %v366_v23, %v364_v35  ;;  %v370_v51 = vld [vmem:[#allocation5 + $0xb0] sm:$0xff] }
  0xae   :  { %5349 = vmatpush1.bf16.msra.mxu0 %v5348_v7  ;;  %v5362_v27 = vpack.c.bf16 %v371_v11, %v369_v19  ;;  %v368_v7 = vld [vmem:[#allocation5 + $0xa0] sm:$0xff]  ;;  %v375_v58 = vld [vmem:[#allocation5 + $0xd8] sm:$0xff]  ;;  %v301_v54 = vld [vmem:[%s9346_s0 + $0x8] sm:$0xff] }
  0xaf   :  { %5351 = vmatprep.subr.bf16.mxu0 %v5350_v3  ;;  %v373_v3 = vld [vmem:[#allocation5 + $0xc8] sm:$0xff]  ;;  %v5364_v60 = vpack.c.bf16 %v370_v51, %v368_v7  ;;  %v372_v63 = vld [vmem:[#allocation5 + $0xc0] sm:$0xff]  ;;  %616 = vmatprep.mubr.f32.mxu0 %v301_v54  ;;  %v383_v23 = vld [vmem:[#allocation5 + $0x118] sm:$0xff] }
  0xb0   :  { %v5366_v62 = vpack.c.bf16 %v375_v58, %v373_v3  ;;  %v377_v56 = vld [vmem:[#allocation5 + $0xe8] sm:$0xff]  ;;  %v387_v51 = vld [vmem:[#allocation5 + $0x138] sm:$0xff] }
  0xb1   :  { %v381_v35 = vld [vmem:[#allocation5 + $0x108] sm:$0xff] }
  0xb2   :  { %5353 = vmatpush1.bf16.msra.mxu0 %v5352_v55  ;;  %v374_v55 = vld [vmem:[#allocation5 + $0xd0] sm:$0xff]  ;;  %v5374_v11 = vpack.c.bf16 %v383_v23, %v381_v35  ;;  %v385_v7 = vld [vmem:[#allocation5 + $0x128] sm:$0xff]  ;;  %v392_v23 = vld [vmem:[#allocation5 + $0x160] sm:$0xff] }
  0xb3   :  { %5355 = vmatprep.subr.bf16.mxu0 %v5354_v59  ;;  %v379_v59 = vld [vmem:[#allocation5 + $0xf8] sm:$0xff]  ;;  %v5368_v43 = vpack.c.bf16 %v374_v55, %v372_v63  ;;  %v5378_v58 = vpack.c.bf16 %v387_v51, %v385_v7  ;;  %v386_v63 = vld [vmem:[#allocation5 + $0x130] sm:$0xff]  ;;  %v396_v51 = vld [vmem:[#allocation5 + $0x180] sm:$0xff] }
  0xb4   :  { %v5370_v47 = vpack.c.bf16 %v379_v59, %v377_v56  ;;  %v391_v55 = vld [vmem:[#allocation5 + $0x158] sm:$0xff]  ;;  %v388_v59 = vld [vmem:[#allocation5 + $0x140] sm:$0xff] }
  0xb6   :  { %5357 = vmatpush1.bf16.msra.mxu0 %v5356_v31  ;;  %v376_v31 = vld [vmem:[#allocation5 + $0xe0] sm:$0xff] }
  0xb7   :  { %5359 = vmatprep.subr.bf16.mxu0 %v5358_v39  ;;  %v378_v39 = vld [vmem:[#allocation5 + $0xf0] sm:$0xff] }
  0xb8   :  { %v5372_v19 = vpack.c.bf16 %v378_v39, %v376_v31  ;;  %v395_v31 = vld [vmem:[#allocation5 + $0x178] sm:$0xff] }
  0xba   :  { %5361 = vmatpush1.bf16.msra.mxu0 %v5360_v15  ;;  %v380_v15 = vld [vmem:[#allocation5 + $0x100] sm:$0xff] }
  0xbb   :  { %5363 = vmatprep.subr.bf16.mxu0 %v5362_v27  ;;  %v382_v27 = vld [vmem:[#allocation5 + $0x110] sm:$0xff] }
  0xbc   :  { %v5376_v3 = vpack.c.bf16 %v382_v27, %v380_v15  ;;  %v399_v15 = vld [vmem:[#allocation5 + $0x198] sm:$0xff] }
  0xbe   :  { %5365 = vmatpush1.bf16.msra.mxu0 %v5364_v60  ;;  %v384_v60 = vld [vmem:[#allocation5 + $0x120] sm:$0xff] }
  0xbf   :  { %5367 = vmatprep.subr.bf16.mxu0 %v5366_v62  ;;  %v389_v62 = vld [vmem:[#allocation5 + $0x148] sm:$0xff]  ;;  %v5380_v54 = vpack.c.bf16 %v386_v63, %v384_v60  ;;  %v403_v60 = vld [vmem:[#allocation5 + $0x1b8] sm:$0xff] }
  0xc0   :  { %v5382_v56 = vpack.c.bf16 %v391_v55, %v389_v62  ;;  %v400_v55 = vld [vmem:[#allocation5 + $0x1a0] sm:$0xff] }
  0xc2   :  { %5369 = vmatpush1.bf16.msra.mxu0 %v5368_v43  ;;  %v390_v43 = vld [vmem:[#allocation5 + $0x150] sm:$0xff] }
  0xc3   :  { %5371 = vmatprep.subr.bf16.mxu0 %v5370_v47  ;;  %v393_v47 = vld [vmem:[#allocation5 + $0x168] sm:$0xff]  ;;  %v5384_v39 = vpack.c.bf16 %v390_v43, %v388_v59  ;;  %v407_v59 = vld [vmem:[#allocation5 + $0x1d8] sm:$0xff] }
  0xc4   :  { %v5386_v35 = vpack.c.bf16 %v395_v31, %v393_v47  ;;  %v404_v31 = vld [vmem:[#allocation5 + $0x1c0] sm:$0xff] }
  0xc6   :  { %5373 = vmatpush1.bf16.msra.mxu0 %v5372_v19  ;;  %v394_v19 = vld [vmem:[#allocation5 + $0x170] sm:$0xff] }
  0xc7   :  { %5375 = vmatprep.subr.bf16.mxu0 %v5374_v11  ;;  %v397_v11 = vld [vmem:[#allocation5 + $0x188] sm:$0xff]  ;;  %v5388_v27 = vpack.c.bf16 %v394_v19, %v392_v23  ;;  %v411_v23 = vld [vmem:[#allocation5 + $0x1f8] sm:$0xff] }
  0xc8   :  { %v5390_v7 = vpack.c.bf16 %v399_v15, %v397_v11  ;;  %v408_v15 = vld [vmem:[#allocation5 + $0x1e0] sm:$0xff] }
  0xca   :  { %5377 = vmatpush1.bf16.msra.mxu0 %v5376_v3  ;;  %v398_v3 = vld [vmem:[#allocation5 + $0x190] sm:$0xff] }
  0xcb   :  { %5379 = vmatprep.subr.bf16.mxu0 %v5378_v58  ;;  %v401_v58 = vld [vmem:[#allocation5 + $0x1a8] sm:$0xff]  ;;  %v5392_v63 = vpack.c.bf16 %v398_v3, %v396_v51  ;;  %v415_v51 = vld [vmem:[#allocation5 + $0x218] sm:$0xff] }
  0xcc   :  { %v5394_v62 = vpack.c.bf16 %v403_v60, %v401_v58  ;;  %v412_v60 = vld [vmem:[#allocation5 + $0x200] sm:$0xff] }
  0xce   :  { %5381 = vmatpush1.bf16.msra.mxu0 %v5380_v54  ;;  %v402_v54 = vld [vmem:[#allocation5 + $0x1b0] sm:$0xff] }
  0xcf   :  { %5383 = vmatprep.subr.bf16.mxu0 %v5382_v56  ;;  %v405_v56 = vld [vmem:[#allocation5 + $0x1c8] sm:$0xff]  ;;  %v5396_v43 = vpack.c.bf16 %v402_v54, %v400_v55  ;;  %v419_v55 = vld [vmem:[#allocation5 + $0x238] sm:$0xff]  ;;  %v300_v54 = vld [vmem:[%s9346_s0] sm:$0xff] }
  0xd0   :  { %v5398_v47 = vpack.c.bf16 %v407_v59, %v405_v56 }
  0xd2   :  { %5385 = vmatpush1.bf16.msra.mxu0 %v5384_v39  ;;  %v406_v39 = vld [vmem:[#allocation5 + $0x1d0] sm:$0xff] }
  0xd3   :  { %5387 = vmatprep.subr.bf16.mxu0 %v5386_v35  ;;  %v409_v35 = vld [vmem:[#allocation5 + $0x1e8] sm:$0xff]  ;;  %v5400_v19 = vpack.c.bf16 %v406_v39, %v404_v31  ;;  %v307_v31 = vld [vmem:[%s9346_s0 + $0x38] sm:$0xff] }
  0xd4   :  { %v5402_v11 = vpack.c.bf16 %v411_v23, %v409_v35  ;;  %v421_v39 = vld [vmem:[#allocation5 + $0x248] sm:$0xff]  ;;  %v423_v35 = vld [vmem:[#allocation5 + $0x258] sm:$0xff] }
  0xd6   :  { %5389 = vmatpush1.bf16.msra.mxu0 %v5388_v27  ;;  %v410_v27 = vld [vmem:[#allocation5 + $0x1f0] sm:$0xff] }
  0xd7   :  { %5391 = vmatprep.subr.bf16.mxu0 %v5390_v7  ;;  %v413_v7 = vld [vmem:[#allocation5 + $0x208] sm:$0xff]  ;;  %v5404_v3 = vpack.c.bf16 %v410_v27, %v408_v15  ;;  %v420_v15 = vld [vmem:[#allocation5 + $0x240] sm:$0xff]  ;;  %v422_v27 = vld [vmem:[#allocation5 + $0x250] sm:$0xff] }
  0xd8   :  { %v5406_v58 = vpack.c.bf16 %v415_v51, %v413_v7  ;;  %v313_v7 = vld [vmem:[%s9346_s0 + $0x68] sm:$0xff] }
  0xd9   :  { %v425_v51 = vld [vmem:[#allocation5 + $0x268] sm:$0xff] }
  0xda   :  { %5393 = vmatpush1.bf16.msra.mxu0 %v5392_v63  ;;  %v414_v63 = vld [vmem:[#allocation5 + $0x210] sm:$0xff] }
  0xdb   :  { %5395 = vmatprep.subr.bf16.mxu0 %v5394_v62  ;;  %v417_v62 = vld [vmem:[#allocation5 + $0x228] sm:$0xff]  ;;  %v5408_v56 = vpack.c.bf16 %v414_v63, %v412_v60  ;;  %v312_v60 = vld [vmem:[%s9346_s0 + $0x60] sm:$0xff] }
  0xdc   :  { %v5410_v59 = vpack.c.bf16 %v419_v55, %v417_v62  ;;  %v424_v62 = vld [vmem:[#allocation5 + $0x260] sm:$0xff]  ;;  %v426_v55 = vld [vmem:[#allocation5 + $0x270] sm:$0xff] }
  0xde   :  { %5397 = vmatpush1.bf16.msra.mxu0 %v5396_v43  ;;  %v416_v43 = vld [vmem:[#allocation5 + $0x220] sm:$0xff] }
  0xdf   :  { %5399 = vmatprep.subr.bf16.mxu0 %v5398_v47  ;;  %v418_v47 = vld [vmem:[#allocation5 + $0x230] sm:$0xff] }
  0xe0   :  { %v5412_v23 = vpack.c.bf16 %v418_v47, %v416_v43  ;;  %v5420_v43 = vpack.c.bf16 %v426_v55, %v424_v62  ;;  %v318_v47 = vld [vmem:[%s9346_s0 + $0x90] sm:$0xff] }
  0xe1   :  { %v330_v55 = vld [vmem:[%s9346_s0 + $0xf0] sm:$0xff] }
  0xe2   :  { %5401 = vmatpush1.bf16.msra.mxu0 %v5400_v19  ;;  %v306_v19 = vld [vmem:[%s9346_s0 + $0x30] sm:$0xff] }
  0xe3   :  { %5403 = vmatprep.subr.bf16.mxu0 %v5402_v11  ;;  %v5414_v11 = vpack.c.bf16 %v423_v35, %v421_v39  ;;  %v428_v39 = vld [vmem:[#allocation5 + $0x280] sm:$0xff]  ;;  %v430_v35 = vld [vmem:[#allocation5 + $0x290] sm:$0xff] }
  0xe6   :  { %5405 = vmatpush1.bf16.msra.mxu0 %v5404_v3  ;;  %v427_v3 = vld [vmem:[#allocation5 + $0x278] sm:$0xff] }
  0xe7   :  { %5407 = vmatprep.subr.bf16.mxu0 %v5406_v58  ;;  %v5416_v58 = vpack.c.bf16 %v422_v27, %v420_v15  ;;  %v5418_v63 = vpack.c.bf16 %v427_v3, %v425_v51  ;;  %v5424_v15 = vpack.c.bf16 %v430_v35, %v428_v39  ;;  %v324_v27 = vld [vmem:[%s9346_s0 + $0xc0] sm:$0xff]  ;;  %v434_v3 = vld [vmem:[#allocation5 + $0x2b0] sm:$0xff] }
  0xe8   :  { %v432_v51 = vld [vmem:[#allocation5 + $0x2a0] sm:$0xff] }
  0xe9   :  { %617 = vmatmul.mubr.f32.vlgmr.msra.gmra.mrb[0].mxu0 %v300_v54  ;;  %v319_v54 = vld [vmem:[%s9346_s0 + $0x98] sm:$0xff]  ;;  %v5428_v62 = vpack.c.bf16 %v434_v3, %v432_v51  ;;  %v336_v35 = vld [vmem:[%s9346_s0 + $0x120] sm:$0xff]  ;;  %v342_v3 = vld [vmem:[%s9346_s0 + $0x150] sm:$0xff] }
  0xea   :  { %5409 = vmatpush1.bf16.msra.mxu0 %v5408_v56  ;;  %622 = vmatprep.mubr.f32.mxu0 %v307_v31  ;;  %v429_v56 = vld [vmem:[#allocation5 + $0x288] sm:$0xff] }
  0xeb   :  { %5411 = vmatprep.subr.bf16.mxu0 %v5410_v59  ;;  %v431_v59 = vld [vmem:[#allocation5 + $0x298] sm:$0xff] }
  0xec   :  { %v5422_v31 = vpack.c.bf16 %v431_v59, %v429_v56  ;;  %v436_v56 = vld [vmem:[#allocation5 + $0x2c0] sm:$0xff]  ;;  %v438_v59 = vld [vmem:[#allocation5 + $0x2d0] sm:$0xff] }
  0xed   :  { %623 = vmatmul.mubr.f32.gmra.mrb[2].mxu0 %v306_v19  ;;  %v433_v19 = vld [vmem:[#allocation5 + $0x2a8] sm:$0xff]  ;;  %v5432_v39 = vpack.c.bf16 %v438_v59, %v436_v56 }
  0xee   :  { %5413 = vmatpush1.bf16.msra.mxu0 %v5412_v23  ;;  %628 = vmatprep.mubr.f32.mxu0 %v313_v7  ;;  %v325_v23 = vld [vmem:[%s9346_s0 + $0xc8] sm:$0xff] }
  0xef   :  { %5415 = vmatprep.subr.bf16.mxu0 %v5414_v11  ;;  %v435_v11 = vld [vmem:[#allocation5 + $0x2b8] sm:$0xff] }
  0xf0   :  { %v5426_v7 = vpack.c.bf16 %v435_v11, %v433_v19  ;;  %v440_v19 = vld [vmem:[#allocation5 + $0x2e0] sm:$0xff]  ;;  %v442_v11 = vld [vmem:[#allocation5 + $0x2f0] sm:$0xff] }
  0xf1   :  { %629 = vmatmul.mubr.f32.gmra.mrb[4].mxu0 %v312_v60  ;;  %v437_v60 = vld [vmem:[#allocation5 + $0x2c8] sm:$0xff]  ;;  %v5436_v51 = vpack.c.bf16 %v442_v11, %v440_v19  ;;  %v452_v19 = vld [vmem:[#allocation5 + $0x340] sm:$0xff]  ;;  %v454_v11 = vld [vmem:[#allocation5 + $0x350] sm:$0xff] }
  0xf2   :  { %5417 = vmatpush1.bf16.msra.mxu0 %v5416_v58  ;;  %634 = vmatprep.mubr.f32.mxu0 %v319_v54  ;;  %v331_v58 = vld [vmem:[%s9346_s0 + $0xf8] sm:$0xff] }
  0xf3   :  { %5419 = vmatprep.subr.bf16.mxu0 %v5418_v63  ;;  %v439_v63 = vld [vmem:[#allocation5 + $0x2d8] sm:$0xff] }
  0xf4   :  { %v5430_v54 = vpack.c.bf16 %v439_v63, %v437_v60  ;;  %v444_v60 = vld [vmem:[#allocation5 + $0x300] sm:$0xff]  ;;  %v446_v63 = vld [vmem:[#allocation5 + $0x310] sm:$0xff] }
  0xf5   :  { %635 = vmatmul.mubr.f32.gmra.mrb[6].mxu0 %v318_v47  ;;  %v441_v47 = vld [vmem:[#allocation5 + $0x2e8] sm:$0xff]  ;;  %v5440_v56 = vpack.c.bf16 %v446_v63, %v444_v60  ;;  %v458_v60 = vld [vmem:[#allocation5 + $0x370] sm:$0xff]  ;;  %v463_v63 = vld [vmem:[#allocation5 + $0x398] sm:$0xff] }
  0xf6   :  { %5421 = vmatpush1.bf16.msra.mxu0 %v5420_v43  ;;  %640 = vmatprep.mubr.f32.mxu0 %v325_v23  ;;  %v337_v43 = vld [vmem:[%s9346_s0 + $0x128] sm:$0xff] }
  0xf7   :  { %5423 = vmatprep.subr.bf16.mxu0 %v5422_v31  ;;  %v443_v31 = vld [vmem:[#allocation5 + $0x2f8] sm:$0xff] }
  0xf8   :  { %v5434_v23 = vpack.c.bf16 %v443_v31, %v441_v47  ;;  %v450_v47 = vld [vmem:[#allocation5 + $0x330] sm:$0xff]  ;;  %v453_v31 = vld [vmem:[#allocation5 + $0x348] sm:$0xff] }
  0xf9   :  { %641 = vmatmul.mubr.f32.gmra.mrb[8].mxu0 %v324_v27  ;;  %v445_v27 = vld [vmem:[#allocation5 + $0x308] sm:$0xff] }
  0xfa   :  { %5425 = vmatpush1.bf16.msra.mxu0 %v5424_v15  ;;  %646 = vmatprep.mubr.f32.mxu0 %v331_v58  ;;  %v343_v15 = vld [vmem:[%s9346_s0 + $0x158] sm:$0xff] }
  0xfb   :  { %5427 = vmatprep.subr.bf16.mxu0 %v5426_v7  ;;  %v447_v7 = vld [vmem:[#allocation5 + $0x318] sm:$0xff] }
  0xfc   :  { %v5438_v58 = vpack.c.bf16 %v447_v7, %v445_v27  ;;  %v459_v27 = vld [vmem:[#allocation5 + $0x378] sm:$0xff]  ;;  %v5448_v7 = vpack.c.bf16 %v454_v11, %v452_v19 }
  0xfd   :  { %647 = vmatmul.mubr.f32.gmra.mrb[10].mxu0 %v330_v55  ;;  %v449_v55 = vld [vmem:[#allocation5 + $0x328] sm:$0xff]  ;;  %v471_v19 = vld [vmem:[#allocation5 + $0x3d8] sm:$0xff] }
  0xfe   :  { %5429 = vmatpush1.bf16.msra.mxu0 %v5428_v62  ;;  %652 = vmatprep.mubr.f32.mxu0 %v337_v43  ;;  %v303_v62 = vld [vmem:[%s9346_s0 + $0x18] sm:$0xff]  ;;  %v448_v43 = vld [vmem:[#allocation5 + $0x320] sm:$0xff] }
  0xff   :  { %5431 = vmatprep.subr.bf16.mxu0 %v5430_v54  ;;  %v451_v54 = vld [vmem:[#allocation5 + $0x338] sm:$0xff] }
 0x100   :  { %v5442_v59 = vpack.c.bf16 %v451_v54, %v449_v55  ;;  %v460_v54 = vld [vmem:[#allocation5 + $0x380] sm:$0xff] }
 0x101   :  { %653 = vmatmul.mubr.f32.gmra.mrb[12].mxu0 %v336_v35  ;;  %v5444_v35 = vpack.c.bf16 %v450_v47, %v448_v43  ;;  %v467_v43 = vld [vmem:[#allocation5 + $0x3b8] sm:$0xff] }
 0x102   :  { %5433 = vmatpush1.bf16.msra.mxu0 %v5432_v39  ;;  %658 = vmatprep.mubr.f32.mxu0 %v343_v15  ;;  %v455_v39 = vld [vmem:[#allocation5 + $0x358] sm:$0xff]  ;;  %v457_v15 = vld [vmem:[#allocation5 + $0x368] sm:$0xff] }
 0x103   :  { %5435 = vmatprep.subr.bf16.mxu0 %v5434_v23  ;;  %v5446_v23 = vpack.c.bf16 %v455_v39, %v453_v31  ;;  %v464_v39 = vld [vmem:[#allocation5 + $0x3a0] sm:$0xff] }
 0x105   :  { %659 = vmatmul.mubr.f32.gmra.mrb[14].mxu0 %v342_v3  ;;  %v456_v3 = vld [vmem:[#allocation5 + $0x360] sm:$0xff] }
 0x106   :  { %5437 = vmatpush1.bf16.msra.mxu0 %v5436_v51  ;;  %729 = vmatprep.mubr.f32.mxu0 %v303_v62  ;;  %v5450_v51 = vpack.c.bf16 %v459_v27, %v457_v15  ;;  %v5452_v62 = vpack.c.bf16 %v458_v60, %v456_v3  ;;  %v468_v27 = vld [vmem:[#allocation5 + $0x3c0] sm:$0xff]  ;;  %v475_v3 = vld [vmem:[#allocation5 + $0x3f8] sm:$0xff] }
 0x107   :  { %5439 = vmatprep.subr.bf16.mxu0 %v5438_v58  ;;  %v461_v58 = vld [vmem:[#allocation5 + $0x388] sm:$0xff] }
 0x108   :  { %v5454_v55 = vpack.c.bf16 %v463_v63, %v461_v58  ;;  %v472_v63 = vld [vmem:[#allocation5 + $0x3e0] sm:$0xff] }
 0x10a   :  { %5441 = vmatpush1.bf16.msra.mxu0 %v5440_v56  ;;  %v462_v56 = vld [vmem:[#allocation5 + $0x390] sm:$0xff] }
 0x10b   :  { %5443 = vmatprep.subr.bf16.mxu0 %v5442_v59  ;;  %v465_v59 = vld [vmem:[#allocation5 + $0x3a8] sm:$0xff]  ;;  %v5456_v47 = vpack.c.bf16 %v462_v56, %v460_v54  ;;  %v479_v54 = vld [vmem:[#allocation5 + $0x418] sm:$0xff] }
 0x10c   :  { %v5458_v31 = vpack.c.bf16 %v467_v43, %v465_v59  ;;  %v476_v43 = vld [vmem:[#allocation5 + $0x400] sm:$0xff] }
 0x10e   :  { %5445 = vmatpush1.bf16.msra.mxu0 %v5444_v35  ;;  %v466_v35 = vld [vmem:[#allocation5 + $0x3b0] sm:$0xff] }
 0x10f   :  { %5447 = vmatprep.subr.bf16.mxu0 %v5446_v23  ;;  %v469_v23 = vld [vmem:[#allocation5 + $0x3c8] sm:$0xff]  ;;  %v5460_v11 = vpack.c.bf16 %v466_v35, %v464_v39  ;;  %v483_v39 = vld [vmem:[#allocation5 + $0x438] sm:$0xff]  ;;  %v302_v35 = vld [vmem:[%s9346_s0 + $0x10] sm:$0xff] }
 0x110   :  { %v5462_v15 = vpack.c.bf16 %v471_v19, %v469_v23 }
 0x112   :  { %5449 = vmatpush1.bf16.msra.mxu0 %v5448_v7  ;;  %v470_v7 = vld [vmem:[#allocation5 + $0x3d0] sm:$0xff] }
 0x113   :  { %5451 = vmatprep.subr.bf16.mxu0 %v5450_v51  ;;  %v473_v51 = vld [vmem:[#allocation5 + $0x3e8] sm:$0xff]  ;;  %v5464_v60 = vpack.c.bf16 %v470_v7, %v468_v27 }
 0x114   :  { %v5466_v58 = vpack.c.bf16 %v475_v3, %v473_v51  ;;  %v309_v27 = vld [vmem:[%s9346_s0 + $0x48] sm:$0xff]  ;;  %v487_v51 = vld [vmem:[#allocation5 + $0x458] sm:$0xff] }
 0x115   :  { %v485_v7 = vld [vmem:[#allocation5 + $0x448] sm:$0xff] }
 0x116   :  { %5453 = vmatpush1.bf16.msra.mxu0 %v5452_v62  ;;  %v474_v62 = vld [vmem:[#allocation5 + $0x3f0] sm:$0xff] }
 0x117   :  { %5455 = vmatprep.subr.bf16.mxu0 %v5454_v55  ;;  %v477_v55 = vld [vmem:[#allocation5 + $0x408] sm:$0xff]  ;;  %v5468_v56 = vpack.c.bf16 %v474_v62, %v472_v63  ;;  %v484_v63 = vld [vmem:[#allocation5 + $0x440] sm:$0xff]  ;;  %v486_v62 = vld [vmem:[#allocation5 + $0x450] sm:$0xff] }
 0x118   :  { %v5470_v59 = vpack.c.bf16 %v479_v54, %v477_v55  ;;  %v315_v55 = vld [vmem:[%s9346_s0 + $0x78] sm:$0xff]  ;;  %v489_v54 = vld [vmem:[#allocation5 + $0x468] sm:$0xff] }
 0x11a   :  { %5457 = vmatpush1.bf16.msra.mxu0 %v5456_v47  ;;  %v478_v47 = vld [vmem:[#allocation5 + $0x410] sm:$0xff] }
 0x11b   :  { %5459 = vmatprep.subr.bf16.mxu0 %v5458_v31  ;;  %v481_v31 = vld [vmem:[#allocation5 + $0x428] sm:$0xff]  ;;  %v5472_v23 = vpack.c.bf16 %v478_v47, %v476_v43  ;;  %v314_v43 = vld [vmem:[%s9346_s0 + $0x70] sm:$0xff] }
 0x11c   :  { %v5474_v19 = vpack.c.bf16 %v483_v39, %v481_v31  ;;  %v488_v31 = vld [vmem:[#allocation5 + $0x460] sm:$0xff]  ;;  %v490_v39 = vld [vmem:[#allocation5 + $0x470] sm:$0xff] }
 0x11e   :  { %5461 = vmatpush1.bf16.msra.mxu0 %v5460_v11  ;;  %v480_v11 = vld [vmem:[#allocation5 + $0x420] sm:$0xff] }
 0x11f   :  { %5463 = vmatprep.subr.bf16.mxu0 %v5462_v15  ;;  %v482_v15 = vld [vmem:[#allocation5 + $0x430] sm:$0xff] }
 0x120   :  { %v5476_v3 = vpack.c.bf16 %v482_v15, %v480_v11  ;;  %v5484_v11 = vpack.c.bf16 %v490_v39, %v488_v31  ;;  %v320_v15 = vld [vmem:[%s9346_s0 + $0xa0] sm:$0xff] }
 0x121   :  { %v332_v39 = vld [vmem:[%s9346_s0 + $0x100] sm:$0xff] }
 0x122   :  { %5465 = vmatpush1.bf16.msra.mxu0 %v5464_v60  ;;  %v308_v60 = vld [vmem:[%s9346_s0 + $0x40] sm:$0xff] }
 0x123   :  { %5467 = vmatprep.subr.bf16.mxu0 %v5466_v58  ;;  %v5478_v58 = vpack.c.bf16 %v487_v51, %v485_v7  ;;  %v492_v7 = vld [vmem:[#allocation5 + $0x480] sm:$0xff]  ;;  %v494_v51 = vld [vmem:[#allocation5 + $0x490] sm:$0xff] }
 0x126   :  { %5469 = vmatpush1.bf16.msra.mxu0 %v5468_v56  ;;  %v491_v56 = vld [vmem:[#allocation5 + $0x478] sm:$0xff] }
 0x127   :  { %5471 = vmatprep.subr.bf16.mxu0 %v5470_v59  ;;  %v5480_v59 = vpack.c.bf16 %v486_v62, %v484_v63  ;;  %v5482_v47 = vpack.c.bf16 %v491_v56, %v489_v54  ;;  %v5488_v63 = vpack.c.bf16 %v494_v51, %v492_v7  ;;  %v326_v62 = vld [vmem:[%s9346_s0 + $0xd0] sm:$0xff]  ;;  %v496_v54 = vld [vmem:[#allocation5 + $0x4a0] sm:$0xff] }
 0x128   :  { %v498_v56 = vld [vmem:[#allocation5 + $0x4b0] sm:$0xff] }
 0x129   :  { %730 = vmatmul.mubr.f32.vlgmr.msra.gmra.mrb[0].mxu0 %v302_v35  ;;  %v321_v35 = vld [vmem:[%s9346_s0 + $0xa8] sm:$0xff]  ;;  %v5492_v31 = vpack.c.bf16 %v498_v56, %v496_v54  ;;  %v338_v51 = vld [vmem:[%s9346_s0 + $0x130] sm:$0xff]  ;;  %v344_v56 = vld [vmem:[%s9346_s0 + $0x160] sm:$0xff] }
 0x12a   :  { %5473 = vmatpush1.bf16.msra.mxu0 %v5472_v23  ;;  %735 = vmatprep.mubr.f32.mxu0 %v309_v27  ;;  %v493_v23 = vld [vmem:[#allocation5 + $0x488] sm:$0xff] }
 0x12b   :  { %5475 = vmatprep.subr.bf16.mxu0 %v5474_v19  ;;  %v495_v19 = vld [vmem:[#allocation5 + $0x498] sm:$0xff] }
 0x12c   :  { %v5486_v27 = vpack.c.bf16 %v495_v19, %v493_v23  ;;  %v500_v23 = vld [vmem:[#allocation5 + $0x4c0] sm:$0xff]  ;;  %v502_v19 = vld [vmem:[#allocation5 + $0x4d0] sm:$0xff] }
 0x12d   :  { %736 = vmatmul.mubr.f32.gmra.mrb[2].mxu0 %v308_v60  ;;  %v497_v60 = vld [vmem:[#allocation5 + $0x4a8] sm:$0xff]  ;;  %v5496_v7 = vpack.c.bf16 %v502_v19, %v500_v23 }
 0x12e   :  { %5477 = vmatpush1.bf16.msra.mxu0 %v5476_v3  ;;  %741 = vmatprep.mubr.f32.mxu0 %v315_v55  ;;  %v327_v3 = vld [vmem:[%s9346_s0 + $0xd8] sm:$0xff] }
 0x12f   :  { %5479 = vmatprep.subr.bf16.mxu0 %v5478_v58  ;;  %v499_v58 = vld [vmem:[#allocation5 + $0x4b8] sm:$0xff] }
 0x130   :  { %v5490_v55 = vpack.c.bf16 %v499_v58, %v497_v60  ;;  %v504_v60 = vld [vmem:[#allocation5 + $0x4e0] sm:$0xff]  ;;  %v506_v58 = vld [vmem:[#allocation5 + $0x4f0] sm:$0xff] }
 0x131   :  { %742 = vmatmul.mubr.f32.gmra.mrb[4].mxu0 %v314_v43  ;;  %v501_v43 = vld [vmem:[#allocation5 + $0x4c8] sm:$0xff]  ;;  %v5500_v54 = vpack.c.bf16 %v506_v58, %v504_v60  ;;  %v516_v60 = vld [vmem:[#allocation5 + $0x540] sm:$0xff]  ;;  %v518_v58 = vld [vmem:[#allocation5 + $0x550] sm:$0xff] }
 0x132   :  { %5481 = vmatpush1.bf16.msra.mxu0 %v5480_v59  ;;  %747 = vmatprep.mubr.f32.mxu0 %v321_v35  ;;  %v333_v59 = vld [vmem:[%s9346_s0 + $0x108] sm:$0xff] }
 0x133   :  { %5483 = vmatprep.subr.bf16.mxu0 %v5482_v47  ;;  %v503_v47 = vld [vmem:[#allocation5 + $0x4d8] sm:$0xff] }
 0x134   :  { %v5494_v35 = vpack.c.bf16 %v503_v47, %v501_v43  ;;  %v508_v43 = vld [vmem:[#allocation5 + $0x500] sm:$0xff]  ;;  %v510_v47 = vld [vmem:[#allocation5 + $0x510] sm:$0xff] }
 0x135   :  { %748 = vmatmul.mubr.f32.gmra.mrb[6].mxu0 %v320_v15  ;;  %v505_v15 = vld [vmem:[#allocation5 + $0x4e8] sm:$0xff]  ;;  %v5504_v23 = vpack.c.bf16 %v510_v47, %v508_v43  ;;  %v522_v43 = vld [vmem:[#allocation5 + $0x570] sm:$0xff]  ;;  %v527_v47 = vld [vmem:[#allocation5 + $0x598] sm:$0xff] }
 0x136   :  { %5485 = vmatpush1.bf16.msra.mxu0 %v5484_v11  ;;  %753 = vmatprep.mubr.f32.mxu0 %v327_v3  ;;  %v339_v11 = vld [vmem:[%s9346_s0 + $0x138] sm:$0xff] }
 0x137   :  { %5487 = vmatprep.subr.bf16.mxu0 %v5486_v27  ;;  %v507_v27 = vld [vmem:[#allocation5 + $0x4f8] sm:$0xff] }
 0x138   :  { %v5498_v3 = vpack.c.bf16 %v507_v27, %v505_v15  ;;  %v514_v15 = vld [vmem:[#allocation5 + $0x530] sm:$0xff]  ;;  %v517_v27 = vld [vmem:[#allocation5 + $0x548] sm:$0xff] }
 0x139   :  { %754 = vmatmul.mubr.f32.gmra.mrb[8].mxu0 %v326_v62  ;;  %v509_v62 = vld [vmem:[#allocation5 + $0x508] sm:$0xff] }
 0x13a   :  { %5489 = vmatpush1.bf16.msra.mxu0 %v5488_v63  ;;  %759 = vmatprep.mubr.f32.mxu0 %v333_v59  ;;  %v345_v63 = vld [vmem:[%s9346_s0 + $0x168] sm:$0xff] }
 0x13b   :  { %5491 = vmatprep.subr.bf16.mxu0 %v5490_v55  ;;  %v511_v55 = vld [vmem:[#allocation5 + $0x518] sm:$0xff] }
 0x13c   :  { %v5502_v59 = vpack.c.bf16 %v511_v55, %v509_v62  ;;  %v523_v62 = vld [vmem:[#allocation5 + $0x578] sm:$0xff]  ;;  %v5512_v55 = vpack.c.bf16 %v518_v58, %v516_v60 }
 0x13d   :  { %760 = vmatmul.mubr.f32.gmra.mrb[10].mxu0 %v332_v39  ;;  %v513_v39 = vld [vmem:[#allocation5 + $0x528] sm:$0xff]  ;;  %v535_v60 = vld [vmem:[#allocation5 + $0x5d8] sm:$0xff] }
 0x13e   :  { %5493 = vmatpush1.bf16.msra.mxu0 %v5492_v31  ;;  %765 = vmatprep.mubr.f32.mxu0 %v339_v11  ;;  %v305_v31 = vld [vmem:[%s9346_s0 + $0x28] sm:$0xff]  ;;  %v512_v11 = vld [vmem:[#allocation5 + $0x520] sm:$0xff] }
 0x13f   :  { %5495 = vmatprep.subr.bf16.mxu0 %v5494_v35  ;;  %v515_v35 = vld [vmem:[#allocation5 + $0x538] sm:$0xff] }
 0x140   :  { %v5506_v19 = vpack.c.bf16 %v515_v35, %v513_v39  ;;  %v524_v35 = vld [vmem:[#allocation5 + $0x580] sm:$0xff] }
 0x141   :  { %766 = vmatmul.mubr.f32.gmra.mrb[12].mxu0 %v338_v51  ;;  %v5508_v51 = vpack.c.bf16 %v514_v15, %v512_v11  ;;  %v531_v11 = vld [vmem:[#allocation5 + $0x5b8] sm:$0xff] }
 0x142   :  { %5497 = vmatpush1.bf16.msra.mxu0 %v5496_v7  ;;  %771 = vmatprep.mubr.f32.mxu0 %v345_v63  ;;  %v519_v7 = vld [vmem:[#allocation5 + $0x558] sm:$0xff]  ;;  %v521_v63 = vld [vmem:[#allocation5 + $0x568] sm:$0xff] }
 0x143   :  { %5499 = vmatprep.subr.bf16.mxu0 %v5498_v3  ;;  %v5510_v3 = vpack.c.bf16 %v519_v7, %v517_v27  ;;  %v528_v7 = vld [vmem:[#allocation5 + $0x5a0] sm:$0xff] }
 0x145   :  { %772 = vmatmul.mubr.f32.gmra.mrb[14].mxu0 %v344_v56  ;;  %v520_v56 = vld [vmem:[#allocation5 + $0x560] sm:$0xff] }
 0x146   :  { %5501 = vmatpush1.bf16.msra.mxu0 %v5500_v54  ;;  %842 = vmatprep.mubr.f32.mxu0 %v305_v31  ;;  %v5514_v54 = vpack.c.bf16 %v523_v62, %v521_v63  ;;  %v5516_v31 = vpack.c.bf16 %v522_v43, %v520_v56  ;;  %v532_v62 = vld [vmem:[#allocation5 + $0x5c0] sm:$0xff]  ;;  %v539_v56 = vld [vmem:[#allocation5 + $0x5f8] sm:$0xff] }
 0x147   :  { %5503 = vmatprep.subr.bf16.mxu0 %v5502_v59  ;;  %v525_v59 = vld [vmem:[#allocation5 + $0x588] sm:$0xff] }
 0x148   :  { %v5518_v39 = vpack.c.bf16 %v527_v47, %v525_v59  ;;  %v536_v47 = vld [vmem:[#allocation5 + $0x5e0] sm:$0xff] }
 0x14a   :  { %5505 = vmatpush1.bf16.msra.mxu0 %v5504_v23  ;;  %v526_v23 = vld [vmem:[#allocation5 + $0x590] sm:$0xff] }
 0x14b   :  { %5507 = vmatprep.subr.bf16.mxu0 %v5506_v19  ;;  %v529_v19 = vld [vmem:[#allocation5 + $0x5a8] sm:$0xff]  ;;  %v5520_v15 = vpack.c.bf16 %v526_v23, %v524_v35  ;;  %v304_v35 = vld [vmem:[%s9346_s0 + $0x20] sm:$0xff]  ;;  %v311_v23 = vld [vmem:[%s9346_s0 + $0x58] sm:$0xff] }
 0x14c   :  { %v5522_v27 = vpack.c.bf16 %v531_v11, %v529_v19  ;;  %v310_v19 = vld [vmem:[%s9346_s0 + $0x50] sm:$0xff]  ;;  %v317_v11 = vld [vmem:[%s9346_s0 + $0x88] sm:$0xff] }
 0x14e   :  { %5509 = vmatpush1.bf16.msra.mxu0 %v5508_v51  ;;  %v530_v51 = vld [vmem:[#allocation5 + $0x5b0] sm:$0xff] }
 0x14f   :  { %5511 = vmatprep.subr.bf16.mxu0 %v5510_v3  ;;  %v533_v3 = vld [vmem:[#allocation5 + $0x5c8] sm:$0xff]  ;;  %v5524_v58 = vpack.c.bf16 %v530_v51, %v528_v7  ;;  %v322_v7 = vld [vmem:[%s9346_s0 + $0xb0] sm:$0xff] }
 0x150   :  { %v5526_v63 = vpack.c.bf16 %v535_v60, %v533_v3  ;;  %v329_v51 = vld [vmem:[%s9346_s0 + $0xe8] sm:$0xff]  ;;  %v328_v3 = vld [vmem:[%s9346_s0 + $0xe0] sm:$0xff]  ;;  %v335_v60 = vld [vmem:[%s9346_s0 + $0x118] sm:$0xff] }
 0x152   :  { %5513 = vmatpush1.bf16.msra.mxu0 %v5512_v55  ;;  %v534_v55 = vld [vmem:[#allocation5 + $0x5d0] sm:$0xff] }
 0x153   :  { %5515 = vmatprep.subr.bf16.mxu0 %v5514_v54  ;;  %v537_v54 = vld [vmem:[#allocation5 + $0x5e8] sm:$0xff]  ;;  %v5528_v43 = vpack.c.bf16 %v534_v55, %v532_v62  ;;  %v340_v62 = vld [vmem:[%s9346_s0 + $0x140] sm:$0xff]  ;;  %v347_v55 = vld [vmem:[%s9346_s0 + $0x178] sm:$0xff] }
 0x154   :  { %v5530_v59 = vpack.c.bf16 %v539_v56, %v537_v54  ;;  %v346_v54 = vld [vmem:[%s9346_s0 + $0x170] sm:$0xff]  ;;  %v542_v56 = vlaneseq }
 0x156   :  { %5517 = vmatpush1.bf16.msra.mxu0 %v5516_v31  ;;  %v538_v31 = vld [vmem:[#allocation5 + $0x5f0] sm:$0xff] }
 0x157   :  { %5519 = vmatprep.subr.bf16.mxu0 %v5518_v39  ;;  %v5532_v39 = vpack.c.bf16 %v538_v31, %v536_v47  ;;  %v540_v47 = vld [vmem:[#allocation7] sm:$0x3] }
 0x15a   :  { %5521 = vmatpush1.bf16.msra.mxu0 %v5520_v15  ;;  %v316_v15 = vld [vmem:[%s9346_s0 + $0x80] sm:$0xff] }
 0x15b   :  { %5523 = vmatprep.subr.bf16.mxu0 %v5522_v27  ;;  %v323_v27 = vld [vmem:[%s9346_s0 + $0xb8] sm:$0xff] }
 0x15e   :  { %5525 = vmatpush1.bf16.msra.mxu0 %v5524_v58  ;;  %v334_v58 = vld [vmem:[%s9346_s0 + $0x110] sm:$0xff] }
 0x15f   :  { %5527 = vmatprep.subr.bf16.mxu0 %v5526_v63  ;;  %v341_v63 = vld [vmem:[%s9346_s0 + $0x148] sm:$0xff] }
 0x162   :  { %5529 = vmatpush1.bf16.msra.mxu0 %v5528_v43  ;;  %v543_v43 = vshrl.u32 %v542_v56, 7 }
 0x163   :  { %5531 = vmatprep.subr.bf16.mxu0 %v5530_v59 }
 0x164   :  { %v8004_v59 = vsub.s32 0, %v543_v43  ;;  %v8006_v31 = vsub.s32 1, %v543_v43 }
 0x166   :  { %5533 = vmatpush1.bf16.msra.mxu0 %v5532_v39  ;;  %v545_v39 = vrot.slane %v540_v47, %v8004_v59 }
 0x169   :  { %843 = vmatmul.mubr.f32.vlgmr.msra.gmra.mrb[0].mxu0 %v304_v35  ;;  %v549_v35 = vrot.slane %v540_v47, %v8006_v31 }
 0x16a   :  { %848 = vmatprep.mubr.f32.mxu0 %v311_v23 }
 0x16d   :  { %849 = vmatmul.mubr.f32.gmra.mrb[2].mxu0 %v310_v19 }
 0x16e   :  { %854 = vmatprep.mubr.f32.mxu0 %v317_v11 }
 0x171   :  { %855 = vmatmul.mubr.f32.gmra.mrb[4].mxu0 %v316_v15 }
 0x172   :  { %860 = vmatprep.mubr.f32.mxu0 %v323_v27 }
 0x175   :  { %861 = vmatmul.mubr.f32.gmra.mrb[6].mxu0 %v322_v7 }
 0x176   :  { %866 = vmatprep.mubr.f32.mxu0 %v329_v51 }
 0x179   :  { %867 = vmatmul.mubr.f32.gmra.mrb[8].mxu0 %v328_v3 }
 0x17a   :  { %872 = vmatprep.mubr.f32.mxu0 %v335_v60 }
 0x17d   :  { %873 = vmatmul.mubr.f32.gmra.mrb[10].mxu0 %v334_v58 }
 0x17e   :  { %878 = vmatprep.mubr.f32.mxu0 %v341_v63 }
 0x181   :  { %879 = vmatmul.mubr.f32.gmra.mrb[12].mxu0 %v340_v62 }
 0x182   :  { %884 = vmatprep.mubr.f32.mxu0 %v347_v55 }
 0x185   :  { %885 = vmatmul.mubr.f32.gmra.mrb[14].mxu0 %v346_v54 }
 0x23c   :  { %v844_v23 = vpop.f32.mrb[0].mxu0 }
 0x23d   :  { %v6870_v19 = vadd.f32 %v844_v23, %v545_v39  ;;  %v846_v11 = vpop.f32.mrb[1].mxu0 }
 0x23e   :  { %v6871_v15 = vadd.f32 %v846_v11, %v549_v35 }
 0x240   :  { %v850_v27 = vpop.f32.mrb[2].mxu0  ;;  %v891_v7 = vadd.f32 %v6871_v15, %v6870_v19 }
 0x241   :  { %v6872_v51 = vadd.f32 %v850_v27, %v545_v39  ;;  %v852_v3 = vpop.f32.mrb[3].mxu0 }
 0x242   :  { %v6873_v60 = vadd.f32 %v852_v3, %v549_v35  ;;  %892 = vadd.xlane.f32.xlu0 %v891_v7 }
 0x244   :  { %v856_v58 = vpop.f32.mrb[4].mxu0  ;;  %v894_v63 = vadd.f32 %v6873_v60, %v6872_v51 }
 0x245   :  { %v6874_v62 = vadd.f32 %v856_v58, %v545_v39  ;;  %v858_v55 = vpop.f32.mrb[5].mxu0 }
 0x246   :  { %v6875_v54 = vadd.f32 %v858_v55, %v549_v35  ;;  %895 = vadd.xlane.f32.xlu0 %v894_v63 }
 0x248   :  { %v862_v56 = vpop.f32.mrb[6].mxu0  ;;  %v897_v43 = vadd.f32 %v6875_v54, %v6874_v62 }
 0x249   :  { %v6876_v50 = vadd.f32 %v862_v56, %v545_v39  ;;  %v864_v47 = vpop.f32.mrb[7].mxu0 }
 0x24a   :  { %v6877_v61 = vadd.f32 %v864_v47, %v549_v35  ;;  %898 = vadd.xlane.f32.xlu1 %v897_v43 }
 0x24c   :  { %v868_v23 = vpop.f32.mrb[8].mxu0  ;;  %v900_v11 = vadd.f32 %v6877_v61, %v6876_v50 }
 0x24d   :  { %v6878_v57 = vadd.f32 %v868_v23, %v545_v39  ;;  %v870_v52 = vpop.f32.mrb[9].mxu0 }
 0x24e   :  { %v6879_v27 = vadd.f32 %v870_v52, %v549_v35  ;;  %901 = vadd.xlane.f32.xlu1 %v900_v11 }
 0x250   :  { %v874_v3 = vpop.f32.mrb[10].mxu0  ;;  %v903_v7 = vadd.f32 %v6879_v27, %v6878_v57 }
 0x251   :  { %v6880_v48 = vadd.f32 %v874_v3, %v545_v39  ;;  %v876_v46 = vpop.f32.mrb[11].mxu0 }
 0x252   :  { %v6881_v58 = vadd.f32 %v876_v46, %v549_v35  ;;  %904 = vadd.xlane.f32.xlu0 %v903_v7 }
 0x254   :  { %v880_v55 = vpop.f32.mrb[12].mxu0  ;;  %v906_v63 = vadd.f32 %v6881_v58, %v6880_v48 }
 0x255   :  { %v6882_v42 = vadd.f32 %v880_v55, %v545_v39  ;;  %v882_v53 = vpop.f32.mrb[13].mxu0 }
 0x256   :  { %v6883_v56 = vadd.f32 %v882_v53, %v549_v35  ;;  %907 = vadd.xlane.f32.xlu1 %v906_v63 }
 0x258   :  { %v886_v47 = vpop.f32.mrb[14].mxu0  ;;  %v909_v43 = vadd.f32 %v6883_v56, %v6882_v42 }
 0x259   :  { %v6884_v49 = vadd.f32 %v886_v47, %v545_v39  ;;  %v888_v44 = vpop.f32.mrb[15].mxu0 }
 0x25a   :  { %v6885_v23 = vadd.f32 %v888_v44, %v549_v35  ;;  %910 = vadd.xlane.f32.xlu0 %v909_v43 }
 0x25c   :  { %v912_v52 = vadd.f32 %v6885_v23, %v6884_v49 }
 0x25e   :  { %913 = vadd.xlane.f32.xlu1 %v912_v52 }
 0x2cf   :  { %v893_v11 = vpop.xlane.xlu0 %892 }
 0x2d0   :  { %v916_v40 = vmul.f32 0.00390625, %v893_v11 }
 0x2d2   :  { %v8010_v3 = vsub.f32 %v6870_v19, %v916_v40  ;;  %v8012_v46 = vsub.f32 %v6871_v15, %v916_v40 }
 0x2d3   :  { %v896_v7 = vpop.xlane.xlu0 %895 }
 0x2d4   :  { %v917_v38 = vmul.f32 0.00390625, %v896_v7  ;;  %v940_v53 = vmul.f32 %v8010_v3, %v8010_v3  ;;  %v941_v55 = vmul.f32 %v8012_v46, %v8012_v46 }
 0x2d6   :  { %v8018_v39 = vsub.f32 %v6872_v51, %v917_v38  ;;  %v8020_v44 = vsub.f32 %v6873_v60, %v917_v38  ;;  %v956_v35 = vadd.f32 %v941_v55, %v940_v53 }
 0x2d7   :  { %v899_v63 = vpop.xlane.xlu1 %898 }
 0x2d8   :  { %v918_v47 = vmul.f32 0.00390625, %v899_v63  ;;  %957 = vadd.xlane.f32.xlu0 %v956_v35  ;;  %v942_v40 = vmul.f32 %v8018_v39, %v8018_v39  ;;  %v943_v19 = vmul.f32 %v8020_v44, %v8020_v44 }
 0x2da   :  { %v8026_v15 = vsub.f32 %v6874_v62, %v918_v47  ;;  %v8028_v43 = vsub.f32 %v6875_v54, %v918_v47  ;;  %v959_v52 = vadd.f32 %v943_v19, %v942_v40 }
 0x2db   :  { %v902_v11 = vpop.xlane.xlu1 %901 }
 0x2dc   :  { %v919_v51 = vmul.f32 0.00390625, %v902_v11  ;;  %960 = vadd.xlane.f32.xlu1 %v959_v52  ;;  %v944_v38 = vmul.f32 %v8026_v15, %v8026_v15  ;;  %v945_v60 = vmul.f32 %v8028_v43, %v8028_v43 }
 0x2de   :  { %v8034_v7 = vsub.f32 %v6876_v50, %v919_v51  ;;  %v8036_v53 = vsub.f32 %v6877_v61, %v919_v51  ;;  %v962_v55 = vadd.f32 %v945_v60, %v944_v38 }
 0x2df   :  { %v905_v35 = vpop.xlane.xlu0 %904 }
 0x2e0   :  { %v920_v62 = vmul.f32 0.00390625, %v905_v35  ;;  %963 = vadd.xlane.f32.xlu0 %v962_v55  ;;  %v946_v54 = vmul.f32 %v8034_v7, %v8034_v7  ;;  %v947_v63 = vmul.f32 %v8036_v53, %v8036_v53 }
 0x2e2   :  { %v8042_v47 = vsub.f32 %v6878_v57, %v920_v62  ;;  %v8044_v40 = vsub.f32 %v6879_v27, %v920_v62  ;;  %v965_v19 = vadd.f32 %v947_v63, %v946_v54 }
 0x2e3   :  { %v908_v52 = vpop.xlane.xlu1 %907 }
 0x2e4   :  { %v921_v50 = vmul.f32 0.00390625, %v908_v52  ;;  %966 = vadd.xlane.f32.xlu1 %v965_v19  ;;  %v948_v61 = vmul.f32 %v8042_v47, %v8042_v47  ;;  %v949_v11 = vmul.f32 %v8044_v40, %v8044_v40 }
 0x2e6   :  { %v8050_v51 = vsub.f32 %v6880_v48, %v921_v50  ;;  %v8052_v38 = vsub.f32 %v6881_v58, %v921_v50  ;;  %v968_v60 = vadd.f32 %v949_v11, %v948_v61 }
 0x2e7   :  { %v911_v55 = vpop.xlane.xlu0 %910 }
 0x2e8   :  { %v922_v57 = vmul.f32 0.00390625, %v911_v55  ;;  %969 = vadd.xlane.f32.xlu0 %v968_v60  ;;  %v950_v27 = vmul.f32 %v8050_v51, %v8050_v51  ;;  %v951_v35 = vmul.f32 %v8052_v38, %v8052_v38 }
 0x2ea   :  { %v8058_v62 = vsub.f32 %v6882_v42, %v922_v57  ;;  %v8060_v54 = vsub.f32 %v6883_v56, %v922_v57  ;;  %v971_v63 = vadd.f32 %v951_v35, %v950_v27 }
 0x2eb   :  { %v914_v19 = vpop.xlane.xlu1 %913 }
 0x2ec   :  { %v923_v48 = vmul.f32 0.00390625, %v914_v19  ;;  %972 = vadd.xlane.f32.xlu1 %v971_v63  ;;  %v952_v58 = vmul.f32 %v8058_v62, %v8058_v62  ;;  %v953_v52 = vmul.f32 %v8060_v54, %v8060_v54 }
 0x2ee   :  { %v8066_v50 = vsub.f32 %v6884_v49, %v923_v48  ;;  %v8068_v61 = vsub.f32 %v6885_v23, %v923_v48  ;;  %v974_v11 = vadd.f32 %v953_v52, %v952_v58  ;;  %v1020_v48 = vld [vmem:[#allocation9] sm:$0x3] }
 0x2ef   :  { %v8075_v45 = vrot.slane %v1020_v48, %v8004_v59 }
 0x2f0   :  { %975 = vadd.xlane.f32.xlu0 %v974_v11  ;;  %v954_v42 = vmul.f32 %v8066_v50, %v8066_v50  ;;  %v955_v56 = vmul.f32 %v8068_v61, %v8068_v61  ;;  %v1048_v11 = vld [vmem:[#allocation10] sm:$0x3] }
 0x2f2   :  { %v977_v60 = vadd.f32 %v955_v56, %v954_v42  ;;  %v8078_v42 = vrot.slane %v1020_v48, %v8006_v31 }
 0x2f4   :  { %978 = vadd.xlane.f32.xlu1 %v977_v60 }
 0x365   :  { %v958_v55 = vpop.xlane.xlu0 %957 }
 0x366   :  { %v980_v57 = vmul.f32 0.00390625, %v958_v55  ;;  %v8081_v55 = vrot.slane %v1048_v11, %v8004_v59 }
 0x368   :  { %v988_v27 = vadd.f32 1e-05, %v980_v57  ;;  %v8084_v57 = vrot.slane %v1048_v11, %v8006_v31 }
 0x369   :  { %v961_v35 = vpop.xlane.xlu1 %960 }
 0x36a   :  { %6995 = vrsqrt.f32 %v988_v27  ;;  %v981_v63 = vmul.f32 0.00390625, %v961_v35 }
 0x36c   :  { %v989_v49 = vadd.f32 1e-05, %v981_v63 }
 0x36d   :  { %v964_v19 = vpop.xlane.xlu0 %963 }
 0x36e   :  { %6997 = vrsqrt.f32 %v989_v49  ;;  %v982_v23 = vmul.f32 0.00390625, %v964_v19 }
 0x370   :  { %v990_v58 = vadd.f32 1e-05, %v982_v23 }
 0x371   :  { %v967_v52 = vpop.xlane.xlu1 %966 }
 0x372   :  { %6999 = vrsqrt.f32 %v990_v58  ;;  %v983_v34 = vmul.f32 0.00390625, %v967_v52 }
 0x374   :  { %v6996_v56 = vpop.eup %6995  ;;  %v991_v60 = vadd.f32 1e-05, %v983_v34 }
 0x375   :  { %v1004_v27 = vmul.f32 %v6996_v56, %v8010_v3  ;;  %v1005_v35 = vmul.f32 %v6996_v56, %v8012_v46  ;;  %v970_v63 = vpop.xlane.xlu0 %969 }
 0x376   :  { %7001 = vrsqrt.f32 %v991_v60  ;;  %v984_v49 = vmul.f32 0.00390625, %v970_v63 }
 0x377   :  { %v1032_v19 = vmul.f32 %v8075_v45, %v1004_v27  ;;  %v1033_v23 = vmul.f32 %v8078_v42, %v1005_v35 }
 0x378   :  { %v6998_v48 = vpop.eup %6997  ;;  %v992_v58 = vadd.f32 1e-05, %v984_v49 }
 0x379   :  { %v8091_v34 = vadd.f32 %v8081_v55, %v1032_v19  ;;  %v8094_v59 = vadd.f32 %v8084_v57, %v1033_v23  ;;  %v1006_v31 = vmul.f32 %v6998_v48, %v8018_v39  ;;  %v1007_v3 = vmul.f32 %v6998_v48, %v8020_v44  ;;  %v973_v46 = vpop.xlane.xlu1 %972 }
 0x37a   :  { %7003 = vrsqrt.f32 %v992_v58  ;;  %v985_v52 = vmul.f32 0.00390625, %v973_v46 }
 0x37b   :  { %v1034_v11 = vmul.f32 %v8075_v45, %v1006_v31  ;;  %v1035_v56 = vmul.f32 %v8078_v42, %v1007_v3 }
 0x37c   :  { %v7000_v60 = vpop.eup %6999  ;;  %v993_v27 = vadd.f32 1e-05, %v985_v52 }
 0x37d   :  { %v8101_v35 = vadd.f32 %v8081_v55, %v1034_v11  ;;  %v8104_v63 = vadd.f32 %v8084_v57, %v1035_v56  ;;  %v1008_v49 = vmul.f32 %v7000_v60, %v8026_v15  ;;  %v1009_v39 = vmul.f32 %v7000_v60, %v8028_v43  ;;  %v976_v44 = vpop.xlane.xlu0 %975 }
 0x37e   :  { %7005 = vrsqrt.f32 %v993_v27  ;;  %v986_v19 = vmul.f32 0.00390625, %v976_v44 }
 0x37f   :  { %v1036_v23 = vmul.f32 %v8075_v45, %v1008_v49  ;;  %v1037_v48 = vmul.f32 %v8078_v42, %v1009_v39 }
 0x380   :  { %v7002_v58 = vpop.eup %7001  ;;  %v994_v31 = vadd.f32 1e-05, %v986_v19 }
 0x381   :  { %v8111_v3 = vadd.f32 %v8081_v55, %v1036_v23  ;;  %v8114_v46 = vadd.f32 %v8084_v57, %v1037_v48  ;;  %v1010_v52 = vmul.f32 %v7002_v58, %v8034_v7  ;;  %v1011_v15 = vmul.f32 %v7002_v58, %v8036_v53  ;;  %v979_v43 = vpop.xlane.xlu1 %978 }
 0x382   :  { %7007 = vrsqrt.f32 %v994_v31  ;;  %v987_v11 = vmul.f32 0.00390625, %v979_v43 }
 0x383   :  { %v1038_v56 = vmul.f32 %v8075_v45, %v1010_v52  ;;  %v1039_v60 = vmul.f32 %v8078_v42, %v1011_v15 }
 0x384   :  { %v7004_v27 = vpop.eup %7003  ;;  %v995_v49 = vadd.f32 1e-05, %v987_v11 }
 0x385   :  { %v8121_v39 = vadd.f32 %v8081_v55, %v1038_v56  ;;  %v8124_v44 = vadd.f32 %v8084_v57, %v1039_v60  ;;  %v1012_v19 = vmul.f32 %v7004_v27, %v8042_v47  ;;  %v1013_v7 = vmul.f32 %v7004_v27, %v8044_v40 }
 0x386   :  { %7009 = vrsqrt.f32 %v995_v49 }
 0x387   :  { %v1040_v53 = vmul.f32 %v8075_v45, %v1012_v19  ;;  %v1041_v23 = vmul.f32 %v8078_v42, %v1013_v7 }
 0x388   :  { %v7006_v48 = vpop.eup %7005 }
 0x389   :  { %v8131_v58 = vadd.f32 %v8081_v55, %v1040_v53  ;;  %v8134_v31 = vadd.f32 %v8084_v57, %v1041_v23  ;;  %v1014_v52 = vmul.f32 %v7006_v48, %v8050_v51  ;;  %v1015_v15 = vmul.f32 %v7006_v48, %v8052_v38 }
 0x38b   :  { %v1042_v47 = vmul.f32 %v8075_v45, %v1014_v52  ;;  %v1043_v40 = vmul.f32 %v8078_v42, %v1015_v15 }
 0x38c   :  { %v7008_v43 = vpop.eup %7007 }
 0x38d   :  { %v8141_v11 = vadd.f32 %v8081_v55, %v1042_v47  ;;  %v8144_v56 = vadd.f32 %v8084_v57, %v1043_v40  ;;  %v1016_v60 = vmul.f32 %v7008_v43, %v8058_v62  ;;  %v1017_v27 = vmul.f32 %v7008_v43, %v8060_v54 }
 0x38f   :  { %v1044_v49 = vmul.f32 %v8075_v45, %v1016_v60  ;;  %v1045_v51 = vmul.f32 %v8078_v42, %v1017_v27 }
 0x390   :  { %v7010_v38 = vpop.eup %7009 }
 0x391   :  { %v8151_v19 = vadd.f32 %v8081_v55, %v1044_v49  ;;  %v8154_v7 = vadd.f32 %v8084_v57, %v1045_v51  ;;  %v1018_v53 = vmul.f32 %v7010_v38, %v8066_v50  ;;  %v1019_v23 = vmul.f32 %v7010_v38, %v8068_v61 }
 0x393   :  { %v1046_v48 = vmul.f32 %v8075_v45, %v1018_v53  ;;  %v1047_v62 = vmul.f32 %v8078_v42, %v1019_v23 }
 0x395   :  { %v8161_v54 = vadd.f32 %v8081_v55, %v1046_v48  ;;  %v8164_v52 = vadd.f32 %v8084_v57, %v1047_v62 }
 0x396   :  { %7355 = dma.done.wait [#allocation4], 24576 }
 0x397   :  { %7356 = vsyncadd [#allocation4], 4294942720  ;;  %1264 = vmatprep.mubr.f32.mxu0 %v8094_v59  ;;  %v9359_v15 = vmov 0.0   ;;  %v8168_v50 = vld [vmem:[#allocation12] sm:$0xff]  ;;  %v8170_v61 = vld [vmem:[#allocation12 + $0x8] sm:$0xff] }
 0x398   :  { %1583 = vmatprep.mubr.f32.mxu1 %v9359_v15  ;;  %9519 = vst [vmem:[#allocation69_spill] sm:$0xff] %v8168_v50  ;;  %9520 = vst [vmem:[#allocation70_spill] sm:$0xff] %v8170_v61  ;;  %v8172_v45 = vld [vmem:[#allocation12 + $0x10] sm:$0xff]  ;;  %v8174_v42 = vld [vmem:[#allocation13] sm:$0xff] }
 0x399   :  { %9521 = vst [vmem:[#allocation71_spill] sm:$0xff] %v8172_v45  ;;  %9522 = vst [vmem:[#allocation72_spill] sm:$0xff] %v8174_v42  ;;  %v1081_v55 = vld [vmem:[#allocation2 + $0x8] sm:$0xff]  ;;  %v1084_v47 = vld [vmem:[#allocation2 + $0x38] sm:$0xff] }
 0x39a   :  { %v5534_v40 = vpack.c.bf16 %v1084_v47, %v1081_v55  ;;  %v1424_v57 = vld [vmem:[#allocation2 + $0x20] sm:$0xff]  ;;  %v1427_v43 = vld [vmem:[#allocation2 + $0x50] sm:$0xff]  ;;  %v1423_v51 = vld [vmem:[#allocation2 + $0x18] sm:$0xff] }
 0x39b   :  { %v1080_v60 = vld [vmem:[#allocation2] sm:$0xff]  ;;  %v5630_v27 = vpack.c.bf16 %v1427_v43, %v1424_v57  ;;  %v1083_v49 = vld [vmem:[#allocation2 + $0x30] sm:$0xff]  ;;  %v1426_v38 = vld [vmem:[#allocation2 + $0x48] sm:$0xff] }
 0x39c   :  { %5535 = vmatprep.subr.bf16.mxu0 %v5534_v40  ;;  %v5536_v53 = vpack.c.bf16 %v1083_v49, %v1080_v60  ;;  %v5632_v23 = vpack.c.bf16 %v1426_v38, %v1423_v51  ;;  %v1087_v48 = vld [vmem:[#allocation2 + $0x68] sm:$0xff]  ;;  %v1090_v62 = vld [vmem:[#allocation2 + $0x98] sm:$0xff]  ;;  %v1430_v15 = vld [vmem:[#allocation2 + $0x80] sm:$0xff] }
 0x39d   :  { %5631 = vmatprep.subr.bf16.mxu1 %v5630_v27  ;;  %v5538_v45 = vpack.c.bf16 %v1090_v62, %v1087_v48  ;;  %v1433_v61 = vld [vmem:[#allocation2 + $0xb0] sm:$0xff]  ;;  %v1086_v42 = vld [vmem:[#allocation2 + $0x60] sm:$0xff]  ;;  %v1429_v41 = vld [vmem:[#allocation2 + $0x78] sm:$0xff] }
 0x39e   :  { %v1089_v50 = vld [vmem:[#allocation2 + $0x90] sm:$0xff]  ;;  %5537 = vmatpush1.bf16.msra.mxu0 %v5536_v53  ;;  %5633 = vmatpush1.bf16.msra.mxu1 %v5632_v23  ;;  %v5634_v55 = vpack.c.bf16 %v1433_v61, %v1430_v15  ;;  %v1432_v57 = vld [vmem:[#allocation2 + $0xa8] sm:$0xff]  ;;  %v1096_v40 = vld [vmem:[#allocation2 + $0xf8] sm:$0xff] }
 0x39f   :  { %v5540_v47 = vpack.c.bf16 %v1089_v50, %v1086_v42  ;;  %v1093_v43 = vld [vmem:[#allocation2 + $0xc8] sm:$0xff]  ;;  %5539 = vmatprep.subr.bf16.mxu0 %v5538_v45  ;;  %v5636_v36 = vpack.c.bf16 %v1432_v57, %v1429_v41  ;;  %v1436_v60 = vld [vmem:[#allocation2 + $0xe0] sm:$0xff]  ;;  %v1439_v49 = vld [vmem:[#allocation2 + $0x110] sm:$0xff] }
 0x3a0   :  { %5635 = vmatprep.subr.bf16.mxu1 %v5634_v55  ;;  %v5542_v51 = vpack.c.bf16 %v1096_v40, %v1093_v43  ;;  %v5638_v38 = vpack.c.bf16 %v1439_v49, %v1436_v60  ;;  %v1092_v27 = vld [vmem:[#allocation2 + $0xc0] sm:$0xff]  ;;  %v1095_v48 = vld [vmem:[#allocation2 + $0xf0] sm:$0xff]  ;;  %v1435_v62 = vld [vmem:[#allocation2 + $0xd8] sm:$0xff] }
 0x3a1   :  { %v1438_v32 = vld [vmem:[#allocation2 + $0x108] sm:$0xff]  ;;  %v1102_v53 = vld [vmem:[#allocation2 + $0x158] sm:$0xff]  ;;  %v5544_v15 = vpack.c.bf16 %v1095_v48, %v1092_v27  ;;  %v1442_v61 = vld [vmem:[#allocation2 + $0x140] sm:$0xff] }
 0x3a2   :  { %v1099_v30 = vld [vmem:[#allocation2 + $0x128] sm:$0xff]  ;;  %5541 = vmatpush1.bf16.msra.mxu0 %v5540_v47  ;;  %5637 = vmatpush1.bf16.msra.mxu1 %v5636_v36  ;;  %v5640_v50 = vpack.c.bf16 %v1438_v32, %v1435_v62  ;;  %v1445_v42 = vld [vmem:[#allocation2 + $0x170] sm:$0xff]  ;;  %v1098_v45 = vld [vmem:[#allocation2 + $0x120] sm:$0xff] }
 0x3a3   :  { %5543 = vmatprep.subr.bf16.mxu0 %v5542_v51  ;;  %5639 = vmatprep.subr.bf16.mxu1 %v5638_v38  ;;  %v5546_v41 = vpack.c.bf16 %v1102_v53, %v1099_v30  ;;  %v5642_v23 = vpack.c.bf16 %v1445_v42, %v1442_v61  ;;  %v1101_v55 = vld [vmem:[#allocation2 + $0x150] sm:$0xff]  ;;  %v1441_v57 = vld [vmem:[#allocation2 + $0x138] sm:$0xff]  ;;  %v1444_v43 = vld [vmem:[#allocation2 + $0x168] sm:$0xff] }
 0x3a4   :  { %v1105_v40 = vld [vmem:[#allocation2 + $0x188] sm:$0xff]  ;;  %v1108_v60 = vld [vmem:[#allocation2 + $0x1b8] sm:$0xff]  ;;  %v1448_v49 = vld [vmem:[#allocation2 + $0x1a0] sm:$0xff]  ;;  %v5548_v47 = vpack.c.bf16 %v1101_v55, %v1098_v45  ;;  %v5644_v36 = vpack.c.bf16 %v1444_v43, %v1441_v57 }
 0x3a5   :  { %v1451_v26 = vld [vmem:[#allocation2 + $0x1d0] sm:$0xff]  ;;  %v1104_v27 = vld [vmem:[#allocation2 + $0x180] sm:$0xff]  ;;  %v5550_v48 = vpack.c.bf16 %v1108_v60, %v1105_v40  ;;  %v1447_v38 = vld [vmem:[#allocation2 + $0x198] sm:$0xff] }
 0x3a6   :  { %5545 = vmatpush1.bf16.msra.mxu0 %v5544_v15  ;;  %5641 = vmatpush1.bf16.msra.mxu1 %v5640_v50  ;;  %v1107_v32 = vld [vmem:[#allocation2 + $0x1b0] sm:$0xff]  ;;  %v5646_v51 = vpack.c.bf16 %v1451_v26, %v1448_v49  ;;  %v1450_v30 = vld [vmem:[#allocation2 + $0x1c8] sm:$0xff]  ;;  %v1114_v53 = vld [vmem:[#allocation2 + $0x218] sm:$0xff] }
 0x3a7   :  { %5547 = vmatprep.subr.bf16.mxu0 %v5546_v41  ;;  %5643 = vmatprep.subr.bf16.mxu1 %v5642_v23  ;;  %v1111_v62 = vld [vmem:[#allocation2 + $0x1e8] sm:$0xff]  ;;  %v1454_v61 = vld [vmem:[#allocation2 + $0x200] sm:$0xff]  ;;  %v1457_v42 = vld [vmem:[#allocation2 + $0x230] sm:$0xff]  ;;  %v5552_v37 = vpack.c.bf16 %v1107_v32, %v1104_v27  ;;  %v5648_v33 = vpack.c.bf16 %v1450_v30, %v1447_v38 }
 0x3a8   :  { %v1110_v15 = vld [vmem:[#allocation2 + $0x1e0] sm:$0xff]  ;;  %v1113_v50 = vld [vmem:[#allocation2 + $0x210] sm:$0xff]  ;;  %v5554_v45 = vpack.c.bf16 %v1114_v53, %v1111_v62  ;;  %v5650_v55 = vpack.c.bf16 %v1457_v42, %v1454_v61  ;;  %v1453_v41 = vld [vmem:[#allocation2 + $0x1f8] sm:$0xff] }
 0x3a9   :  { %v1456_v23 = vld [vmem:[#allocation2 + $0x228] sm:$0xff]  ;;  %v1120_v26 = vld [vmem:[#allocation2 + $0x278] sm:$0xff]  ;;  %v1460_v43 = vld [vmem:[#allocation2 + $0x260] sm:$0xff]  ;;  %v5556_v60 = vpack.c.bf16 %v1113_v50, %v1110_v15 }
 0x3aa   :  { %5549 = vmatpush1.bf16.msra.mxu0 %v5548_v47  ;;  %5645 = vmatpush1.bf16.msra.mxu1 %v5644_v36  ;;  %v1117_v57 = vld [vmem:[#allocation2 + $0x248] sm:$0xff]  ;;  %v1463_v40 = vld [vmem:[#allocation2 + $0x290] sm:$0xff]  ;;  %v5652_v49 = vpack.c.bf16 %v1456_v23, %v1453_v41  ;;  %v1116_v47 = vld [vmem:[#allocation2 + $0x240] sm:$0xff] }
 0x3ab   :  { %5551 = vmatprep.subr.bf16.mxu0 %v5550_v48  ;;  %5647 = vmatprep.subr.bf16.mxu1 %v5646_v51  ;;  %v1119_v36 = vld [vmem:[#allocation2 + $0x270] sm:$0xff]  ;;  %v5558_v27 = vpack.c.bf16 %v1120_v26, %v1117_v57  ;;  %v5654_v32 = vpack.c.bf16 %v1463_v40, %v1460_v43  ;;  %v1459_v48 = vld [vmem:[#allocation2 + $0x258] sm:$0xff]  ;;  %v1462_v51 = vld [vmem:[#allocation2 + $0x288] sm:$0xff] }
 0x3ac   :  { %v1123_v38 = vld [vmem:[#allocation2 + $0x2a8] sm:$0xff]  ;;  %v1126_v30 = vld [vmem:[#allocation2 + $0x2d8] sm:$0xff]  ;;  %v1466_v62 = vld [vmem:[#allocation2 + $0x2c0] sm:$0xff]  ;;  %v5560_v61 = vpack.c.bf16 %v1119_v36, %v1116_v47  ;;  %v5656_v42 = vpack.c.bf16 %v1462_v51, %v1459_v48 }
 0x3ad   :  { %v1469_v53 = vld [vmem:[#allocation2 + $0x2f0] sm:$0xff]  ;;  %v5562_v15 = vpack.c.bf16 %v1126_v30, %v1123_v38  ;;  %v1129_v41 = vld [vmem:[#allocation2 + $0x308] sm:$0xff]  ;;  %v1132_v23 = vld [vmem:[#allocation2 + $0x338] sm:$0xff] }
 0x3ae   :  { %5553 = vmatpush1.bf16.msra.mxu0 %v5552_v37  ;;  %5649 = vmatpush1.bf16.msra.mxu1 %v5648_v33  ;;  %v1122_v37 = vld [vmem:[#allocation2 + $0x2a0] sm:$0xff]  ;;  %v1125_v33 = vld [vmem:[#allocation2 + $0x2d0] sm:$0xff]  ;;  %v5658_v50 = vpack.c.bf16 %v1469_v53, %v1466_v62  ;;  %v5566_v47 = vpack.c.bf16 %v1132_v23, %v1129_v41  ;;  %v1135_v48 = vld [vmem:[#allocation2 + $0x368] sm:$0xff] }
 0x3af   :  { %5555 = vmatprep.subr.bf16.mxu0 %v5554_v45  ;;  %5651 = vmatprep.subr.bf16.mxu1 %v5650_v55  ;;  %v1465_v45 = vld [vmem:[#allocation2 + $0x2b8] sm:$0xff]  ;;  %v1468_v55 = vld [vmem:[#allocation2 + $0x2e8] sm:$0xff]  ;;  %v1472_v57 = vld [vmem:[#allocation2 + $0x320] sm:$0xff]  ;;  %v5564_v43 = vpack.c.bf16 %v1125_v33, %v1122_v37 }
 0x3b0   :  { %v1475_v26 = vld [vmem:[#allocation2 + $0x350] sm:$0xff]  ;;  %v5660_v40 = vpack.c.bf16 %v1468_v55, %v1465_v45  ;;  %v1138_v51 = vld [vmem:[#allocation2 + $0x398] sm:$0xff]  ;;  %v1478_v38 = vld [vmem:[#allocation2 + $0x380] sm:$0xff] }
 0x3b1   :  { %v5662_v36 = vpack.c.bf16 %v1475_v26, %v1472_v57  ;;  %v1481_v30 = vld [vmem:[#allocation2 + $0x3b0] sm:$0xff]  ;;  %v5570_v37 = vpack.c.bf16 %v1138_v51, %v1135_v48  ;;  %v1141_v45 = vld [vmem:[#allocation2 + $0x3c8] sm:$0xff]  ;;  %v1144_v55 = vld [vmem:[#allocation2 + $0x3f8] sm:$0xff] }
 0x3b2   :  { %5557 = vmatpush1.bf16.msra.mxu0 %v5556_v60  ;;  %5653 = vmatpush1.bf16.msra.mxu1 %v5652_v49  ;;  %v1128_v60 = vld [vmem:[#allocation2 + $0x300] sm:$0xff]  ;;  %v1131_v49 = vld [vmem:[#allocation2 + $0x330] sm:$0xff]  ;;  %v5666_v33 = vpack.c.bf16 %v1481_v30, %v1478_v38 }
 0x3b3   :  { %5559 = vmatprep.subr.bf16.mxu0 %v5558_v27  ;;  %5655 = vmatprep.subr.bf16.mxu1 %v5654_v32  ;;  %v1471_v27 = vld [vmem:[#allocation2 + $0x318] sm:$0xff]  ;;  %v1474_v32 = vld [vmem:[#allocation2 + $0x348] sm:$0xff]  ;;  %v5568_v62 = vpack.c.bf16 %v1131_v49, %v1128_v60  ;;  %v1484_v41 = vld [vmem:[#allocation2 + $0x3e0] sm:$0xff]  ;;  %v5574_v60 = vpack.c.bf16 %v1144_v55, %v1141_v45 }
 0x3b4   :  { %v5664_v53 = vpack.c.bf16 %v1474_v32, %v1471_v27  ;;  %v1487_v23 = vld [vmem:[#allocation2 + $0x410] sm:$0xff]  ;;  %v1147_v27 = vld [vmem:[#allocation2 + $0x428] sm:$0xff]  ;;  %v1150_v32 = vld [vmem:[#allocation2 + $0x458] sm:$0xff] }
 0x3b5   :  { %v5670_v49 = vpack.c.bf16 %v1487_v23, %v1484_v41  ;;  %v1490_v48 = vld [vmem:[#allocation2 + $0x440] sm:$0xff]  ;;  %v1493_v51 = vld [vmem:[#allocation2 + $0x470] sm:$0xff] }
 0x3b6   :  { %5561 = vmatpush1.bf16.msra.mxu0 %v5560_v61  ;;  %5657 = vmatpush1.bf16.msra.mxu1 %v5656_v42  ;;  %v1134_v61 = vld [vmem:[#allocation2 + $0x360] sm:$0xff]  ;;  %v1137_v42 = vld [vmem:[#allocation2 + $0x390] sm:$0xff] }
 0x3b7   :  { %5563 = vmatprep.subr.bf16.mxu0 %v5562_v15  ;;  %5659 = vmatprep.subr.bf16.mxu1 %v5658_v50  ;;  %v1477_v15 = vld [vmem:[#allocation2 + $0x378] sm:$0xff]  ;;  %v1480_v50 = vld [vmem:[#allocation2 + $0x3a8] sm:$0xff]  ;;  %v5572_v57 = vpack.c.bf16 %v1137_v42, %v1134_v61  ;;  %v5578_v61 = vpack.c.bf16 %v1150_v32, %v1147_v27  ;;  %v5674_v42 = vpack.c.bf16 %v1493_v51, %v1490_v48  ;;  %v1496_v45 = vld [vmem:[#allocation2 + $0x4a0] sm:$0xff] }
 0x3b8   :  { %v5668_v26 = vpack.c.bf16 %v1480_v50, %v1477_v15  ;;  %v1153_v15 = vld [vmem:[#allocation2 + $0x488] sm:$0xff]  ;;  %v1156_v50 = vld [vmem:[#allocation2 + $0x4b8] sm:$0xff]  ;;  %v1499_v55 = vld [vmem:[#allocation2 + $0x4d0] sm:$0xff] }
 0x3b9   :  { %v1502_v27 = vld [vmem:[#allocation2 + $0x500] sm:$0xff]  ;;  %v1505_v32 = vld [vmem:[#allocation2 + $0x530] sm:$0xff] }
 0x3ba   :  { %5565 = vmatpush1.bf16.msra.mxu0 %v5564_v43  ;;  %5661 = vmatpush1.bf16.msra.mxu1 %v5660_v40  ;;  %v1140_v43 = vld [vmem:[#allocation2 + $0x3c0] sm:$0xff]  ;;  %v1143_v40 = vld [vmem:[#allocation2 + $0x3f0] sm:$0xff] }
 0x3bb   :  { %5567 = vmatprep.subr.bf16.mxu0 %v5566_v47  ;;  %5663 = vmatprep.subr.bf16.mxu1 %v5662_v36  ;;  %v1483_v47 = vld [vmem:[#allocation2 + $0x3d8] sm:$0xff]  ;;  %v1486_v36 = vld [vmem:[#allocation2 + $0x408] sm:$0xff]  ;;  %v5576_v38 = vpack.c.bf16 %v1143_v40, %v1140_v43  ;;  %v5582_v43 = vpack.c.bf16 %v1156_v50, %v1153_v15  ;;  %v5678_v40 = vpack.c.bf16 %v1499_v55, %v1496_v45  ;;  %v1508_v15 = vld [vmem:[#allocation2 + $0x560] sm:$0xff] }
 0x3bc   :  { %v5672_v30 = vpack.c.bf16 %v1486_v36, %v1483_v47  ;;  %v1159_v47 = vld [vmem:[#allocation2 + $0x4e8] sm:$0xff]  ;;  %v1162_v36 = vld [vmem:[#allocation2 + $0x518] sm:$0xff]  ;;  %v1511_v50 = vld [vmem:[#allocation2 + $0x590] sm:$0xff] }
 0x3be   :  { %5569 = vmatpush1.bf16.msra.mxu0 %v5568_v62  ;;  %5665 = vmatpush1.bf16.msra.mxu1 %v5664_v53  ;;  %v1146_v62 = vld [vmem:[#allocation2 + $0x420] sm:$0xff]  ;;  %v1149_v53 = vld [vmem:[#allocation2 + $0x450] sm:$0xff] }
 0x3bf   :  { %5571 = vmatprep.subr.bf16.mxu0 %v5570_v37  ;;  %5667 = vmatprep.subr.bf16.mxu1 %v5666_v33  ;;  %v1489_v37 = vld [vmem:[#allocation2 + $0x438] sm:$0xff]  ;;  %v1492_v33 = vld [vmem:[#allocation2 + $0x468] sm:$0xff]  ;;  %v5580_v41 = vpack.c.bf16 %v1149_v53, %v1146_v62  ;;  %v5586_v62 = vpack.c.bf16 %v1162_v36, %v1159_v47  ;;  %v5682_v53 = vpack.c.bf16 %v1505_v32, %v1502_v27  ;;  %v1514_v47 = vld [vmem:[#allocation2 + $0x5c0] sm:$0xff] }
 0x3c0   :  { %v5676_v23 = vpack.c.bf16 %v1492_v33, %v1489_v37  ;;  %v1165_v37 = vld [vmem:[#allocation2 + $0x548] sm:$0xff]  ;;  %v1168_v33 = vld [vmem:[#allocation2 + $0x578] sm:$0xff]  ;;  %v1517_v36 = vld [vmem:[#allocation2 + $0x5f0] sm:$0xff] }
 0x3c2   :  { %5573 = vmatpush1.bf16.msra.mxu0 %v5572_v57  ;;  %5669 = vmatpush1.bf16.msra.mxu1 %v5668_v26  ;;  %v1152_v57 = vld [vmem:[#allocation2 + $0x480] sm:$0xff]  ;;  %v1155_v26 = vld [vmem:[#allocation2 + $0x4b0] sm:$0xff] }
 0x3c3   :  { %5575 = vmatprep.subr.bf16.mxu0 %v5574_v60  ;;  %5671 = vmatprep.subr.bf16.mxu1 %v5670_v49  ;;  %v1495_v60 = vld [vmem:[#allocation2 + $0x498] sm:$0xff]  ;;  %v1498_v49 = vld [vmem:[#allocation2 + $0x4c8] sm:$0xff]  ;;  %v5584_v48 = vpack.c.bf16 %v1155_v26, %v1152_v57  ;;  %v5590_v57 = vpack.c.bf16 %v1168_v33, %v1165_v37  ;;  %v5686_v26 = vpack.c.bf16 %v1511_v50, %v1508_v15 }
 0x3c4   :  { %v5680_v51 = vpack.c.bf16 %v1498_v49, %v1495_v60  ;;  %v1171_v60 = vld [vmem:[#allocation2 + $0x5a8] sm:$0xff]  ;;  %v1174_v49 = vld [vmem:[#allocation2 + $0x5d8] sm:$0xff] }
 0x3c5   :  { %v1473_v37 = vld [vmem:[#allocation2 + $0x328] sm:$0xff]  ;;  %v1476_v33 = vld [vmem:[#allocation2 + $0x358] sm:$0xff] }
 0x3c6   :  { %5577 = vmatpush1.bf16.msra.mxu0 %v5576_v38  ;;  %5673 = vmatpush1.bf16.msra.mxu1 %v5672_v30  ;;  %v1158_v38 = vld [vmem:[#allocation2 + $0x4e0] sm:$0xff]  ;;  %v1161_v30 = vld [vmem:[#allocation2 + $0x510] sm:$0xff] }
 0x3c7   :  { %5579 = vmatprep.subr.bf16.mxu0 %v5578_v61  ;;  %5675 = vmatprep.subr.bf16.mxu1 %v5674_v42  ;;  %v1501_v61 = vld [vmem:[#allocation2 + $0x4f8] sm:$0xff]  ;;  %v1504_v42 = vld [vmem:[#allocation2 + $0x528] sm:$0xff]  ;;  %v5588_v45 = vpack.c.bf16 %v1161_v30, %v1158_v38  ;;  %v5594_v38 = vpack.c.bf16 %v1174_v49, %v1171_v60  ;;  %v5690_v30 = vpack.c.bf16 %v1517_v36, %v1514_v47 }
 0x3c8   :  { %v5684_v55 = vpack.c.bf16 %v1504_v42, %v1501_v61  ;;  %v1130_v61 = vld [vmem:[#allocation2 + $0x310] sm:$0xff]  ;;  %v1133_v42 = vld [vmem:[#allocation2 + $0x340] sm:$0xff]  ;;  %v1479_v60 = vld [vmem:[#allocation2 + $0x388] sm:$0xff] }
 0x3c9   :  { %v1482_v49 = vld [vmem:[#allocation2 + $0x3b8] sm:$0xff] }
 0x3ca   :  { %5581 = vmatpush1.bf16.msra.mxu0 %v5580_v41  ;;  %5677 = vmatpush1.bf16.msra.mxu1 %v5676_v23  ;;  %v1164_v41 = vld [vmem:[#allocation2 + $0x540] sm:$0xff]  ;;  %v1167_v23 = vld [vmem:[#allocation2 + $0x570] sm:$0xff] }
 0x3cb   :  { %5583 = vmatprep.subr.bf16.mxu0 %v5582_v43  ;;  %5679 = vmatprep.subr.bf16.mxu1 %v5678_v40  ;;  %v1507_v43 = vld [vmem:[#allocation2 + $0x558] sm:$0xff]  ;;  %v1510_v40 = vld [vmem:[#allocation2 + $0x588] sm:$0xff]  ;;  %v5592_v27 = vpack.c.bf16 %v1167_v23, %v1164_v41  ;;  %v5694_v41 = vpack.c.bf16 %v1476_v33, %v1473_v37  ;;  %v1085_v23 = vld [vmem:[#allocation2 + $0x40] sm:$0xff] }
 0x3cc   :  { %v5688_v32 = vpack.c.bf16 %v1510_v40, %v1507_v43  ;;  %v1136_v43 = vld [vmem:[#allocation2 + $0x370] sm:$0xff]  ;;  %v1139_v40 = vld [vmem:[#allocation2 + $0x3a0] sm:$0xff]  ;;  %v1488_v37 = vld [vmem:[#allocation2 + $0x418] sm:$0xff] }
 0x3ce   :  { %5585 = vmatpush1.bf16.msra.mxu0 %v5584_v48  ;;  %5681 = vmatpush1.bf16.msra.mxu1 %v5680_v51  ;;  %v1170_v48 = vld [vmem:[#allocation2 + $0x5a0] sm:$0xff]  ;;  %v1173_v51 = vld [vmem:[#allocation2 + $0x5d0] sm:$0xff] }
 0x3cf   :  { %5587 = vmatprep.subr.bf16.mxu0 %v5586_v62  ;;  %5683 = vmatprep.subr.bf16.mxu1 %v5682_v53  ;;  %v1513_v62 = vld [vmem:[#allocation2 + $0x5b8] sm:$0xff]  ;;  %v1516_v53 = vld [vmem:[#allocation2 + $0x5e8] sm:$0xff]  ;;  %v5596_v15 = vpack.c.bf16 %v1173_v51, %v1170_v48  ;;  %v1091_v48 = vld [vmem:[#allocation2 + $0xa0] sm:$0xff] }
 0x3d0   :  { %v5692_v50 = vpack.c.bf16 %v1516_v53, %v1513_v62  ;;  %v1431_v51 = vld [vmem:[#allocation2 + $0x88] sm:$0xff]  ;;  %v1142_v62 = vld [vmem:[#allocation2 + $0x3d0] sm:$0xff]  ;;  %v1145_v53 = vld [vmem:[#allocation2 + $0x400] sm:$0xff] }
 0x3d2   :  { %5589 = vmatpush1.bf16.msra.mxu0 %v5588_v45  ;;  %5685 = vmatpush1.bf16.msra.mxu1 %v5684_v55  ;;  %v1082_v45 = vld [vmem:[#allocation2 + $0x10] sm:$0xff]  ;;  %v5598_v55 = vpack.c.bf16 %v1133_v42, %v1130_v61  ;;  %v9523_v61 = vmov 0.0   ;;  %v1485_v42 = vld [vmem:[#allocation2 + $0x3e8] sm:$0xff] }
 0x3d3   :  { %5591 = vmatprep.subr.bf16.mxu0 %v5590_v57  ;;  %5687 = vmatprep.subr.bf16.mxu1 %v5686_v26  ;;  %v1425_v57 = vld [vmem:[#allocation2 + $0x28] sm:$0xff]  ;;  %v1428_v26 = vld [vmem:[#allocation2 + $0x58] sm:$0xff]  ;;  %v5600_v47 = vpack.c.bf16 %v1085_v23, %v1082_v45  ;;  %v5606_v45 = vpack.c.bf16 %v1145_v53, %v1142_v62  ;;  %v1157_v62 = vld [vmem:[#allocation2 + $0x4c0] sm:$0xff] }
 0x3d4   :  { %v5696_v36 = vpack.c.bf16 %v1428_v26, %v1425_v57  ;;  %v1440_v23 = vld [vmem:[#allocation2 + $0x118] sm:$0xff]  ;;  %v5702_v57 = vpack.c.bf16 %v1488_v37, %v1485_v42  ;;  %v1148_v26 = vld [vmem:[#allocation2 + $0x430] sm:$0xff]  ;;  %v1497_v53 = vld [vmem:[#allocation2 + $0x4a8] sm:$0xff] }
 0x3d5   :  { %v1500_v42 = vld [vmem:[#allocation2 + $0x4d8] sm:$0xff] }
 0x3d6   :  { %5593 = vmatpush1.bf16.msra.mxu0 %v5592_v27  ;;  %5689 = vmatpush1.bf16.msra.mxu1 %v5688_v32  ;;  %v1088_v27 = vld [vmem:[#allocation2 + $0x70] sm:$0xff]  ;;  %v5602_v32 = vpack.c.bf16 %v1139_v40, %v1136_v43  ;;  %v1151_v43 = vld [vmem:[#allocation2 + $0x460] sm:$0xff]  ;;  %v1491_v40 = vld [vmem:[#allocation2 + $0x448] sm:$0xff] }
 0x3d7   :  { %5595 = vmatprep.subr.bf16.mxu0 %v5594_v38  ;;  %5691 = vmatprep.subr.bf16.mxu1 %v5690_v30  ;;  %v1434_v38 = vld [vmem:[#allocation2 + $0xb8] sm:$0xff]  ;;  %v5698_v30 = vpack.c.bf16 %v1482_v49, %v1479_v60  ;;  %v5604_v33 = vpack.c.bf16 %v1091_v48, %v1088_v27  ;;  %v5610_v27 = vpack.c.bf16 %v1151_v43, %v1148_v26  ;;  %v1443_v48 = vld [vmem:[#allocation2 + $0x148] sm:$0xff]  ;;  %v1163_v26 = vld [vmem:[#allocation2 + $0x520] sm:$0xff] }
 0x3d8   :  { %v1494_v60 = vld [vmem:[#allocation2 + $0x478] sm:$0xff]  ;;  %v1503_v43 = vld [vmem:[#allocation2 + $0x508] sm:$0xff] }
 0x3da   :  { %5597 = vmatpush1.bf16.msra.mxu0 %v5596_v15  ;;  %5693 = vmatpush1.bf16.msra.mxu1 %v5692_v50  ;;  %v5700_v15 = vpack.c.bf16 %v1434_v38, %v1431_v51  ;;  %v1094_v50 = vld [vmem:[#allocation2 + $0xd0] sm:$0xff]  ;;  %v1446_v51 = vld [vmem:[#allocation2 + $0x178] sm:$0xff]  ;;  %v5706_v38 = vpack.c.bf16 %v1494_v60, %v1491_v40 }
 0x3db   :  { %5599 = vmatprep.subr.bf16.mxu0 %v5598_v55  ;;  %5695 = vmatprep.subr.bf16.mxu1 %v5694_v41  ;;  %v1097_v55 = vld [vmem:[#allocation2 + $0x100] sm:$0xff]  ;;  %v1437_v41 = vld [vmem:[#allocation2 + $0xe8] sm:$0xff]  ;;  %v1506_v40 = vld [vmem:[#allocation2 + $0x538] sm:$0xff] }
 0x3dc   :  { %v5608_v49 = vpack.c.bf16 %v1097_v55, %v1094_v50  ;;  %v1449_v55 = vld [vmem:[#allocation2 + $0x1a8] sm:$0xff] }
 0x3dd   :  { %1265 = vmatmul.mubr.f32.vlgmr.msra.gmra.mrb[16].mxu0 %v8091_v34  ;;  %1584 = vmatmul.mubr.f32.vlgmr.msra.gmra.mrb[0].mxu1 %v9523_v61 }
 0x3de   :  { %5601 = vmatpush3.bf16.msra.mxu0 %v5600_v47  ;;  %5697 = vmatpush3.bf16.msra.mxu1 %v5696_v36  ;;  %v5704_v47 = vpack.c.bf16 %v1440_v23, %v1437_v41  ;;  %v1100_v36 = vld [vmem:[#allocation2 + $0x130] sm:$0xff]  ;;  %v1452_v41 = vld [vmem:[#allocation2 + $0x1d8] sm:$0xff]  ;;  %v5710_v23 = vpack.c.bf16 %v1500_v42, %v1497_v53 }
 0x3df   :  { %1270 = vmatprep.mubr.f32.mxu0 %v8104_v63  ;;  %5603 = vmatprep.subr.bf16.mxu0 %v5602_v32  ;;  %v1103_v32 = vld [vmem:[#allocation2 + $0x160] sm:$0xff]  ;;  %v1512_v53 = vld [vmem:[#allocation2 + $0x598] sm:$0xff] }
 0x3e0   :  { %5699 = vmatprep.subr.bf16.mxu1 %v5698_v30  ;;  %1589 = vmatprep.mubr.f32.mxu1 %v9523_v61  ;;  %v1154_v30 = vld [vmem:[#allocation2 + $0x490] sm:$0xff]  ;;  %v5612_v37 = vpack.c.bf16 %v1103_v32, %v1100_v36  ;;  %v1455_v32 = vld [vmem:[#allocation2 + $0x208] sm:$0xff] }
 0x3e1   :  { %1271 = vmatmul.mubr.f32.gmra.mrb[18].mxu0 %v8101_v35  ;;  %1590 = vmatmul.mubr.f32.gmra.mrb[2].mxu1 %v9523_v61  ;;  %v5614_v50 = vpack.c.bf16 %v1157_v62, %v1154_v30  ;;  %v1169_v30 = vld [vmem:[#allocation2 + $0x580] sm:$0xff]  ;;  %v1509_v62 = vld [vmem:[#allocation2 + $0x568] sm:$0xff] }
 0x3e2   :  { %5605 = vmatpush3.bf16.msra.mxu0 %v5604_v33  ;;  %5701 = vmatpush3.bf16.msra.mxu1 %v5700_v15  ;;  %v5708_v33 = vpack.c.bf16 %v1446_v51, %v1443_v48  ;;  %v1106_v15 = vld [vmem:[#allocation2 + $0x190] sm:$0xff]  ;;  %v1458_v48 = vld [vmem:[#allocation2 + $0x238] sm:$0xff]  ;;  %v5714_v51 = vpack.c.bf16 %v1506_v40, %v1503_v43 }
 0x3e3   :  { %1276 = vmatprep.mubr.f32.mxu0 %v8114_v46  ;;  %5607 = vmatprep.subr.bf16.mxu0 %v5606_v45  ;;  %v1109_v45 = vld [vmem:[#allocation2 + $0x1c0] sm:$0xff]  ;;  %v1518_v43 = vld [vmem:[#allocation2 + $0x5f8] sm:$0xff] }
 0x3e4   :  { %5703 = vmatprep.subr.bf16.mxu1 %v5702_v57  ;;  %1660 = vmatprep.mubr.f32.mxu1 %v9523_v61  ;;  %v1160_v57 = vld [vmem:[#allocation2 + $0x4f0] sm:$0xff]  ;;  %v5616_v60 = vpack.c.bf16 %v1109_v45, %v1106_v15  ;;  %v1461_v45 = vld [vmem:[#allocation2 + $0x268] sm:$0xff] }
 0x3e5   :  { %1277 = vmatmul.mubr.f32.gmra.mrb[20].mxu0 %v8111_v3  ;;  %v5618_v36 = vpack.c.bf16 %v1163_v26, %v1160_v57  ;;  %v1175_v57 = vld [vmem:[#allocation2 + $0x5e0] sm:$0xff]  ;;  %v1515_v26 = vld [vmem:[#allocation2 + $0x5c8] sm:$0xff] }
 0x3e6   :  { %5609 = vmatpush3.bf16.msra.mxu0 %v5608_v49  ;;  %5705 = vmatpush3.bf16.msra.mxu1 %v5704_v47  ;;  %v5712_v49 = vpack.c.bf16 %v1452_v41, %v1449_v55  ;;  %v1112_v47 = vld [vmem:[#allocation2 + $0x1f0] sm:$0xff]  ;;  %v1464_v55 = vld [vmem:[#allocation2 + $0x298] sm:$0xff]  ;;  %v5718_v41 = vpack.c.bf16 %v1512_v53, %v1509_v62 }
 0x3e7   :  { %1282 = vmatprep.mubr.f32.mxu0 %v8124_v44  ;;  %5611 = vmatprep.subr.bf16.mxu0 %v5610_v27  ;;  %v1115_v27 = vld [vmem:[#allocation2 + $0x220] sm:$0xff]  ;;  %v1182_v62 = vld [vmem:[%s9351_s5 + $0x30] sm:$0xff]  ;;  %v1183_v53 = vld [vmem:[%s9351_s5 + $0x38] sm:$0xff] }
 0x3e8   :  { %5707 = vmatprep.subr.bf16.mxu1 %v5706_v38  ;;  %v1166_v38 = vld [vmem:[#allocation2 + $0x550] sm:$0xff]  ;;  %v5620_v42 = vpack.c.bf16 %v1115_v27, %v1112_v47  ;;  %v1467_v27 = vld [vmem:[#allocation2 + $0x2c8] sm:$0xff] }
 0x3e9   :  { %1283 = vmatmul.mubr.f32.gmra.mrb[22].mxu0 %v8121_v39  ;;  %v5622_v15 = vpack.c.bf16 %v1169_v30, %v1166_v38 }
 0x3ea   :  { %5613 = vmatpush3.bf16.msra.mxu0 %v5612_v37  ;;  %5709 = vmatpush3.bf16.msra.mxu1 %v5708_v33  ;;  %v5716_v37 = vpack.c.bf16 %v1458_v48, %v1455_v32  ;;  %v1118_v33 = vld [vmem:[#allocation2 + $0x250] sm:$0xff]  ;;  %v1470_v32 = vld [vmem:[#allocation2 + $0x2f8] sm:$0xff]  ;;  %v5722_v48 = vpack.c.bf16 %v1518_v43, %v1515_v26  ;;  %v1188_v26 = vld [vmem:[%s9351_s5 + $0x60] sm:$0xff] }
 0x3eb   :  { %1288 = vmatprep.mubr.f32.mxu0 %v8134_v31  ;;  %5615 = vmatprep.subr.bf16.mxu0 %v5614_v50  ;;  %v1121_v50 = vld [vmem:[#allocation2 + $0x280] sm:$0xff]  ;;  %v5724_v38 = vpack.c.bf16 %v1470_v32, %v1467_v27  ;;  %v1189_v43 = vld [vmem:[%s9351_s5 + $0x68] sm:$0xff]  ;;  %v1191_v27 = vld [vmem:[%s9351_s5 + $0x78] sm:$0xff] }
 0x3ec   :  { %5711 = vmatprep.subr.bf16.mxu1 %v5710_v23  ;;  %v1172_v23 = vld [vmem:[#allocation2 + $0x5b0] sm:$0xff]  ;;  %v5624_v40 = vpack.c.bf16 %v1121_v50, %v1118_v33  ;;  %v1185_v50 = vld [vmem:[%s9351_s5 + $0x48] sm:$0xff]  ;;  %v1192_v32 = vld [vmem:[%s9351_s5 + $0x80] sm:$0xff] }
 0x3ed   :  { %1289 = vmatmul.mubr.f32.gmra.mrb[24].mxu0 %v8131_v58  ;;  %v5626_v47 = vpack.c.bf16 %v1175_v57, %v1172_v23 }
 0x3ee   :  { %5617 = vmatpush3.bf16.msra.mxu0 %v5616_v60  ;;  %5713 = vmatpush3.bf16.msra.mxu1 %v5712_v49  ;;  %v5720_v60 = vpack.c.bf16 %v1464_v55, %v1461_v45  ;;  %v1124_v49 = vld [vmem:[#allocation2 + $0x2b0] sm:$0xff] }
 0x3ef   :  { %1294 = vmatprep.mubr.f32.mxu0 %v8144_v56  ;;  %5619 = vmatprep.subr.bf16.mxu0 %v5618_v36  ;;  %v1127_v36 = vld [vmem:[#allocation2 + $0x2e0] sm:$0xff]  ;;  %v1186_v45 = vld [vmem:[%s9351_s5 + $0x50] sm:$0xff] }
 0x3f0   :  { %5715 = vmatprep.subr.bf16.mxu1 %v5714_v51  ;;  %v5628_v51 = vpack.c.bf16 %v1127_v36, %v1124_v49 }
 0x3f1   :  { %1295 = vmatmul.mubr.f32.gmra.mrb[26].mxu0 %v8141_v11 }
 0x3f2   :  { %5621 = vmatpush3.bf16.msra.mxu0 %v5620_v42  ;;  %5717 = vmatpush3.bf16.msra.mxu1 %v5716_v37 }
 0x3f3   :  { %1300 = vmatprep.mubr.f32.mxu0 %v8154_v7  ;;  %5623 = vmatprep.subr.bf16.mxu0 %v5622_v15 }
 0x3f4   :  { %5719 = vmatprep.subr.bf16.mxu1 %v5718_v41 }
 0x3f5   :  { %1301 = vmatmul.mubr.f32.gmra.mrb[28].mxu0 %v8151_v19 }
 0x3f6   :  { %5625 = vmatpush3.bf16.msra.mxu0 %v5624_v40  ;;  %5721 = vmatpush3.bf16.msra.mxu1 %v5720_v60 }
 0x3f7   :  { %1306 = vmatprep.mubr.f32.mxu0 %v8164_v52  ;;  %5627 = vmatprep.subr.bf16.mxu0 %v5626_v47 }
 0x3f8   :  { %5723 = vmatprep.subr.bf16.mxu1 %v5722_v48 }
 0x3f9   :  { %1307 = vmatmul.mubr.f32.gmra.mrb[30].mxu0 %v8161_v54 }
 0x3fa   :  { %5629 = vmatpush3.bf16.msra.mxu0 %v5628_v51  ;;  %5725 = vmatpush3.bf16.msra.mxu1 %v5724_v38 }
 0x3fb   :  { %1377 = vmatprep.mubr.f32.mxu0 %v8094_v59  ;;  %v1177_v59 = vld [vmem:[%s9351_s5 + $0x8] sm:$0xff] }
 0x3fd   :  { %1378 = vmatmul.mubr.f32.vlgmr.msra.gmra.mrb[32].mxu0 %v8091_v34  ;;  %1661 = vmatmul.mubr.f32.vlgmr.msra.gmra.mrb[4].mxu1 %v9523_v61  ;;  %v1176_v34 = vld [vmem:[%s9351_s5] sm:$0xff] }
 0x3fe   :  { %1382 = vmatprep.mubr.f32.mxu0 %v8104_v63  ;;  %1665 = vmatprep.mubr.f32.mxu1 %v9523_v61 }
 0x401   :  { %1383 = vmatmul.mubr.f32.gmra.mrb[34].mxu0 %v8101_v35  ;;  %1666 = vmatmul.mubr.f32.gmra.mrb[6].mxu1 %v9523_v61 }
 0x402   :  { %1387 = vmatprep.mubr.f32.mxu0 %v8114_v46 }
 0x405   :  { %1388 = vmatmul.mubr.f32.gmra.mrb[36].mxu0 %v8111_v3 }
 0x406   :  { %1392 = vmatprep.mubr.f32.mxu0 %v8124_v44 }
 0x409   :  { %1393 = vmatmul.mubr.f32.gmra.mrb[38].mxu0 %v8121_v39 }
 0x40a   :  { %1397 = vmatprep.mubr.f32.mxu0 %v8134_v31 }
 0x40d   :  { %1398 = vmatmul.mubr.f32.gmra.mrb[40].mxu0 %v8131_v58  ;;  %v1179_v58 = vld [vmem:[%s9351_s5 + $0x18] sm:$0xff] }
 0x40e   :  { %1402 = vmatprep.mubr.f32.mxu0 %v8144_v56 }
 0x411   :  { %1403 = vmatmul.mubr.f32.gmra.mrb[42].mxu0 %v8141_v11  ;;  %v1180_v11 = vld [vmem:[%s9351_s5 + $0x20] sm:$0xff] }
 0x412   :  { %1407 = vmatprep.mubr.f32.mxu0 %v8154_v7 }
 0x415   :  { %1408 = vmatmul.mubr.f32.gmra.mrb[44].mxu0 %v8151_v19 }
 0x416   :  { %1412 = vmatprep.mubr.f32.mxu0 %v8164_v52 }
 0x419   :  { %1413 = vmatmul.mubr.f32.gmra.mrb[46].mxu0 %v8161_v54 }
 0x4b0   :  { %v1266_v35 = vpop.f32.mrb[16].mxu0  ;;  %v1585_v63 = vpop.f32.mrb[0].mxu1 }
 0x4b1   :  { %v1267_v3 = vadd.f32 %v1266_v35, %v1176_v34  ;;  %v1268_v46 = vpop.f32.mrb[17].mxu0  ;;  %v1587_v39 = vpop.f32.mrb[1].mxu1  ;;  %v1194_v35 = vld [vmem:[%s9351_s5 + $0x90] sm:$0xff] }
 0x4b2   :  { %v1269_v44 = vadd.f32 %v1268_v46, %v1177_v59 }
 0x4b3   :  { %v1671_v31 = vadd.f32 %v1585_v63, %v1267_v3  ;;  %v1195_v3 = vld [vmem:[%s9351_s5 + $0x98] sm:$0xff] }
 0x4b4   :  { %v1678_v56 = vadd.f32 %v1587_v39, %v1269_v44  ;;  %v1272_v19 = vpop.f32.mrb[18].mxu0 }
 0x4b5   :  { %v8226_v7 = vadd.f32 %v1272_v19, %v1179_v58  ;;  %v1274_v54 = vpop.f32.mrb[19].mxu0  ;;  %v4480_v52 = vmul.f32 -1.442695, %v1671_v31  ;;  %v1197_v31 = vld [vmem:[%s9351_s5 + $0xa8] sm:$0xff] }
 0x4b6   :  { %v8228_v30 = vadd.f32 %v1274_v54, %v1180_v11  ;;  %v4481_v40 = vmul.f32 -1.442695, %v1678_v56  ;;  %v1198_v11 = vld [vmem:[%s9351_s5 + $0xb0] sm:$0xff] }
 0x4b7   :  { %7011 = vpow2.f32 %v4480_v52 }
 0x4b8   :  { %v1278_v42 = vpop.f32.mrb[20].mxu0  ;;  %7013 = vpow2.f32 %v4481_v40 }
 0x4b9   :  { %v8236_v37 = vadd.f32 %v1278_v42, %v1182_v62  ;;  %v1280_v33 = vpop.f32.mrb[21].mxu0 }
 0x4ba   :  { %v8238_v15 = vadd.f32 %v1280_v33, %v1183_v53 }
 0x4bb   :  { %9524 = vst [vmem:[#allocation73_spill] sm:$0xff] %v8236_v37 }
 0x4bc   :  { %9525 = vst [vmem:[#allocation74_spill] sm:$0xff] %v8238_v15  ;;  %v1284_v55 = vpop.f32.mrb[22].mxu0 }
 0x4bd   :  { %v8246_v41 = vadd.f32 %v1284_v55, %v1185_v50  ;;  %v1286_v23 = vpop.f32.mrb[23].mxu0 }
 0x4be   :  { %v8248_v57 = vadd.f32 %v1286_v23, %v1186_v45  ;;  %v8293_v45 = vld [vmem:[%s9352_s6] sm:$0xff] }
 0x4bf   :  { %9526 = vst [vmem:[#allocation75_spill] sm:$0xff] %v8246_v41 }
 0x4c0   :  { %9527 = vst [vmem:[#allocation76_spill] sm:$0xff] %v8248_v57  ;;  %v1290_v60 = vpop.f32.mrb[24].mxu0 }
 0x4c1   :  { %v8256_v49 = vadd.f32 %v1290_v60, %v1188_v26  ;;  %v1292_v47 = vpop.f32.mrb[25].mxu0  ;;  %v7012_v48 = vpop.eup %7011 }
 0x4c2   :  { %v8258_v36 = vadd.f32 %v1292_v47, %v1189_v43  ;;  %v1675_v63 = vadd.f32 1.0, %v7012_v48  ;;  %v7014_v52 = vpop.eup %7013  ;;  %v1178_v43 = vld [vmem:[%s9351_s5 + $0x10] sm:$0xff] }
 0x4c3   :  { %9528 = vst [vmem:[#allocation77_spill] sm:$0xff] %v8256_v49  ;;  %v1682_v33 = vadd.f32 1.0, %v7014_v52 }
 0x4c4   :  { %9529 = vst [vmem:[#allocation78_spill] sm:$0xff] %v8258_v36  ;;  %v1296_v51 = vpop.f32.mrb[26].mxu0  ;;  %7015 = vrcp.f32 %v1675_v63 }
 0x4c5   :  { %v8266_v38 = vadd.f32 %v1296_v51, %v1191_v27  ;;  %v1298_v34 = vpop.f32.mrb[27].mxu0  ;;  %7017 = vrcp.f32 %v1682_v33 }
 0x4c6   :  { %v8268_v59 = vadd.f32 %v1298_v34, %v1192_v32  ;;  %v1181_v32 = vld [vmem:[%s9351_s5 + $0x28] sm:$0xff] }
 0x4c7   :  { %9530 = vst [vmem:[#allocation79_spill] sm:$0xff] %v8266_v38 }
 0x4c8   :  { %9531 = vst [vmem:[#allocation80_spill] sm:$0xff] %v8268_v59  ;;  %v1302_v46 = vpop.f32.mrb[28].mxu0 }
 0x4c9   :  { %v8276_v39 = vadd.f32 %v1302_v46, %v1194_v35  ;;  %v1304_v44 = vpop.f32.mrb[29].mxu0 }
 0x4ca   :  { %v8278_v58 = vadd.f32 %v1304_v44, %v1195_v3 }
 0x4cb   :  { %9532 = vst [vmem:[#allocation81_spill] sm:$0xff] %v8276_v39 }
 0x4cc   :  { %9533 = vst [vmem:[#allocation82_spill] sm:$0xff] %v8278_v58  ;;  %v1308_v56 = vpop.f32.mrb[30].mxu0 }
 0x4cd   :  { %v8286_v19 = vadd.f32 %v1308_v56, %v1197_v31  ;;  %v1310_v54 = vpop.f32.mrb[31].mxu0 }
 0x4ce   :  { %v8288_v62 = vadd.f32 %v1310_v54, %v1198_v11  ;;  %v7016_v27 = vpop.eup %7015  ;;  %v1184_v11 = vld [vmem:[%s9351_s5 + $0x40] sm:$0xff] }
 0x4cf   :  { %9534 = vst [vmem:[#allocation83_spill] sm:$0xff] %v8286_v19 }
 0x4d0   :  { %9535 = vst [vmem:[#allocation84_spill] sm:$0xff] %v8288_v62  ;;  %v4546_v53 = vpop.f32.mrb[32].mxu0  ;;  %v4602_v42 = vpop.f32.mrb[4].mxu1 }
 0x4d1   :  { %v4547_v50 = vpop.f32.mrb[33].mxu0  ;;  %v4603_v55 = vpop.f32.mrb[5].mxu1 }
 0x4d2   :  { %v4548_v23 = vadd.f32 %v4547_v50, %v4546_v53  ;;  %v4604_v26 = vadd.f32 %v4603_v55, %v4602_v42  ;;  %v1187_v42 = vld [vmem:[%s9351_s5 + $0x58] sm:$0xff]  ;;  %v7018_v55 = vpop.eup %7017 }
 0x4d4   :  { %v1685_v40 = vadd.f32 %v4604_v26, %v8293_v45  ;;  %v4549_v60 = vpop.f32.mrb[34].mxu0  ;;  %v4605_v47 = vpop.f32.mrb[6].mxu1  ;;  %v1380_v34 = vadd.f32 %v4548_v23, %v1178_v43  ;;  %v1190_v43 = vld [vmem:[%s9351_s5 + $0x70] sm:$0xff] }
 0x4d5   :  { %v4550_v48 = vpop.f32.mrb[35].mxu0  ;;  %v4606_v51 = vpop.f32.mrb[7].mxu1 }
 0x4d6   :  { %v1686_v35 = vmul.f32 %v7016_v27, %v1685_v40  ;;  %v4551_v63 = vadd.f32 %v4550_v48, %v4549_v60  ;;  %v8302_v3 = vadd.f32 %v4606_v51, %v4605_v47  ;;  %v1689_v47 = vsub.f32 1.0, %v7018_v55 }
 0x4d7   :  { %v1691_v51 = vmul.f32 0.0, %v7018_v55  ;;  %v1199_v55 = vld [vmem:[%s9351_s5 + $0xb8] sm:$0xff] }
 0x4d8   :  { %v1687_v46 = vadd.f32 %v1686_v35, %v1380_v34  ;;  %v8304_v44 = vadd.f32 %v4551_v63, %v1181_v32  ;;  %v4552_v31 = vpop.f32.mrb[36].mxu0  ;;  %v1193_v35 = vld [vmem:[%s9351_s5 + $0x88] sm:$0xff] }
 0x4d9   :  { %v4553_v56 = vpop.f32.mrb[37].mxu0 }
 0x4da   :  { %7019 = vtanh.f32 %v1687_v46  ;;  %v4554_v54 = vadd.f32 %v4553_v56, %v4552_v31 }
 0x4dc   :  { %v8309_v52 = vadd.f32 %v4554_v54, %v1184_v11  ;;  %v4555_v53 = vpop.f32.mrb[38].mxu0  ;;  %v1196_v54 = vld [vmem:[%s9351_s5 + $0xa0] sm:$0xff] }
 0x4dd   :  { %v4556_v33 = vpop.f32.mrb[39].mxu0 }
 0x4de   :  { %9536 = vst [vmem:[#allocation85_spill] sm:$0xff] %v8309_v52  ;;  %v4557_v50 = vadd.f32 %v4556_v33, %v4555_v53 }
 0x4e0   :  { %v8314_v23 = vadd.f32 %v4557_v50, %v1187_v42  ;;  %v4558_v26 = vpop.f32.mrb[40].mxu0 }
 0x4e1   :  { %v4559_v40 = vpop.f32.mrb[41].mxu0 }
 0x4e2   :  { %9537 = vst [vmem:[#allocation86_spill] sm:$0xff] %v8314_v23  ;;  %v4560_v60 = vadd.f32 %v4559_v40, %v4558_v26 }
 0x4e4   :  { %v7020_v27 = vpop.eup %7019  ;;  %v8319_v32 = vadd.f32 %v4560_v60, %v1190_v43  ;;  %v4561_v48 = vpop.f32.mrb[42].mxu0  ;;  %v8340_v60 = vpack.c.bf16 %v7568_v5, %v7548_v1 }
 0x4e5   :  { %v1690_v34 = vmul.f32 %v7020_v27, %v1689_v47  ;;  %v4562_v63 = vpop.f32.mrb[43].mxu0  ;;  %v8344_v47 = vpack.c.bf16 %v7563_v4, %v7543_v0  ;;  %v8348_v27 = vpack.c.bf16 %v7608_v13, %v7588_v9 }
 0x4e6   :  { %9538 = vst [vmem:[#allocation87_spill] sm:$0xff] %v8319_v32  ;;  %v4563_v46 = vadd.f32 %v4562_v63, %v4561_v48  ;;  %9542 = vst [vmem:[#allocation91_spill] sm:$0xff] %v8340_v60 }
 0x4e7   :  { %v8324_v31 = vadd.f32 %v1691_v51, %v1690_v34  ;;  %9543 = vst [vmem:[#allocation92_spill] sm:$0xff] %v8344_v47  ;;  %9544 = vst [vmem:[#allocation93_spill] sm:$0xff] %v8348_v27 }
 0x4e8   :  { %v8326_v11 = vadd.f32 %v4563_v46, %v1193_v35  ;;  %v4564_v56 = vpop.f32.mrb[44].mxu0 }
 0x4e9   :  { %v4565_v53 = vpop.f32.mrb[45].mxu0 }
 0x4ea   :  { %9539 = vst [vmem:[#allocation88_spill] sm:$0xff] %v8326_v11  ;;  %v4566_v42 = vadd.f32 %v4565_v53, %v4564_v56 }
 0x4ec   :  { %v8331_v33 = vadd.f32 %v4566_v42, %v1196_v54  ;;  %v4567_v50 = vpop.f32.mrb[46].mxu0 }
 0x4ed   :  { %v4568_v26 = vpop.f32.mrb[47].mxu0 }
 0x4ee   :  { %9540 = vst [vmem:[#allocation89_spill] sm:$0xff] %v8331_v33  ;;  %v4569_v43 = vadd.f32 %v4568_v26, %v4567_v50 }
 0x4f0   :  { %v8336_v40 = vadd.f32 %v4569_v43, %v1199_v55 }
 0x4f2   :  { %9541 = vst [vmem:[#allocation90_spill] sm:$0xff] %v8336_v40 }
 0x4f3   :  { %7357 = dma.done.wait [#allocation4 + $0x1], 8192 }
 0x4f4   :  { %7358 = vsyncadd [#allocation4 + $0x1], 4294959104  ;;  %1809 = vmatprep.mubr.f32.mxu1 %v9523_v61  ;;  %5727 = vmatprep.subr.bf16.mxu1 %v8340_v60  ;;  %v8355_v1 = vpack.c.bf16 %v7603_v12, %v7583_v8  ;;  %v8360_v0 = vpack.c.bf16 %v7648_v21, %v7628_v17  ;;  %v9365_v4 = vmov 0.0|0.0   ;;  %v8365_v5 = vpack.c.bf16 %v7573_v6, %v7553_v2  ;;  %v9552_v12 = vld [vmem:[#allocation38_spill] sm:$0xff]  ;;  %v9556_v17 = vld [vmem:[#allocation35_spill] sm:$0xff] }
 0x4f5   :  { %5729 = vmatpush1.bf16.msra.mxu1 %v8344_v47  ;;  %5758 = vmatprep.subr.bf16.mxu0 %v9365_v4  ;;  %vm7371_vm0 = vmmov 0   ;;  %v8372_v8 = vpack.c.bf16 %v7613_v14, %v7593_v10  ;;  %v8377_v9 = vpack.c.bf16 %v7643_v20, %v7623_v16  ;;  %v8383_v2 = vpack.c.bf16 %v7688_v29, %v7668_v25  ;;  %v9553_v13 = vld [vmem:[#allocation42_spill] sm:$0xff]  ;;  %v9555_v16 = vld [vmem:[#allocation33_spill] sm:$0xff]  ;;  %v9564_v29 = vld [vmem:[#allocation39_spill] sm:$0xff] }
 0x4f6   :  { %9545 = vst [vmem:[#allocation94_spill] sm:$0xff] %v8355_v1  ;;  %5731 = vmatprep.subr.bf16.mxu1 %v8348_v27  ;;  %9546 = vst [vmem:[#allocation95_spill] sm:$0xff] %v8360_v0  ;;  %5059 = vmatprep.mubr.msk.f32.mxu0 %vm7371_vm0, %v9523_v61  ;;  %v8388_v6 = vpack.c.bf16 %v7653_v22, %v7633_v18  ;;  %v8393_v10 = vpack.c.bf16 %v7683_v28, %v7663_v24  ;;  %v9558_v20 = vld [vmem:[#allocation37_spill] sm:$0xff]  ;;  %v9561_v24 = vld [vmem:[#allocation46_spill] sm:$0xff] }
 0x4f7   :  { %9547 = vst [vmem:[#allocation96_spill] sm:$0xff] %v8365_v5  ;;  %5760 = vmatpush3.bf16.msra.mxu0 %v8365_v5  ;;  %9548 = vst [vmem:[#allocation97_spill] sm:$0xff] %v8377_v9  ;;  %v8399_v14 = vpack.c.bf16 %v9553_v13, %v9552_v12  ;;  %v8404_v18 = vpack.c.bf16 %v9556_v17, %v9555_v16  ;;  %v9559_v21 = vld [vmem:[#allocation41_spill] sm:$0xff]  ;;  %v9562_v25 = vld [vmem:[#allocation50_spill] sm:$0xff] }
 0x4f8   :  { %5761 = vmatprep.subr.bf16.mxu0 %v9365_v4  ;;  %9549 = vst [vmem:[#allocation98_spill] sm:$0xff] %v8383_v2  ;;  %9550 = vst [vmem:[#allocation99_spill] sm:$0xff] %v8388_v6  ;;  %v8409_v22 = vpack.c.bf16 %v9559_v21, %v9558_v20  ;;  %v8415_v28 = vpack.c.bf16 %v9562_v25, %v9561_v24  ;;  %v9565_v48 = vld [vmem:[#allocation43_spill] sm:$0xff]  ;;  %v9567_v34 = vld [vmem:[#allocation45_spill] sm:$0xff] }
 0x4f9   :  { %5733 = vmatpush1.bf16.msra.mxu1 %v8355_v1  ;;  %9551 = vst [vmem:[#allocation100_spill] sm:$0xff] %v8393_v10  ;;  %9554 = vst [vmem:[#allocation38_spill] sm:$0xff] %v8399_v14  ;;  %v8420_v51 = vpack.c.bf16 %v9565_v48, %v9564_v29  ;;  %v9568_v35 = vld [vmem:[#allocation49_spill] sm:$0xff]  ;;  %v9570_v46 = vld [vmem:[#allocation54_spill] sm:$0xff] }
 0x4fa   :  { %5735 = vmatprep.subr.bf16.mxu1 %v8360_v0  ;;  %9557 = vst [vmem:[#allocation42_spill] sm:$0xff] %v8404_v18  ;;  %9560 = vst [vmem:[#allocation33_spill] sm:$0xff] %v8409_v22  ;;  %v8425_v63 = vpack.c.bf16 %v9568_v35, %v9567_v34  ;;  %v9571_v56 = vld [vmem:[#allocation58_spill] sm:$0xff]  ;;  %v9573_v53 = vld [vmem:[#allocation47_spill] sm:$0xff] }
 0x4fb   :  { %5763 = vmatpush3.bf16.msra.mxu0 %v8372_v8  ;;  %9563 = vst [vmem:[#allocation35_spill] sm:$0xff] %v8415_v28  ;;  %9566 = vst [vmem:[#allocation37_spill] sm:$0xff] %v8420_v51  ;;  %v8431_v54 = vpack.c.bf16 %v9571_v56, %v9570_v46  ;;  %v9574_v42 = vld [vmem:[#allocation51_spill] sm:$0xff]  ;;  %v9576_v55 = vld [vmem:[#allocation53_spill] sm:$0xff] }
 0x4fc   :  { %5764 = vmatprep.subr.bf16.mxu0 %v9365_v4  ;;  %9569 = vst [vmem:[#allocation41_spill] sm:$0xff] %v8425_v63  ;;  %v8436_v50 = vpack.c.bf16 %v9574_v42, %v9573_v53  ;;  %v9577_v26 = vld [vmem:[#allocation57_spill] sm:$0xff]  ;;  %v9579_v12 = vld [vmem:[#allocation62_spill] sm:$0xff]  ;;  %v1912_v20 = vld [vmem:[#allocation2 + $0x50] sm:$0xff] }
 0x4fd   :  { %5737 = vmatpush1.bf16.msra.mxu1 %v8377_v9  ;;  %9572 = vst [vmem:[#allocation46_spill] sm:$0xff] %v8431_v54  ;;  %v8441_v43 = vpack.c.bf16 %v9577_v26, %v9576_v55  ;;  %v9580_v13 = vld [vmem:[#allocation66_spill] sm:$0xff]  ;;  %v9582_v21 = vld [vmem:[#allocation55_spill] sm:$0xff]  ;;  %v9585_v29 = vld [vmem:[#allocation61_spill] sm:$0xff] }
 0x4fe   :  { %5739 = vmatprep.subr.bf16.mxu1 %v8383_v2  ;;  %9575 = vst [vmem:[#allocation50_spill] sm:$0xff] %v8436_v50  ;;  %v8447_v16 = vpack.c.bf16 %v9580_v13, %v9579_v12  ;;  %v1909_v17 = vld [vmem:[#allocation2 + $0x20] sm:$0xff]  ;;  %v9583_v24 = vld [vmem:[#allocation59_spill] sm:$0xff]  ;;  %v1908_v35 = vld [vmem:[#allocation2 + $0x18] sm:$0xff] }
 0x4ff   :  { %5766 = vmatpush3.bf16.msra.mxu0 %v8388_v6  ;;  %9578 = vst [vmem:[#allocation39_spill] sm:$0xff] %v8441_v43  ;;  %v8452_v25 = vpack.c.bf16 %v9583_v24, %v9582_v21  ;;  %v9586_v48 = vld [vmem:[#allocation65_spill] sm:$0xff]  ;;  %v8461_v46 = vpack.c.bf16 %v1912_v20, %v1909_v17  ;;  %v1911_v56 = vld [vmem:[#allocation2 + $0x48] sm:$0xff]  ;;  %v1918_v26 = vld [vmem:[#allocation2 + $0xb0] sm:$0xff] }
 0x500   :  { %5767 = vmatprep.subr.bf16.mxu0 %v9365_v4  ;;  %9581 = vst [vmem:[#allocation43_spill] sm:$0xff] %v8447_v16  ;;  %v8457_v34 = vpack.c.bf16 %v9586_v48, %v9585_v29  ;;  %v1958_v53 = vld [vmem:[#allocation2 + $0x328] sm:$0xff]  ;;  %v1961_v42 = vld [vmem:[#allocation2 + $0x358] sm:$0xff]  ;;  %v1915_v55 = vld [vmem:[#allocation2 + $0x80] sm:$0xff]  ;;  %v8469_v24 = vpack.c.bf16 %v1911_v56, %v1908_v35 }
 0x501   :  { %5741 = vmatpush1.bf16.msra.mxu1 %v8393_v10  ;;  %9584 = vst [vmem:[#allocation45_spill] sm:$0xff] %v8452_v25  ;;  %9588 = vst [vmem:[#allocation54_spill] sm:$0xff] %v8461_v46  ;;  %v9589_v12 = vld [vmem:[#allocation63_spill] sm:$0xff]  ;;  %v1914_v29 = vld [vmem:[#allocation2 + $0x78] sm:$0xff]  ;;  %v8472_v17 = vpack.c.bf16 %v1961_v42, %v1958_v53  ;;  %v8475_v40 = vpack.c.bf16 %v1918_v26, %v1915_v55 }
 0x502   :  { %5743 = vmatprep.subr.bf16.mxu1 %v8399_v14  ;;  %9587 = vst [vmem:[#allocation49_spill] sm:$0xff] %v8457_v34  ;;  %v9590_v13 = vld [vmem:[#allocation67_spill] sm:$0xff]  ;;  %v1913_v48 = vld [vmem:[#allocation2 + $0x58] sm:$0xff]  ;;  %v1933_v32 = vld [vmem:[#allocation2 + $0x1a0] sm:$0xff] }
 0x503   :  { %5769 = vmatpush3.bf16.msra.mxu0 %v8404_v18  ;;  %v8466_v21 = vpack.c.bf16 %v9590_v13, %v9589_v12  ;;  %9592 = vst [vmem:[#allocation47_spill] sm:$0xff] %v8472_v17  ;;  %v1910_v20 = vld [vmem:[#allocation2 + $0x28] sm:$0xff]  ;;  %v1967_v33 = vld [vmem:[#allocation2 + $0x3b8] sm:$0xff]  ;;  %v1921_v12 = vld [vmem:[#allocation2 + $0xe0] sm:$0xff] }
 0x504   :  { %5770 = vmatprep.subr.bf16.mxu0 %v9365_v4  ;;  %v1917_v62 = vld [vmem:[#allocation2 + $0xa8] sm:$0xff]  ;;  %v1924_v13 = vld [vmem:[#allocation2 + $0x110] sm:$0xff]  ;;  %v8479_v35 = vpack.c.bf16 %v1913_v48, %v1910_v20  ;;  %v1920_v53 = vld [vmem:[#allocation2 + $0xd8] sm:$0xff] }
 0x505   :  { %5745 = vmatpush1.bf16.msra.mxu1 %v8409_v22  ;;  %9591 = vst [vmem:[#allocation58_spill] sm:$0xff] %v8466_v21  ;;  %v1964_v19 = vld [vmem:[#allocation2 + $0x388] sm:$0xff]  ;;  %v8482_v56 = vpack.c.bf16 %v1917_v62, %v1914_v29  ;;  %v1919_v26 = vld [vmem:[#allocation2 + $0xb8] sm:$0xff]  ;;  %v1927_v20 = vld [vmem:[#allocation2 + $0x140] sm:$0xff] }
 0x506   :  { %5747 = vmatprep.subr.bf16.mxu1 %v8415_v28  ;;  %v8485_v42 = vpack.c.bf16 %v1967_v33, %v1964_v19  ;;  %v1916_v55 = vld [vmem:[#allocation2 + $0x88] sm:$0xff]  ;;  %v1973_v11 = vld [vmem:[#allocation2 + $0x418] sm:$0xff]  ;;  %v1930_v48 = vld [vmem:[#allocation2 + $0x170] sm:$0xff] }
 0x507   :  { %5772 = vmatpush3.bf16.msra.mxu0 %v8420_v51  ;;  %v1923_v58 = vld [vmem:[#allocation2 + $0x108] sm:$0xff]  ;;  %v8493_v62 = vpack.c.bf16 %v1919_v26, %v1916_v55  ;;  %v1926_v33 = vld [vmem:[#allocation2 + $0x138] sm:$0xff]  ;;  %v8503_v59 = vpack.c.bf16 %v1930_v48, %v1927_v20  ;;  %v1936_v36 = vld [vmem:[#allocation2 + $0x1d0] sm:$0xff] }
 0x508   :  { %5773 = vmatprep.subr.bf16.mxu0 %v9365_v4  ;;  %v1970_v39 = vld [vmem:[#allocation2 + $0x3e8] sm:$0xff]  ;;  %v8497_v19 = vpack.c.bf16 %v1923_v58, %v1920_v53  ;;  %v1979_v26 = vld [vmem:[#allocation2 + $0x478] sm:$0xff]  ;;  %v8515_v49 = vpack.c.bf16 %v1936_v36, %v1933_v32 }
 0x509   :  { %5749 = vmatpush1.bf16.msra.mxu1 %v8425_v63  ;;  %v8500_v29 = vpack.c.bf16 %v1973_v11, %v1970_v39  ;;  %9593 = vst [vmem:[#allocation51_spill] sm:$0xff] %v8503_v59  ;;  %v1929_v38 = vld [vmem:[#allocation2 + $0x168] sm:$0xff]  ;;  %v1932_v39 = vld [vmem:[#allocation2 + $0x198] sm:$0xff] }
 0x50a   :  { %5751 = vmatprep.subr.bf16.mxu1 %v8431_v54  ;;  %v1976_v55 = vld [vmem:[#allocation2 + $0x448] sm:$0xff]  ;;  %v8509_v53 = vpack.c.bf16 %v1929_v38, %v1926_v33  ;;  %v1931_v48 = vld [vmem:[#allocation2 + $0x178] sm:$0xff]  ;;  %9596 = vst [vmem:[#allocation62_spill] sm:$0xff] %v8515_v49 }
 0x50b   :  { %5775 = vmatpush3.bf16.msra.mxu0 %v8436_v50  ;;  %v8512_v11 = vpack.c.bf16 %v1979_v26, %v1976_v55  ;;  %v1928_v20 = vld [vmem:[#allocation2 + $0x148] sm:$0xff]  ;;  %v1985_v41 = vld [vmem:[#allocation2 + $0x4d8] sm:$0xff] }
 0x50c   :  { %5776 = vmatprep.subr.bf16.mxu0 %v9365_v4  ;;  %9594 = vst [vmem:[#allocation53_spill] sm:$0xff] %v8509_v53  ;;  %v1935_v23 = vld [vmem:[#allocation2 + $0x1c8] sm:$0xff]  ;;  %v8518_v38 = vpack.c.bf16 %v1931_v48, %v1928_v20  ;;  %v1938_v55 = vld [vmem:[#allocation2 + $0x1f8] sm:$0xff]  ;;  %v1945_v20 = vld [vmem:[#allocation2 + $0x260] sm:$0xff] }
 0x50d   :  { %5753 = vmatpush1.bf16.msra.mxu1 %v8441_v43  ;;  %9595 = vst [vmem:[#allocation57_spill] sm:$0xff] %v8512_v11  ;;  %v1982_v57 = vld [vmem:[#allocation2 + $0x4a8] sm:$0xff]  ;;  %v8521_v33 = vpack.c.bf16 %v1935_v23, %v1932_v39  ;;  %v1937_v32 = vld [vmem:[#allocation2 + $0x1d8] sm:$0xff]  ;;  %v1948_v48 = vld [vmem:[#allocation2 + $0x290] sm:$0xff] }
 0x50e   :  { %5755 = vmatprep.subr.bf16.mxu1 %v8447_v16  ;;  %9597 = vst [vmem:[#allocation66_spill] sm:$0xff] %v8518_v38  ;;  %v8524_v26 = vpack.c.bf16 %v1985_v41, %v1982_v57  ;;  %v1934_v36 = vld [vmem:[#allocation2 + $0x1a8] sm:$0xff]  ;;  %v1944_v41 = vld [vmem:[#allocation2 + $0x258] sm:$0xff] }
 0x50f   :  { %5778 = vmatpush3.bf16.msra.mxu0 %v8452_v25  ;;  %9598 = vst [vmem:[#allocation55_spill] sm:$0xff] %v8521_v33  ;;  %v1941_v15 = vld [vmem:[#allocation2 + $0x228] sm:$0xff]  ;;  %v8530_v23 = vpack.c.bf16 %v1937_v32, %v1934_v36  ;;  %v1951_v36 = vld [vmem:[#allocation2 + $0x2c0] sm:$0xff]  ;;  %v1954_v32 = vld [vmem:[#allocation2 + $0x2f0] sm:$0xff] }
 0x510   :  { %5779 = vmatprep.subr.bf16.mxu0 %v9365_v4  ;;  %v8488_v4 = vpack.c.bf16 %v1924_v13, %v1921_v12  ;;  %v1922_v12 = vld [vmem:[#allocation2 + $0xe8] sm:$0xff]  ;;  %v1925_v13 = vld [vmem:[#allocation2 + $0x118] sm:$0xff]  ;;  %9599 = vst [vmem:[#allocation59_spill] sm:$0xff] %v8524_v26  ;;  %v8533_v39 = vpack.c.bf16 %v1941_v15, %v1938_v55 }
 0x511   :  { %5757 = vmatpush1.bf16.msra.mxu1 %v8457_v34  ;;  %v8506_v58 = vpack.c.bf16 %v1925_v13, %v1922_v12  ;;  %v1939_v12 = vld [vmem:[#allocation2 + $0x200] sm:$0xff]  ;;  %v1942_v13 = vld [vmem:[#allocation2 + $0x230] sm:$0xff]  ;;  %v1988_v37 = vld [vmem:[#allocation2 + $0x508] sm:$0xff]  ;;  %9601 = vst [vmem:[#allocation65_spill] sm:$0xff] %v8530_v23 }
 0x512   :  { %5783 = vmatprep.subr.bf16.mxu1 %v8461_v46  ;;  %v8527_v52 = vpack.c.bf16 %v1942_v13, %v1939_v12  ;;  %9602 = vst [vmem:[#allocation63_spill] sm:$0xff] %v8533_v39  ;;  %v1940_v12 = vld [vmem:[#allocation2 + $0x208] sm:$0xff]  ;;  %v1943_v13 = vld [vmem:[#allocation2 + $0x238] sm:$0xff] }
 0x513   :  { %5781 = vmatpush3.bf16.msra.mxu0 %v8466_v21  ;;  %v8542_v15 = vpack.c.bf16 %v1943_v13, %v1940_v12  ;;  %v1957_v12 = vld [vmem:[#allocation2 + $0x320] sm:$0xff]  ;;  %v1960_v13 = vld [vmem:[#allocation2 + $0x350] sm:$0xff] }
 0x514   :  { %1810 = vmatmul.mubr.f32.vlgmr.msra.gmra.mrb[2].mxu1 %v8324_v31  ;;  %5847 = vmatprep.subr.bf16.mxu0 %v8472_v17  ;;  %9600 = vst [vmem:[#allocation61_spill] sm:$0xff] %v8527_v52 }
 0x515   :  { %5785 = vmatpush1.bf16.msra.mxu1 %v8469_v24  ;;  %2068 = vmatprep.mubr.f32.mxu1 %v9523_v61  ;;  %9605 = vst [vmem:[#allocation102_spill] sm:$0xff] %v8542_v15 }
 0x516   :  { %5787 = vmatprep.subr.bf16.mxu1 %v8475_v40  ;;  %5060 = vmatmul.mubr.f32.vlgmr.msra.gmra.mrb[48].mxu0 %v8324_v31 }
 0x517   :  { %5849 = vmatpush3.bf16.msra.mxu0 %v8479_v35  ;;  %2145 = vmatprep.mubr.f32.mxu0 %v9523_v61 }
 0x518   :  { %5851 = vmatprep.subr.bf16.mxu0 %v8485_v42 }
 0x519   :  { %5789 = vmatpush1.bf16.msra.mxu1 %v8482_v56 }
 0x51a   :  { %5791 = vmatprep.subr.bf16.mxu1 %v8488_v4 }
 0x51b   :  { %5853 = vmatpush3.bf16.msra.mxu0 %v8493_v62 }
 0x51c   :  { %5855 = vmatprep.subr.bf16.mxu0 %v8500_v29 }
 0x51d   :  { %5793 = vmatpush1.bf16.msra.mxu1 %v8497_v19 }
 0x51e   :  { %5795 = vmatprep.subr.bf16.mxu1 %v8503_v59  ;;  %v1991_v59 = vld [vmem:[#allocation2 + $0x538] sm:$0xff] }
 0x51f   :  { %5857 = vmatpush3.bf16.msra.mxu0 %v8506_v58  ;;  %v8536_v57 = vpack.c.bf16 %v1991_v59, %v1988_v37  ;;  %v1950_v37 = vld [vmem:[#allocation2 + $0x2b8] sm:$0xff] }
 0x520   :  { %5859 = vmatprep.subr.bf16.mxu0 %v8512_v11  ;;  %v1994_v11 = vld [vmem:[#allocation2 + $0x568] sm:$0xff] }
 0x521   :  { %5797 = vmatpush1.bf16.msra.mxu1 %v8509_v53  ;;  %9603 = vst [vmem:[#allocation67_spill] sm:$0xff] %v8536_v57  ;;  %v1947_v53 = vld [vmem:[#allocation2 + $0x288] sm:$0xff] }
 0x522   :  { %5799 = vmatprep.subr.bf16.mxu1 %v8515_v49  ;;  %v8539_v49 = vpack.c.bf16 %v1948_v48, %v1945_v20  ;;  %v8545_v55 = vpack.c.bf16 %v1947_v53, %v1944_v41  ;;  %v1946_v20 = vld [vmem:[#allocation2 + $0x268] sm:$0xff]  ;;  %v1949_v48 = vld [vmem:[#allocation2 + $0x298] sm:$0xff] }
 0x523   :  { %5861 = vmatpush3.bf16.msra.mxu0 %v8518_v38  ;;  %v1997_v38 = vld [vmem:[#allocation2 + $0x598] sm:$0xff]  ;;  %v8554_v53 = vpack.c.bf16 %v1949_v48, %v1946_v20  ;;  %v1969_v48 = vld [vmem:[#allocation2 + $0x3e0] sm:$0xff] }
 0x524   :  { %5863 = vmatprep.subr.bf16.mxu0 %v8524_v26  ;;  %9604 = vst [vmem:[#allocation101_spill] sm:$0xff] %v8539_v49  ;;  %v8548_v59 = vpack.c.bf16 %v1997_v38, %v1994_v11  ;;  %v2000_v26 = vld [vmem:[#allocation2 + $0x5c8] sm:$0xff] }
 0x525   :  { %5801 = vmatpush1.bf16.msra.mxu1 %v8521_v33  ;;  %v1953_v33 = vld [vmem:[#allocation2 + $0x2e8] sm:$0xff] }
 0x526   :  { %5803 = vmatprep.subr.bf16.mxu1 %v8527_v52  ;;  %v8551_v52 = vpack.c.bf16 %v1954_v32, %v1951_v36  ;;  %v8557_v41 = vpack.c.bf16 %v1953_v33, %v1950_v37  ;;  %v1952_v38 = vld [vmem:[#allocation2 + $0x2c8] sm:$0xff]  ;;  %v1955_v36 = vld [vmem:[#allocation2 + $0x2f8] sm:$0xff]  ;;  %v8563_v32 = vpack.c.bf16 %v1960_v13, %v1957_v12  ;;  %v1972_v12 = vld [vmem:[#allocation2 + $0x410] sm:$0xff] }
 0x527   :  { %5865 = vmatpush3.bf16.msra.mxu0 %v8530_v23  ;;  %v2003_v23 = vld [vmem:[#allocation2 + $0x5f8] sm:$0xff]  ;;  %v8566_v20 = vpack.c.bf16 %v1955_v36, %v1952_v38  ;;  %v1965_v37 = vld [vmem:[#allocation2 + $0x3a8] sm:$0xff]  ;;  %v9610_v38 = vmov 0.0|0.0  }
 0x528   :  { %5867 = vmatprep.subr.bf16.mxu0 %v8536_v57  ;;  %v8560_v11 = vpack.c.bf16 %v2003_v23, %v2000_v26  ;;  %9606 = vst [vmem:[#allocation103_spill] sm:$0xff] %v8563_v32  ;;  %v1963_v57 = vld [vmem:[#allocation2 + $0x380] sm:$0xff]  ;;  %v1962_v23 = vld [vmem:[#allocation2 + $0x378] sm:$0xff]  ;;  %v1971_v36 = vld [vmem:[#allocation2 + $0x408] sm:$0xff] }
 0x529   :  { %5805 = vmatpush1.bf16.msra.mxu1 %v8533_v39  ;;  %v1959_v39 = vld [vmem:[#allocation2 + $0x348] sm:$0xff]  ;;  %v8577_v13 = vpack.c.bf16 %v1965_v37, %v1962_v23  ;;  %v1974_v37 = vld [vmem:[#allocation2 + $0x438] sm:$0xff] }
 0x52a   :  { %5807 = vmatprep.subr.bf16.mxu1 %v8539_v49  ;;  %v1956_v49 = vld [vmem:[#allocation2 + $0x318] sm:$0xff] }
 0x52b   :  { %5869 = vmatpush3.bf16.msra.mxu0 %v8542_v15  ;;  %v1966_v15 = vld [vmem:[#allocation2 + $0x3b0] sm:$0xff]  ;;  %v8569_v33 = vpack.c.bf16 %v1959_v39, %v1956_v49  ;;  %9609 = vst [vmem:[#allocation106_spill] sm:$0xff] %v8577_v13  ;;  %v8581_v49 = vpack.c.bf16 %v1972_v12, %v1969_v48  ;;  %v1968_v39 = vld [vmem:[#allocation2 + $0x3d8] sm:$0xff]  ;;  %v1977_v48 = vld [vmem:[#allocation2 + $0x468] sm:$0xff] }
 0x52c   :  { %5871 = vmatprep.subr.bf16.mxu0 %v8548_v59  ;;  %v8573_v26 = vpack.c.bf16 %v1966_v15, %v1963_v57  ;;  %v1975_v57 = vld [vmem:[#allocation2 + $0x440] sm:$0xff]  ;;  %v1978_v15 = vld [vmem:[#allocation2 + $0x470] sm:$0xff] }
 0x52d   :  { %5809 = vmatpush1.bf16.msra.mxu1 %v8545_v55  ;;  %9607 = vst [vmem:[#allocation104_spill] sm:$0xff] %v8569_v33  ;;  %9611 = vst [vmem:[#allocation107_spill] sm:$0xff] %v8581_v49  ;;  %v8590_v23 = vpack.c.bf16 %v1978_v15, %v1975_v57  ;;  %v1981_v12 = vld [vmem:[#allocation2 + $0x4a0] sm:$0xff]  ;;  %v1990_v15 = vld [vmem:[#allocation2 + $0x530] sm:$0xff] }
 0x52e   :  { %5811 = vmatprep.subr.bf16.mxu1 %v8551_v52  ;;  %9608 = vst [vmem:[#allocation105_spill] sm:$0xff] %v8573_v26  ;;  %v1987_v57 = vld [vmem:[#allocation2 + $0x500] sm:$0xff] }
 0x52f   :  { %5873 = vmatpush3.bf16.msra.mxu0 %v8554_v53  ;;  %9613 = vst [vmem:[#allocation109_spill] sm:$0xff] %v8590_v23 }
 0x530   :  { %5875 = vmatprep.subr.bf16.mxu0 %v8560_v11 }
 0x531   :  { %5813 = vmatpush1.bf16.msra.mxu1 %v8557_v41 }
 0x532   :  { %5815 = vmatprep.subr.bf16.mxu1 %v8563_v32  ;;  %v8586_v32 = vpack.c.bf16 %v1971_v36, %v1968_v39  ;;  %v1980_v36 = vld [vmem:[#allocation2 + $0x498] sm:$0xff] }
 0x533   :  { %5877 = vmatpush3.bf16.msra.mxu0 %v8566_v20 }
 0x534   :  { %5910 = vmatprep.subr.bf16.mxu0 %v9610_v38  ;;  %9612 = vst [vmem:[#allocation108_spill] sm:$0xff] %v8586_v32 }
 0x535   :  { %5817 = vmatpush1.bf16.msra.mxu1 %v8569_v33  ;;  %v8594_v33 = vpack.c.bf16 %v1977_v48, %v1974_v37  ;;  %v8606_v37 = vpack.c.bf16 %v1990_v15, %v1987_v57  ;;  %v1986_v48 = vld [vmem:[#allocation2 + $0x4f8] sm:$0xff]  ;;  %v1999_v57 = vld [vmem:[#allocation2 + $0x5c0] sm:$0xff]  ;;  %v2002_v15 = vld [vmem:[#allocation2 + $0x5f0] sm:$0xff] }
 0x536   :  { %5819 = vmatprep.subr.bf16.mxu1 %v8573_v26  ;;  %2146 = vmatmul.mubr.f32.vlgmr.msra.gmra.mrb[50].mxu0 %v8324_v31  ;;  %v1984_v26 = vld [vmem:[#allocation2 + $0x4d0] sm:$0xff] }
 0x537   :  { %5912 = vmatpush3.bf16.msra.mxu0 %v8365_v5  ;;  %9614 = vst [vmem:[#allocation110_spill] sm:$0xff] %v8594_v33  ;;  %v8598_v39 = vpack.c.bf16 %v1984_v26, %v1981_v12  ;;  %9617 = vst [vmem:[#allocation113_spill] sm:$0xff] %v8606_v37  ;;  %v1993_v26 = vld [vmem:[#allocation2 + $0x560] sm:$0xff]  ;;  %v1996_v12 = vld [vmem:[#allocation2 + $0x590] sm:$0xff] }
 0x538   :  { %5913 = vmatprep.subr.bf16.mxu0 %v9610_v38 }
 0x539   :  { %5821 = vmatpush1.bf16.msra.mxu1 %v8577_v13  ;;  %9615 = vst [vmem:[#allocation111_spill] sm:$0xff] %v8598_v39 }
 0x53a   :  { %5823 = vmatprep.subr.bf16.mxu1 %v8581_v49  ;;  %v1983_v49 = vld [vmem:[#allocation2 + $0x4c8] sm:$0xff] }
 0x53b   :  { %5915 = vmatpush3.bf16.msra.mxu0 %v8372_v8  ;;  %v8602_v13 = vpack.c.bf16 %v1983_v49, %v1980_v36  ;;  %v8614_v49 = vpack.c.bf16 %v1996_v12, %v1993_v26  ;;  %v1992_v36 = vld [vmem:[#allocation2 + $0x558] sm:$0xff] }
 0x53c   :  { %5916 = vmatprep.subr.bf16.mxu0 %v9610_v38 }
 0x53d   :  { %5825 = vmatpush1.bf16.msra.mxu1 %v8586_v32  ;;  %9616 = vst [vmem:[#allocation112_spill] sm:$0xff] %v8602_v13  ;;  %9619 = vst [vmem:[#allocation115_spill] sm:$0xff] %v8614_v49 }
 0x53e   :  { %5827 = vmatprep.subr.bf16.mxu1 %v8590_v23  ;;  %v1989_v23 = vld [vmem:[#allocation2 + $0x528] sm:$0xff] }
 0x53f   :  { %5918 = vmatpush3.bf16.msra.mxu0 %v8388_v6  ;;  %v8610_v32 = vpack.c.bf16 %v1989_v23, %v1986_v48  ;;  %v8622_v23 = vpack.c.bf16 %v2002_v15, %v1999_v57  ;;  %v1998_v48 = vld [vmem:[#allocation2 + $0x5b8] sm:$0xff] }
 0x540   :  { %5919 = vmatprep.subr.bf16.mxu0 %v9610_v38 }
 0x541   :  { %5829 = vmatpush1.bf16.msra.mxu1 %v8594_v33  ;;  %9618 = vst [vmem:[#allocation114_spill] sm:$0xff] %v8610_v32  ;;  %9621 = vst [vmem:[#allocation117_spill] sm:$0xff] %v8622_v23 }
 0x542   :  { %5831 = vmatprep.subr.bf16.mxu1 %v8598_v39  ;;  %v1995_v39 = vld [vmem:[#allocation2 + $0x588] sm:$0xff] }
 0x543   :  { %5921 = vmatpush3.bf16.msra.mxu0 %v8404_v18  ;;  %v8618_v33 = vpack.c.bf16 %v1995_v39, %v1992_v36 }
 0x544   :  { %5922 = vmatprep.subr.bf16.mxu0 %v9610_v38 }
 0x545   :  { %5833 = vmatpush1.bf16.msra.mxu1 %v8602_v13  ;;  %9620 = vst [vmem:[#allocation116_spill] sm:$0xff] %v8618_v33 }
 0x546   :  { %5835 = vmatprep.subr.bf16.mxu1 %v8606_v37  ;;  %v2001_v37 = vld [vmem:[#allocation2 + $0x5e8] sm:$0xff] }
 0x547   :  { %5924 = vmatpush3.bf16.msra.mxu0 %v8420_v51  ;;  %v8626_v26 = vpack.c.bf16 %v2001_v37, %v1998_v48  ;;  %v9623_v37 = vld [vmem:[#allocation69_spill] sm:$0xff]  ;;  %v9624_v48 = vld [vmem:[#allocation70_spill] sm:$0xff] }
 0x548   :  { %5925 = vmatprep.subr.bf16.mxu0 %v9610_v38 }
 0x549   :  { %5837 = vmatpush1.bf16.msra.mxu1 %v8610_v32  ;;  %9622 = vst [vmem:[#allocation118_spill] sm:$0xff] %v8626_v26 }
 0x54a   :  { %5839 = vmatprep.subr.bf16.mxu1 %v8614_v49 }
 0x54b   :  { %5927 = vmatpush3.bf16.msra.mxu0 %v8436_v50 }
 0x54c   :  { %5928 = vmatprep.subr.bf16.mxu0 %v9610_v38 }
 0x54d   :  { %5841 = vmatpush1.bf16.msra.mxu1 %v8618_v33 }
 0x54e   :  { %5843 = vmatprep.subr.bf16.mxu1 %v8622_v23 }
 0x54f   :  { %5930 = vmatpush3.bf16.msra.mxu0 %v8452_v25 }
 0x550   :  { %5931 = vmatprep.subr.bf16.mxu0 %v9610_v38 }
 0x551   :  { %5845 = vmatpush1.bf16.msra.mxu1 %v8626_v26 }
 0x552   :  { %5879 = vmatprep.subr.bf16.mxu1 %v8340_v60 }
 0x553   :  { %5933 = vmatpush3.bf16.msra.mxu0 %v8466_v21 }
 0x554   :  { %2069 = vmatmul.mubr.f32.vlgmr.msra.gmra.mrb[8].mxu1 %v8324_v31  ;;  %5999 = vmatprep.subr.bf16.mxu0 %v8472_v17 }
 0x555   :  { %5881 = vmatpush1.bf16.msra.mxu1 %v8344_v47 }
 0x556   :  { %5883 = vmatprep.subr.bf16.mxu1 %v8348_v27 }
 0x559   :  { %5885 = vmatpush1.bf16.msra.mxu1 %v8355_v1 }
 0x55a   :  { %5887 = vmatprep.subr.bf16.mxu1 %v8360_v0 }
 0x55d   :  { %5889 = vmatpush1.bf16.msra.mxu1 %v8377_v9 }
 0x55e   :  { %5891 = vmatprep.subr.bf16.mxu1 %v8383_v2 }
 0x561   :  { %5893 = vmatpush1.bf16.msra.mxu1 %v8393_v10  ;;  %v9626_v10 = vld [vmem:[#allocation71_spill] sm:$0xff] }
 0x562   :  { %5895 = vmatprep.subr.bf16.mxu1 %v8399_v14 }
 0x565   :  { %5897 = vmatpush1.bf16.msra.mxu1 %v8409_v22 }
 0x566   :  { %5899 = vmatprep.subr.bf16.mxu1 %v8415_v28 }
 0x569   :  { %5901 = vmatpush1.bf16.msra.mxu1 %v8425_v63 }
 0x56a   :  { %5903 = vmatprep.subr.bf16.mxu1 %v8431_v54 }
 0x56d   :  { %5905 = vmatpush1.bf16.msra.mxu1 %v8441_v43 }
 0x56e   :  { %5907 = vmatprep.subr.bf16.mxu1 %v8447_v16 }
 0x571   :  { %5909 = vmatpush1.bf16.msra.mxu1 %v8457_v34  ;;  %v9625_v34 = vld [vmem:[#allocation72_spill] sm:$0xff] }
 0x572   :  { %5935 = vmatprep.subr.bf16.mxu1 %v8461_v46  ;;  %v1900_v46 = vadd.f32 %v8302_v3, %v9625_v34 }
 0x5e7   :  { %v1811_v39 = vpop.f32.mrb[2].mxu1 }
 0x5e8   :  { %v1812_v12 = vadd.f32 %v1811_v39, %v9623_v37  ;;  %v1813_v36 = vpop.f32.mrb[3].mxu1 }
 0x5e9   :  { %v1882_v15 = vpop.f32.mrb[48].mxu0  ;;  %v1814_v28 = vadd.f32 %v1813_v36, %v9624_v48 }
 0x5ea   :  { %v4482_v57 = vmul.f32 -1.442695, %v1812_v12  ;;  %v5061_v22 = vpop.f32.mrb[49].mxu0  ;;  %v1883_v2 = vadd.f32 %v1882_v15, %v9626_v10 }
 0x5eb   :  { %v4483_v63 = vmul.f32 -1.442695, %v1814_v28 }
 0x5ec   :  { %7021 = vpow2.f32 %v4482_v57 }
 0x5ed   :  { %7023 = vpow2.f32 %v4483_v63 }
 0x5f6   :  { %v7022_v54 = vpop.eup %7021 }
 0x5f7   :  { %v1890_v43 = vadd.f32 1.0, %v7022_v54  ;;  %v7024_v16 = vpop.eup %7023 }
 0x5f8   :  { %v1897_v14 = vadd.f32 1.0, %v7024_v16 }
 0x5f9   :  { %7025 = vrcp.f32 %v1890_v43 }
 0x5fa   :  { %7027 = vrcp.f32 %v1897_v14 }
 0x603   :  { %v7026_v39 = vpop.eup %7025 }
 0x604   :  { %v1901_v12 = vmul.f32 %v7026_v39, %v1900_v46  ;;  %v7028_v28 = vpop.eup %7027 }
 0x605   :  { %v1904_v63 = vsub.f32 1.0, %v7028_v28  ;;  %v1906_v43 = vmul.f32 0.0, %v7028_v28 }
 0x606   :  { %v1902_v37 = vadd.f32 %v1901_v12, %v1883_v2 }
 0x608   :  { %7029 = vtanh.f32 %v1902_v37 }
 0x609   :  { %v4657_v36 = vpop.f32.mrb[50].mxu0 }
 0x60a   :  { %v4658_v22 = vpop.f32.mrb[51].mxu0 }
 0x60b   :  { %v4659_v57 = vadd.f32 %v4658_v22, %v4657_v36 }
 0x60d   :  { %v2170_v36 = vadd.f32 %v4659_v57, %v8293_v45  ;;  %v9629_v57 = vld [vmem:[#allocation53_spill] sm:$0xff] }
 0x612   :  { %v7030_v48 = vpop.eup %7029 }
 0x613   :  { %v1905_v54 = vmul.f32 %v7030_v48, %v1904_v63 }
 0x615   :  { %v8658_v9 = vadd.f32 %v1906_v43, %v1905_v54 }
 0x617   :  { %2074 = vmatprep.mubr.f32.mxu1 %v8658_v9  ;;  %2150 = vmatprep.mubr.f32.mxu0 %v8658_v9 }
 0x618   :  { %2075 = vmatmul.mubr.f32.gmra.mrb[10].mxu1 %v9523_v61  ;;  %2151 = vmatmul.mubr.f32.gmra.mrb[52].mxu0 %v9523_v61 }
 0x619   :  { %2242 = vmatprep.mubr.f32.mxu1 %v9523_v61  ;;  %5094 = vmatprep.mubr.msk.f32.mxu0 %vm7371_vm0, %v9523_v61 }
 0x627   :  { %v2070_v3 = vpop.f32.mrb[8].mxu1 }
 0x628   :  { %v2156_v2 = vadd.f32 %v2070_v3, %v8226_v7  ;;  %v2072_v14 = vpop.f32.mrb[9].mxu1 }
 0x629   :  { %v2163_v46 = vadd.f32 %v2072_v14, %v8228_v30  ;;  %v9630_v14 = vld [vmem:[#allocation66_spill] sm:$0xff] }
 0x62a   :  { %v4484_v16 = vmul.f32 -1.442695, %v2156_v2 }
 0x62b   :  { %v4485_v37 = vmul.f32 -1.442695, %v2163_v46  ;;  %v9632_v46 = vld [vmem:[#allocation59_spill] sm:$0xff] }
 0x62c   :  { %7031 = vpow2.f32 %v4484_v16  ;;  %v9631_v16 = vld [vmem:[#allocation62_spill] sm:$0xff] }
 0x62d   :  { %7033 = vpow2.f32 %v4485_v37  ;;  %v9633_v37 = vld [vmem:[#allocation55_spill] sm:$0xff] }
 0x636   :  { %v7032_v15 = vpop.eup %7031 }
 0x637   :  { %v2160_v48 = vadd.f32 1.0, %v7032_v15  ;;  %v7034_v39 = vpop.eup %7033  ;;  %v9634_v15 = vld [vmem:[#allocation65_spill] sm:$0xff] }
 0x638   :  { %v2167_v12 = vadd.f32 1.0, %v7034_v39  ;;  %v9636_v39 = vld [vmem:[#allocation67_spill] sm:$0xff] }
 0x639   :  { %7035 = vrcp.f32 %v2160_v48  ;;  %v9635_v48 = vld [vmem:[#allocation61_spill] sm:$0xff] }
 0x63a   :  { %7037 = vrcp.f32 %v2167_v12  ;;  %v9637_v12 = vld [vmem:[#allocation63_spill] sm:$0xff] }
 0x643   :  { %v7036_v22 = vpop.eup %7035 }
 0x644   :  { %v2171_v28 = vmul.f32 %v7036_v22, %v2170_v36  ;;  %v7038_v7 = vpop.eup %7037  ;;  %v9638_v36 = vld [vmem:[#allocation102_spill] sm:$0xff]  ;;  %v9639_v22 = vld [vmem:[#allocation101_spill] sm:$0xff] }
 0x645   :  { %v2174_v54 = vsub.f32 1.0, %v7038_v7  ;;  %v2176_v3 = vmul.f32 %v7038_v7, %v8324_v31  ;;  %v9628_v31 = vld [vmem:[#allocation57_spill] sm:$0xff] }
 0x646   :  { %v2172_v63 = vadd.f32 %v2171_v28, %v8304_v44  ;;  %v9627_v44 = vld [vmem:[#allocation51_spill] sm:$0xff]  ;;  %v9642_v7 = vld [vmem:[#allocation105_spill] sm:$0xff] }
 0x647   :  { %v9640_v28 = vld [vmem:[#allocation103_spill] sm:$0xff] }
 0x648   :  { %7039 = vtanh.f32 %v2172_v63  ;;  %v9641_v63 = vld [vmem:[#allocation104_spill] sm:$0xff] }
 0x652   :  { %v7040_v43 = vpop.eup %7039 }
 0x653   :  { %v2175_v30 = vmul.f32 %v7040_v43, %v2174_v54  ;;  %v9643_v54 = vld [vmem:[#allocation106_spill] sm:$0xff]  ;;  %v9644_v43 = vld [vmem:[#allocation107_spill] sm:$0xff] }
 0x655   :  { %v8672_v2 = vadd.f32 %v2176_v3, %v2175_v30  ;;  %v9645_v30 = vld [vmem:[#allocation108_spill] sm:$0xff]  ;;  %v9646_v3 = vld [vmem:[#allocation109_spill] sm:$0xff] }
 0x657   :  { %2243 = vmatmul.mubr.f32.vlgmr.msra.gmra.mrb[10].mxu1 %v8672_v2  ;;  %5095 = vmatmul.mubr.f32.vlgmr.msra.gmra.mrb[54].mxu0 %v8672_v2 }
 0x658   :  { %5937 = vmatpush1.bf16.msra.mxu1 %v8469_v24  ;;  %6001 = vmatpush3.bf16.msra.mxu0 %v8479_v35 }
 0x659   :  { %5939 = vmatprep.subr.bf16.mxu1 %v8475_v40  ;;  %6003 = vmatprep.subr.bf16.mxu0 %v8485_v42 }
 0x65a   :  { %2482 = vmatprep.mubr.f32.mxu0 %v9523_v61  ;;  %2405 = vmatprep.mubr.f32.mxu1 %v9523_v61 }
 0x65c   :  { %5941 = vmatpush1.bf16.msra.mxu1 %v8482_v56  ;;  %6005 = vmatpush3.bf16.msra.mxu0 %v8493_v62 }
 0x65d   :  { %5943 = vmatprep.subr.bf16.mxu1 %v8488_v4  ;;  %6007 = vmatprep.subr.bf16.mxu0 %v8500_v29 }
 0x660   :  { %5945 = vmatpush1.bf16.msra.mxu1 %v8497_v19  ;;  %6009 = vmatpush3.bf16.msra.mxu0 %v8506_v58 }
 0x661   :  { %5947 = vmatprep.subr.bf16.mxu1 %v9627_v44  ;;  %6011 = vmatprep.subr.bf16.mxu0 %v9628_v31 }
 0x664   :  { %5949 = vmatpush1.bf16.msra.mxu1 %v9629_v57  ;;  %6013 = vmatpush3.bf16.msra.mxu0 %v9630_v14 }
 0x665   :  { %5951 = vmatprep.subr.bf16.mxu1 %v9631_v16  ;;  %6015 = vmatprep.subr.bf16.mxu0 %v9632_v46 }
 0x668   :  { %5953 = vmatpush1.bf16.msra.mxu1 %v9633_v37  ;;  %6017 = vmatpush3.bf16.msra.mxu0 %v9634_v15 }
 0x669   :  { %5955 = vmatprep.subr.bf16.mxu1 %v9635_v48  ;;  %6019 = vmatprep.subr.bf16.mxu0 %v9636_v39 }
 0x66c   :  { %5957 = vmatpush1.bf16.msra.mxu1 %v9637_v12  ;;  %6021 = vmatpush3.bf16.msra.mxu0 %v9638_v36 }
 0x66d   :  { %5959 = vmatprep.subr.bf16.mxu1 %v9639_v22  ;;  %6023 = vmatprep.subr.bf16.mxu0 %v8548_v59 }
 0x670   :  { %5961 = vmatpush1.bf16.msra.mxu1 %v8545_v55  ;;  %6025 = vmatpush3.bf16.msra.mxu0 %v8554_v53 }
 0x671   :  { %5963 = vmatprep.subr.bf16.mxu1 %v8551_v52  ;;  %6027 = vmatprep.subr.bf16.mxu0 %v8560_v11 }
 0x674   :  { %5965 = vmatpush1.bf16.msra.mxu1 %v8557_v41  ;;  %6029 = vmatpush3.bf16.msra.mxu0 %v8566_v20 }
 0x675   :  { %5967 = vmatprep.subr.bf16.mxu1 %v9640_v28  ;;  %6062 = vmatprep.subr.bf16.mxu0 %v9610_v38 }
 0x677   :  { %2483 = vmatmul.mubr.f32.vlgmr.msra.gmra.mrb[56].mxu0 %v8672_v2 }
 0x678   :  { %5969 = vmatpush1.bf16.msra.mxu1 %v9641_v63  ;;  %6064 = vmatpush3.bf16.msra.mxu0 %v8365_v5  ;;  %v9647_v5 = vld [vmem:[#allocation110_spill] sm:$0xff] }
 0x679   :  { %5971 = vmatprep.subr.bf16.mxu1 %v9642_v7  ;;  %6065 = vmatprep.subr.bf16.mxu0 %v9610_v38  ;;  %v9648_v7 = vld [vmem:[#allocation111_spill] sm:$0xff] }
 0x67c   :  { %5973 = vmatpush1.bf16.msra.mxu1 %v9643_v54  ;;  %6067 = vmatpush3.bf16.msra.mxu0 %v8372_v8 }
 0x67d   :  { %5975 = vmatprep.subr.bf16.mxu1 %v9644_v43  ;;  %6068 = vmatprep.subr.bf16.mxu0 %v9610_v38  ;;  %v9649_v43 = vld [vmem:[#allocation113_spill] sm:$0xff] }
 0x680   :  { %5977 = vmatpush1.bf16.msra.mxu1 %v9645_v30  ;;  %6070 = vmatpush3.bf16.msra.mxu0 %v8388_v6 }
 0x681   :  { %5979 = vmatprep.subr.bf16.mxu1 %v9646_v3  ;;  %6071 = vmatprep.subr.bf16.mxu0 %v9610_v38 }
 0x684   :  { %5981 = vmatpush1.bf16.msra.mxu1 %v9647_v5  ;;  %6073 = vmatpush3.bf16.msra.mxu0 %v8404_v18 }
 0x685   :  { %5983 = vmatprep.subr.bf16.mxu1 %v9648_v7  ;;  %6074 = vmatprep.subr.bf16.mxu0 %v9610_v38 }
 0x688   :  { %5985 = vmatpush1.bf16.msra.mxu1 %v8602_v13  ;;  %6076 = vmatpush3.bf16.msra.mxu0 %v8420_v51  ;;  %v9663_v51 = vld [vmem:[#allocation70_spill] sm:$0xff] }
 0x689   :  { %5987 = vmatprep.subr.bf16.mxu1 %v9649_v43  ;;  %6077 = vmatprep.subr.bf16.mxu0 %v9610_v38 }
 0x68c   :  { %5989 = vmatpush1.bf16.msra.mxu1 %v8610_v32  ;;  %6079 = vmatpush3.bf16.msra.mxu0 %v8436_v50 }
 0x68d   :  { %5991 = vmatprep.subr.bf16.mxu1 %v8614_v49  ;;  %6080 = vmatprep.subr.bf16.mxu0 %v9610_v38 }
 0x690   :  { %5993 = vmatpush1.bf16.msra.mxu1 %v8618_v33  ;;  %6082 = vmatpush3.bf16.msra.mxu0 %v8452_v25  ;;  %v9651_v25 = vld [vmem:[#allocation98_spill] sm:$0xff]  ;;  %v9656_v33 = vld [vmem:[#allocation41_spill] sm:$0xff] }
 0x691   :  { %5995 = vmatprep.subr.bf16.mxu1 %v8622_v23  ;;  %6083 = vmatprep.subr.bf16.mxu0 %v9610_v38  ;;  %v9650_v23 = vld [vmem:[#allocation97_spill] sm:$0xff] }
 0x694   :  { %5997 = vmatpush1.bf16.msra.mxu1 %v8626_v26  ;;  %6085 = vmatpush3.bf16.msra.mxu0 %v8466_v21  ;;  %v9652_v26 = vld [vmem:[#allocation100_spill] sm:$0xff]  ;;  %v9653_v21 = vld [vmem:[#allocation38_spill] sm:$0xff] }
 0x695   :  { %6031 = vmatprep.subr.bf16.mxu1 %v8340_v60  ;;  %6151 = vmatprep.subr.bf16.mxu0 %v8472_v17  ;;  %v9654_v60 = vld [vmem:[#allocation33_spill] sm:$0xff]  ;;  %v9655_v17 = vld [vmem:[#allocation35_spill] sm:$0xff] }
 0x697   :  { %2406 = vmatmul.mubr.f32.vlgmr.msra.gmra.mrb[12].mxu1 %v8672_v2 }
 0x698   :  { %6033 = vmatpush1.bf16.msra.mxu1 %v8344_v47  ;;  %v9657_v47 = vld [vmem:[#allocation46_spill] sm:$0xff] }
 0x699   :  { %6035 = vmatprep.subr.bf16.mxu1 %v8348_v27  ;;  %v9658_v27 = vld [vmem:[#allocation39_spill] sm:$0xff] }
 0x69c   :  { %6037 = vmatpush1.bf16.msra.mxu1 %v8355_v1  ;;  %v9659_v1 = vld [vmem:[#allocation43_spill] sm:$0xff] }
 0x69d   :  { %6039 = vmatprep.subr.bf16.mxu1 %v8360_v0  ;;  %v9660_v0 = vld [vmem:[#allocation49_spill] sm:$0xff] }
 0x6a0   :  { %6041 = vmatpush1.bf16.msra.mxu1 %v9650_v23  ;;  %v9661_v23 = vld [vmem:[#allocation54_spill] sm:$0xff] }
 0x6a1   :  { %6043 = vmatprep.subr.bf16.mxu1 %v9651_v25 }
 0x6a4   :  { %6045 = vmatpush1.bf16.msra.mxu1 %v9652_v26 }
 0x6a5   :  { %6047 = vmatprep.subr.bf16.mxu1 %v9653_v21 }
 0x6a8   :  { %6049 = vmatpush1.bf16.msra.mxu1 %v9654_v60  ;;  %v9662_v60 = vld [vmem:[#allocation69_spill] sm:$0xff] }
 0x6a9   :  { %6051 = vmatprep.subr.bf16.mxu1 %v9655_v17 }
 0x6ac   :  { %6053 = vmatpush1.bf16.msra.mxu1 %v9656_v33 }
 0x6ad   :  { %6055 = vmatprep.subr.bf16.mxu1 %v9657_v47 }
 0x6b0   :  { %6057 = vmatpush1.bf16.msra.mxu1 %v9658_v27 }
 0x6b1   :  { %6059 = vmatprep.subr.bf16.mxu1 %v9659_v1 }
 0x6b4   :  { %6061 = vmatpush1.bf16.msra.mxu1 %v9660_v0 }
 0x6b5   :  { %6087 = vmatprep.subr.bf16.mxu1 %v9661_v23 }
 0x6eb   :  { %v4660_v25 = vpop.f32.mrb[52].mxu0 }
 0x6ec   :  { %v4661_v26 = vpop.f32.mrb[53].mxu0 }
 0x6ed   :  { %v4662_v49 = vadd.f32 %v4661_v26, %v4660_v25 }
 0x6ef   :  { %v2333_v23 = vadd.f32 %v4662_v49, %v9625_v34 }
 0x72a   :  { %v2244_v21 = vpop.f32.mrb[10].mxu1  ;;  %v2315_v50 = vpop.f32.mrb[54].mxu0 }
 0x72b   :  { %v2245_v32 = vadd.f32 %v2244_v21, %v9662_v60  ;;  %v2246_v17 = vpop.f32.mrb[11].mxu1  ;;  %v5096_v43 = vpop.f32.mrb[55].mxu0  ;;  %v2316_v26 = vadd.f32 %v2315_v50, %v9626_v10 }
 0x72c   :  { %v2247_v47 = vadd.f32 %v2246_v17, %v9663_v51 }
 0x72d   :  { %v4486_v33 = vmul.f32 -1.442695, %v2245_v32 }
 0x72e   :  { %v4487_v27 = vmul.f32 -1.442695, %v2247_v47 }
 0x72f   :  { %7041 = vpow2.f32 %v4486_v33 }
 0x730   :  { %7043 = vpow2.f32 %v4487_v27 }
 0x739   :  { %v7042_v1 = vpop.eup %7041 }
 0x73a   :  { %v2323_v13 = vadd.f32 1.0, %v7042_v1  ;;  %v7044_v0 = vpop.eup %7043 }
 0x73b   :  { %v2330_v7 = vadd.f32 1.0, %v7044_v0 }
 0x73c   :  { %7045 = vrcp.f32 %v2323_v13 }
 0x73d   :  { %7047 = vrcp.f32 %v2330_v7 }
 0x746   :  { %v7046_v25 = vpop.eup %7045 }
 0x747   :  { %v2334_v18 = vmul.f32 %v7046_v25, %v2333_v23  ;;  %v7048_v33 = vpop.eup %7047 }
 0x748   :  { %v2337_v47 = vsub.f32 1.0, %v7048_v33  ;;  %v2339_v1 = vmul.f32 %v7048_v33, %v8658_v9 }
 0x749   :  { %v2335_v21 = vadd.f32 %v2334_v18, %v2316_v26  ;;  %v9664_v18 = vld [vmem:[#allocation73_spill] sm:$0xff] }
 0x74a   :  { %v4712_v43 = vpop.f32.mrb[56].mxu0 }
 0x74b   :  { %7049 = vtanh.f32 %v2335_v21  ;;  %v4713_v32 = vpop.f32.mrb[57].mxu0 }
 0x74c   :  { %v4714_v17 = vadd.f32 %v4713_v32, %v4712_v43 }
 0x74e   :  { %v2507_v32 = vadd.f32 %v4714_v17, %v8293_v45  ;;  %v9668_v17 = vld [vmem:[#allocation105_spill] sm:$0xff] }
 0x755   :  { %v7050_v27 = vpop.eup %7049 }
 0x756   :  { %v2338_v51 = vmul.f32 %v7050_v27, %v2337_v47  ;;  %v9666_v27 = vld [vmem:[#allocation85_spill] sm:$0xff] }
 0x758   :  { %v8765_v13 = vadd.f32 %v2339_v1, %v2338_v51  ;;  %v9665_v51 = vld [vmem:[#allocation74_spill] sm:$0xff] }
 0x75a   :  { %2411 = vmatprep.mubr.f32.mxu1 %v8765_v13  ;;  %2487 = vmatprep.mubr.f32.mxu0 %v8765_v13 }
 0x75b   :  { %2412 = vmatmul.mubr.f32.gmra.mrb[14].mxu1 %v9523_v61  ;;  %2488 = vmatmul.mubr.f32.gmra.mrb[58].mxu0 %v9523_v61 }
 0x75c   :  { %2579 = vmatprep.mubr.f32.mxu1 %v9523_v61  ;;  %5129 = vmatprep.mubr.msk.f32.mxu0 %vm7371_vm0, %v9523_v61 }
 0x76a   :  { %v2407_v0 = vpop.f32.mrb[12].mxu1 }
 0x76b   :  { %v2493_v50 = vadd.f32 %v2407_v0, %v9664_v18  ;;  %v2409_v49 = vpop.f32.mrb[13].mxu1 }
 0x76c   :  { %v2500_v23 = vadd.f32 %v2409_v49, %v9665_v51 }
 0x76d   :  { %v4488_v9 = vmul.f32 -1.442695, %v2493_v50 }
 0x76e   :  { %v4489_v7 = vmul.f32 -1.442695, %v2500_v23  ;;  %v9669_v23 = vld [vmem:[#allocation107_spill] sm:$0xff] }
 0x76f   :  { %7051 = vpow2.f32 %v4488_v9 }
 0x770   :  { %7053 = vpow2.f32 %v4489_v7  ;;  %v9670_v7 = vld [vmem:[#allocation42_spill] sm:$0xff] }
 0x779   :  { %v7052_v25 = vpop.eup %7051 }
 0x77a   :  { %v2497_v26 = vadd.f32 1.0, %v7052_v25  ;;  %v7054_v21 = vpop.eup %7053  ;;  %v9671_v25 = vld [vmem:[#allocation111_spill] sm:$0xff] }
 0x77b   :  { %v2504_v43 = vadd.f32 1.0, %v7054_v21  ;;  %v9673_v21 = vld [vmem:[#allocation37_spill] sm:$0xff] }
 0x77c   :  { %7055 = vrcp.f32 %v2497_v26  ;;  %v9672_v26 = vld [vmem:[#allocation112_spill] sm:$0xff] }
 0x77d   :  { %7057 = vrcp.f32 %v2504_v43  ;;  %v9674_v43 = vld [vmem:[#allocation113_spill] sm:$0xff] }
 0x786   :  { %v7056_v33 = vpop.eup %7055 }
 0x787   :  { %v2508_v47 = vmul.f32 %v7056_v33, %v2507_v32  ;;  %v7058_v0 = vpop.eup %7057  ;;  %v9675_v32 = vld [vmem:[#allocation114_spill] sm:$0xff] }
 0x788   :  { %v2511_v18 = vsub.f32 1.0, %v7058_v0  ;;  %v2513_v9 = vmul.f32 %v7058_v0, %v8672_v2  ;;  %v9667_v2 = vld [vmem:[#allocation96_spill] sm:$0xff]  ;;  %v9676_v33 = vld [vmem:[#allocation50_spill] sm:$0xff]  ;;  %v9680_v0 = vld [vmem:[#allocation117_spill] sm:$0xff] }
 0x789   :  { %v2509_v1 = vadd.f32 %v2508_v47, %v9666_v27  ;;  %v9677_v47 = vld [vmem:[#allocation115_spill] sm:$0xff]  ;;  %v9678_v27 = vld [vmem:[#allocation116_spill] sm:$0xff] }
 0x78b   :  { %7059 = vtanh.f32 %v2509_v1  ;;  %v9679_v1 = vld [vmem:[#allocation45_spill] sm:$0xff] }
 0x795   :  { %v7060_v50 = vpop.eup %7059 }
 0x796   :  { %v2512_v49 = vmul.f32 %v7060_v50, %v2511_v18  ;;  %v9681_v18 = vld [vmem:[#allocation118_spill] sm:$0xff] }
 0x797   :  { %v9682_v50 = vld [vmem:[#allocation58_spill] sm:$0xff] }
 0x798   :  { %v8779_v51 = vadd.f32 %v2513_v9, %v2512_v49  ;;  %v9683_v49 = vld [vmem:[#allocation91_spill] sm:$0xff] }
 0x799   :  { %v9684_v9 = vld [vmem:[#allocation47_spill] sm:$0xff] }
 0x79a   :  { %2580 = vmatmul.mubr.f32.vlgmr.msra.gmra.mrb[14].mxu1 %v8779_v51  ;;  %5130 = vmatmul.mubr.f32.vlgmr.msra.gmra.mrb[60].mxu0 %v8779_v51 }
 0x79b   :  { %6089 = vmatpush1.bf16.msra.mxu1 %v8469_v24  ;;  %6153 = vmatpush3.bf16.msra.mxu0 %v8479_v35 }
 0x79c   :  { %6091 = vmatprep.subr.bf16.mxu1 %v8475_v40  ;;  %6155 = vmatprep.subr.bf16.mxu0 %v8485_v42 }
 0x79d   :  { %2819 = vmatprep.mubr.f32.mxu0 %v9523_v61  ;;  %2742 = vmatprep.mubr.f32.mxu1 %v9523_v61 }
 0x79f   :  { %6093 = vmatpush1.bf16.msra.mxu1 %v8482_v56  ;;  %6157 = vmatpush3.bf16.msra.mxu0 %v8493_v62 }
 0x7a0   :  { %6095 = vmatprep.subr.bf16.mxu1 %v8488_v4  ;;  %6159 = vmatprep.subr.bf16.mxu0 %v8500_v29 }
 0x7a3   :  { %6097 = vmatpush1.bf16.msra.mxu1 %v8497_v19  ;;  %6161 = vmatpush3.bf16.msra.mxu0 %v8506_v58 }
 0x7a4   :  { %6099 = vmatprep.subr.bf16.mxu1 %v9627_v44  ;;  %6163 = vmatprep.subr.bf16.mxu0 %v9628_v31 }
 0x7a7   :  { %6101 = vmatpush1.bf16.msra.mxu1 %v9629_v57  ;;  %6165 = vmatpush3.bf16.msra.mxu0 %v9630_v14 }
 0x7a8   :  { %6103 = vmatprep.subr.bf16.mxu1 %v9631_v16  ;;  %6167 = vmatprep.subr.bf16.mxu0 %v9632_v46 }
 0x7ab   :  { %6105 = vmatpush1.bf16.msra.mxu1 %v9633_v37  ;;  %6169 = vmatpush3.bf16.msra.mxu0 %v9634_v15 }
 0x7ac   :  { %6107 = vmatprep.subr.bf16.mxu1 %v9635_v48  ;;  %6171 = vmatprep.subr.bf16.mxu0 %v9636_v39 }
 0x7af   :  { %6109 = vmatpush1.bf16.msra.mxu1 %v9637_v12  ;;  %6173 = vmatpush3.bf16.msra.mxu0 %v9638_v36 }
 0x7b0   :  { %6111 = vmatprep.subr.bf16.mxu1 %v9639_v22  ;;  %6175 = vmatprep.subr.bf16.mxu0 %v8548_v59 }
 0x7b3   :  { %6113 = vmatpush1.bf16.msra.mxu1 %v8545_v55  ;;  %6177 = vmatpush3.bf16.msra.mxu0 %v8554_v53 }
 0x7b4   :  { %6115 = vmatprep.subr.bf16.mxu1 %v8551_v52  ;;  %6179 = vmatprep.subr.bf16.mxu0 %v8560_v11 }
 0x7b7   :  { %6117 = vmatpush1.bf16.msra.mxu1 %v8557_v41  ;;  %6181 = vmatpush3.bf16.msra.mxu0 %v8566_v20 }
 0x7b8   :  { %6119 = vmatprep.subr.bf16.mxu1 %v9640_v28  ;;  %6214 = vmatprep.subr.bf16.mxu0 %v9610_v38 }
 0x7ba   :  { %2820 = vmatmul.mubr.f32.vlgmr.msra.gmra.mrb[62].mxu0 %v8779_v51 }
 0x7bb   :  { %6121 = vmatpush1.bf16.msra.mxu1 %v9641_v63  ;;  %6216 = vmatpush3.bf16.msra.mxu0 %v9667_v2 }
 0x7bc   :  { %6123 = vmatprep.subr.bf16.mxu1 %v9668_v17  ;;  %6217 = vmatprep.subr.bf16.mxu0 %v9610_v38 }
 0x7bf   :  { %6125 = vmatpush1.bf16.msra.mxu1 %v9643_v54  ;;  %6219 = vmatpush3.bf16.msra.mxu0 %v8372_v8 }
 0x7c0   :  { %6127 = vmatprep.subr.bf16.mxu1 %v9669_v23  ;;  %6220 = vmatprep.subr.bf16.mxu0 %v9610_v38 }
 0x7c3   :  { %6129 = vmatpush1.bf16.msra.mxu1 %v9645_v30  ;;  %6222 = vmatpush3.bf16.msra.mxu0 %v8388_v6 }
 0x7c4   :  { %6131 = vmatprep.subr.bf16.mxu1 %v9646_v3  ;;  %6223 = vmatprep.subr.bf16.mxu0 %v9610_v38 }
 0x7c7   :  { %6133 = vmatpush1.bf16.msra.mxu1 %v9647_v5  ;;  %6225 = vmatpush3.bf16.msra.mxu0 %v9670_v7  ;;  %v9701_v7 = vld [vmem:[#allocation70_spill] sm:$0xff] }
 0x7c8   :  { %6135 = vmatprep.subr.bf16.mxu1 %v9671_v25  ;;  %6226 = vmatprep.subr.bf16.mxu0 %v9610_v38 }
 0x7cb   :  { %6137 = vmatpush1.bf16.msra.mxu1 %v9672_v26  ;;  %6228 = vmatpush3.bf16.msra.mxu0 %v9673_v21 }
 0x7cc   :  { %6139 = vmatprep.subr.bf16.mxu1 %v9674_v43  ;;  %6229 = vmatprep.subr.bf16.mxu0 %v9610_v38  ;;  %v9695_v43 = vld [vmem:[#allocation41_spill] sm:$0xff] }
 0x7cf   :  { %6141 = vmatpush1.bf16.msra.mxu1 %v9675_v32  ;;  %6231 = vmatpush3.bf16.msra.mxu0 %v9676_v33  ;;  %v9686_v33 = vld [vmem:[#allocation93_spill] sm:$0xff]  ;;  %v9690_v32 = vld [vmem:[#allocation98_spill] sm:$0xff] }
 0x7d0   :  { %6143 = vmatprep.subr.bf16.mxu1 %v9677_v47  ;;  %6232 = vmatprep.subr.bf16.mxu0 %v9610_v38  ;;  %v9685_v47 = vld [vmem:[#allocation92_spill] sm:$0xff] }
 0x7d3   :  { %6145 = vmatpush1.bf16.msra.mxu1 %v9678_v27  ;;  %6234 = vmatpush3.bf16.msra.mxu0 %v9679_v1  ;;  %v9687_v27 = vld [vmem:[#allocation94_spill] sm:$0xff]  ;;  %v9688_v1 = vld [vmem:[#allocation95_spill] sm:$0xff] }
 0x7d4   :  { %6147 = vmatprep.subr.bf16.mxu1 %v9680_v0  ;;  %6235 = vmatprep.subr.bf16.mxu0 %v9610_v38  ;;  %v9689_v0 = vld [vmem:[#allocation97_spill] sm:$0xff] }
 0x7d7   :  { %6149 = vmatpush1.bf16.msra.mxu1 %v9681_v18  ;;  %6237 = vmatpush3.bf16.msra.mxu0 %v9682_v50  ;;  %v9691_v18 = vld [vmem:[#allocation100_spill] sm:$0xff]  ;;  %v9692_v50 = vld [vmem:[#allocation38_spill] sm:$0xff] }
 0x7d8   :  { %6183 = vmatprep.subr.bf16.mxu1 %v9683_v49  ;;  %6303 = vmatprep.subr.bf16.mxu0 %v9684_v9  ;;  %v9693_v49 = vld [vmem:[#allocation33_spill] sm:$0xff]  ;;  %v9694_v9 = vld [vmem:[#allocation35_spill] sm:$0xff] }
 0x7da   :  { %2743 = vmatmul.mubr.f32.vlgmr.msra.gmra.mrb[16].mxu1 %v8779_v51 }
 0x7db   :  { %6185 = vmatpush1.bf16.msra.mxu1 %v9685_v47  ;;  %v9696_v47 = vld [vmem:[#allocation46_spill] sm:$0xff] }
 0x7dc   :  { %6187 = vmatprep.subr.bf16.mxu1 %v9686_v33  ;;  %v9697_v33 = vld [vmem:[#allocation39_spill] sm:$0xff] }
 0x7df   :  { %6189 = vmatpush1.bf16.msra.mxu1 %v9687_v27  ;;  %v9698_v27 = vld [vmem:[#allocation43_spill] sm:$0xff] }
 0x7e0   :  { %6191 = vmatprep.subr.bf16.mxu1 %v9688_v1  ;;  %v9699_v1 = vld [vmem:[#allocation49_spill] sm:$0xff] }
 0x7e3   :  { %6193 = vmatpush1.bf16.msra.mxu1 %v9689_v0  ;;  %v9700_v0 = vld [vmem:[#allocation54_spill] sm:$0xff] }
 0x7e4   :  { %6195 = vmatprep.subr.bf16.mxu1 %v9690_v32 }
 0x7e7   :  { %6197 = vmatpush1.bf16.msra.mxu1 %v9691_v18 }
 0x7e8   :  { %6199 = vmatprep.subr.bf16.mxu1 %v9692_v50 }
 0x7eb   :  { %6201 = vmatpush1.bf16.msra.mxu1 %v9693_v49 }
 0x7ec   :  { %6203 = vmatprep.subr.bf16.mxu1 %v9694_v9 }
 0x7ef   :  { %6205 = vmatpush1.bf16.msra.mxu1 %v9695_v43 }
 0x7f0   :  { %6207 = vmatprep.subr.bf16.mxu1 %v9696_v47 }
 0x7f3   :  { %6209 = vmatpush1.bf16.msra.mxu1 %v9697_v33 }
 0x7f4   :  { %6211 = vmatprep.subr.bf16.mxu1 %v9698_v27 }
 0x7f7   :  { %6213 = vmatpush1.bf16.msra.mxu1 %v9699_v1 }
 0x7f8   :  { %6239 = vmatprep.subr.bf16.mxu1 %v9700_v0 }
 0x82e   :  { %v4715_v32 = vpop.f32.mrb[58].mxu0 }
 0x82f   :  { %v4716_v18 = vpop.f32.mrb[59].mxu0 }
 0x830   :  { %v4717_v21 = vadd.f32 %v4716_v18, %v4715_v32 }
 0x832   :  { %v2670_v0 = vadd.f32 %v4717_v21, %v9625_v34 }
 0x86d   :  { %v2581_v50 = vpop.f32.mrb[14].mxu1  ;;  %v2652_v26 = vpop.f32.mrb[60].mxu0 }
 0x86e   :  { %v2582_v49 = vadd.f32 %v2581_v50, %v9662_v60  ;;  %v2583_v9 = vpop.f32.mrb[15].mxu1  ;;  %v5131_v25 = vpop.f32.mrb[61].mxu0  ;;  %v2653_v18 = vadd.f32 %v2652_v26, %v9626_v10 }
 0x86f   :  { %v2584_v47 = vadd.f32 %v2583_v9, %v9701_v7 }
 0x870   :  { %v4490_v43 = vmul.f32 -1.442695, %v2582_v49 }
 0x871   :  { %v4491_v33 = vmul.f32 -1.442695, %v2584_v47 }
 0x872   :  { %7061 = vpow2.f32 %v4490_v43 }
 0x873   :  { %7063 = vpow2.f32 %v4491_v33 }
 0x87c   :  { %v7062_v27 = vpop.eup %7061 }
 0x87d   :  { %v2660_v5 = vadd.f32 1.0, %v7062_v27  ;;  %v7064_v1 = vpop.eup %7063 }
 0x87e   :  { %v2667_v3 = vadd.f32 1.0, %v7064_v1 }
 0x87f   :  { %7065 = vrcp.f32 %v2660_v5 }
 0x880   :  { %7067 = vrcp.f32 %v2667_v3  ;;  %v9702_v3 = vld [vmem:[#allocation75_spill] sm:$0xff] }
 0x889   :  { %v7066_v32 = vpop.eup %7065 }
 0x88a   :  { %v2671_v6 = vmul.f32 %v7066_v32, %v2670_v0  ;;  %v7068_v43 = vpop.eup %7067 }
 0x88b   :  { %v2674_v47 = vsub.f32 1.0, %v7068_v43  ;;  %v2676_v5 = vmul.f32 %v7068_v43, %v8765_v13 }
 0x88c   :  { %v2672_v50 = vadd.f32 %v2671_v6, %v2653_v18 }
 0x88d   :  { %v4767_v25 = vpop.f32.mrb[62].mxu0 }
 0x88e   :  { %7069 = vtanh.f32 %v2672_v50  ;;  %v4768_v49 = vpop.f32.mrb[63].mxu0 }
 0x88f   :  { %v4769_v9 = vadd.f32 %v4768_v49, %v4767_v25 }
 0x891   :  { %v2844_v49 = vadd.f32 %v4769_v9, %v8293_v45  ;;  %v9706_v9 = vld [vmem:[#allocation109_spill] sm:$0xff] }
 0x898   :  { %v7070_v33 = vpop.eup %7069 }
 0x899   :  { %v2675_v7 = vmul.f32 %v7070_v33, %v2674_v47  ;;  %v9704_v33 = vld [vmem:[#allocation86_spill] sm:$0xff] }
 0x89b   :  { %v8872_v27 = vadd.f32 %v2676_v5, %v2675_v7  ;;  %v9703_v7 = vld [vmem:[#allocation76_spill] sm:$0xff] }
 0x89d   :  { %2748 = vmatprep.mubr.f32.mxu1 %v8872_v27  ;;  %2824 = vmatprep.mubr.f32.mxu0 %v8872_v27 }
 0x89e   :  { %2749 = vmatmul.mubr.f32.gmra.mrb[18].mxu1 %v9523_v61  ;;  %2825 = vmatmul.mubr.f32.gmra.mrb[64].mxu0 %v9523_v61 }
 0x89f   :  { %2916 = vmatprep.mubr.f32.mxu1 %v9523_v61  ;;  %5164 = vmatprep.mubr.msk.f32.mxu0 %vm7371_vm0, %v9523_v61 }
 0x8ad   :  { %v2744_v6 = vpop.f32.mrb[16].mxu1 }
 0x8ae   :  { %v2830_v26 = vadd.f32 %v2744_v6, %v9702_v3  ;;  %v2746_v21 = vpop.f32.mrb[17].mxu1 }
 0x8af   :  { %v2837_v1 = vadd.f32 %v2746_v21, %v9703_v7 }
 0x8b0   :  { %v4492_v13 = vmul.f32 -1.442695, %v2830_v26 }
 0x8b1   :  { %v4493_v0 = vmul.f32 -1.442695, %v2837_v1  ;;  %v9707_v1 = vld [vmem:[#allocation110_spill] sm:$0xff] }
 0x8b2   :  { %7071 = vpow2.f32 %v4492_v13 }
 0x8b3   :  { %7073 = vpow2.f32 %v4493_v0  ;;  %v9708_v0 = vld [vmem:[#allocation42_spill] sm:$0xff] }
 0x8bc   :  { %v7072_v32 = vpop.eup %7071 }
 0x8bd   :  { %v2834_v18 = vadd.f32 1.0, %v7072_v32  ;;  %v7074_v50 = vpop.eup %7073  ;;  %v9709_v32 = vld [vmem:[#allocation111_spill] sm:$0xff] }
 0x8be   :  { %v2841_v25 = vadd.f32 1.0, %v7074_v50  ;;  %v9711_v50 = vld [vmem:[#allocation37_spill] sm:$0xff] }
 0x8bf   :  { %7075 = vrcp.f32 %v2834_v18  ;;  %v9710_v18 = vld [vmem:[#allocation112_spill] sm:$0xff] }
 0x8c0   :  { %7077 = vrcp.f32 %v2841_v25  ;;  %v9712_v25 = vld [vmem:[#allocation113_spill] sm:$0xff] }
 0x8c9   :  { %v7076_v43 = vpop.eup %7075 }
 0x8ca   :  { %v2845_v47 = vmul.f32 %v7076_v43, %v2844_v49  ;;  %v7078_v6 = vpop.eup %7077  ;;  %v9713_v49 = vld [vmem:[#allocation114_spill] sm:$0xff] }
 0x8cb   :  { %v2848_v3 = vsub.f32 1.0, %v7078_v6  ;;  %v2850_v13 = vmul.f32 %v7078_v6, %v8779_v51  ;;  %v9705_v51 = vld [vmem:[#allocation99_spill] sm:$0xff]  ;;  %v9714_v43 = vld [vmem:[#allocation50_spill] sm:$0xff]  ;;  %v9718_v6 = vld [vmem:[#allocation117_spill] sm:$0xff] }
 0x8cc   :  { %v2846_v5 = vadd.f32 %v2845_v47, %v9704_v33  ;;  %v9715_v47 = vld [vmem:[#allocation115_spill] sm:$0xff]  ;;  %v9716_v33 = vld [vmem:[#allocation116_spill] sm:$0xff] }
 0x8ce   :  { %7079 = vtanh.f32 %v2846_v5  ;;  %v9717_v5 = vld [vmem:[#allocation45_spill] sm:$0xff] }
 0x8d8   :  { %v7080_v26 = vpop.eup %7079 }
 0x8d9   :  { %v2849_v21 = vmul.f32 %v7080_v26, %v2848_v3  ;;  %v9719_v3 = vld [vmem:[#allocation118_spill] sm:$0xff] }
 0x8da   :  { %v9720_v26 = vld [vmem:[#allocation58_spill] sm:$0xff] }
 0x8db   :  { %v8886_v7 = vadd.f32 %v2850_v13, %v2849_v21  ;;  %v9721_v21 = vld [vmem:[#allocation91_spill] sm:$0xff] }
 0x8dc   :  { %v9722_v13 = vld [vmem:[#allocation47_spill] sm:$0xff] }
 0x8dd   :  { %2917 = vmatmul.mubr.f32.vlgmr.msra.gmra.mrb[18].mxu1 %v8886_v7  ;;  %5165 = vmatmul.mubr.f32.vlgmr.msra.gmra.mrb[66].mxu0 %v8886_v7 }
 0x8de   :  { %6241 = vmatpush1.bf16.msra.mxu1 %v8469_v24  ;;  %6305 = vmatpush3.bf16.msra.mxu0 %v8479_v35 }
 0x8df   :  { %6243 = vmatprep.subr.bf16.mxu1 %v8475_v40  ;;  %6307 = vmatprep.subr.bf16.mxu0 %v8485_v42 }
 0x8e0   :  { %3156 = vmatprep.mubr.f32.mxu0 %v9523_v61  ;;  %3079 = vmatprep.mubr.f32.mxu1 %v9523_v61 }
 0x8e2   :  { %6245 = vmatpush1.bf16.msra.mxu1 %v8482_v56  ;;  %6309 = vmatpush3.bf16.msra.mxu0 %v8493_v62 }
 0x8e3   :  { %6247 = vmatprep.subr.bf16.mxu1 %v8488_v4  ;;  %6311 = vmatprep.subr.bf16.mxu0 %v8500_v29 }
 0x8e6   :  { %6249 = vmatpush1.bf16.msra.mxu1 %v8497_v19  ;;  %6313 = vmatpush3.bf16.msra.mxu0 %v8506_v58 }
 0x8e7   :  { %6251 = vmatprep.subr.bf16.mxu1 %v9627_v44  ;;  %6315 = vmatprep.subr.bf16.mxu0 %v9628_v31 }
 0x8ea   :  { %6253 = vmatpush1.bf16.msra.mxu1 %v9629_v57  ;;  %6317 = vmatpush3.bf16.msra.mxu0 %v9630_v14 }
 0x8eb   :  { %6255 = vmatprep.subr.bf16.mxu1 %v9631_v16  ;;  %6319 = vmatprep.subr.bf16.mxu0 %v9632_v46 }
 0x8ee   :  { %6257 = vmatpush1.bf16.msra.mxu1 %v9633_v37  ;;  %6321 = vmatpush3.bf16.msra.mxu0 %v9634_v15 }
 0x8ef   :  { %6259 = vmatprep.subr.bf16.mxu1 %v9635_v48  ;;  %6323 = vmatprep.subr.bf16.mxu0 %v9636_v39 }
 0x8f2   :  { %6261 = vmatpush1.bf16.msra.mxu1 %v9637_v12  ;;  %6325 = vmatpush3.bf16.msra.mxu0 %v9638_v36 }
 0x8f3   :  { %6263 = vmatprep.subr.bf16.mxu1 %v9639_v22  ;;  %6327 = vmatprep.subr.bf16.mxu0 %v8548_v59 }
 0x8f6   :  { %6265 = vmatpush1.bf16.msra.mxu1 %v8545_v55  ;;  %6329 = vmatpush3.bf16.msra.mxu0 %v8554_v53 }
 0x8f7   :  { %6267 = vmatprep.subr.bf16.mxu1 %v8551_v52  ;;  %6331 = vmatprep.subr.bf16.mxu0 %v8560_v11 }
 0x8fa   :  { %6269 = vmatpush1.bf16.msra.mxu1 %v8557_v41  ;;  %6333 = vmatpush3.bf16.msra.mxu0 %v8566_v20 }
 0x8fb   :  { %6271 = vmatprep.subr.bf16.mxu1 %v9640_v28  ;;  %6366 = vmatprep.subr.bf16.mxu0 %v9610_v38 }
 0x8fd   :  { %3157 = vmatmul.mubr.f32.vlgmr.msra.gmra.mrb[68].mxu0 %v8886_v7 }
 0x8fe   :  { %6273 = vmatpush1.bf16.msra.mxu1 %v9641_v63  ;;  %6368 = vmatpush3.bf16.msra.mxu0 %v9667_v2 }
 0x8ff   :  { %6275 = vmatprep.subr.bf16.mxu1 %v9668_v17  ;;  %6369 = vmatprep.subr.bf16.mxu0 %v9610_v38 }
 0x902   :  { %6277 = vmatpush1.bf16.msra.mxu1 %v9643_v54  ;;  %6371 = vmatpush3.bf16.msra.mxu0 %v8372_v8 }
 0x903   :  { %6279 = vmatprep.subr.bf16.mxu1 %v9669_v23  ;;  %6372 = vmatprep.subr.bf16.mxu0 %v9610_v38 }
 0x906   :  { %6281 = vmatpush1.bf16.msra.mxu1 %v9645_v30  ;;  %6374 = vmatpush3.bf16.msra.mxu0 %v9705_v51 }
 0x907   :  { %6283 = vmatprep.subr.bf16.mxu1 %v9706_v9  ;;  %6375 = vmatprep.subr.bf16.mxu0 %v9610_v38 }
 0x90a   :  { %6285 = vmatpush1.bf16.msra.mxu1 %v9707_v1  ;;  %6377 = vmatpush3.bf16.msra.mxu0 %v9708_v0  ;;  %v9739_v0 = vld [vmem:[#allocation70_spill] sm:$0xff] }
 0x90b   :  { %6287 = vmatprep.subr.bf16.mxu1 %v9709_v32  ;;  %6378 = vmatprep.subr.bf16.mxu0 %v9610_v38 }
 0x90e   :  { %6289 = vmatpush1.bf16.msra.mxu1 %v9710_v18  ;;  %6380 = vmatpush3.bf16.msra.mxu0 %v9711_v50 }
 0x90f   :  { %6291 = vmatprep.subr.bf16.mxu1 %v9712_v25  ;;  %6381 = vmatprep.subr.bf16.mxu0 %v9610_v38  ;;  %v9733_v25 = vld [vmem:[#allocation41_spill] sm:$0xff] }
 0x912   :  { %6293 = vmatpush1.bf16.msra.mxu1 %v9713_v49  ;;  %6383 = vmatpush3.bf16.msra.mxu0 %v9714_v43  ;;  %v9724_v43 = vld [vmem:[#allocation93_spill] sm:$0xff]  ;;  %v9728_v49 = vld [vmem:[#allocation98_spill] sm:$0xff] }
 0x913   :  { %6295 = vmatprep.subr.bf16.mxu1 %v9715_v47  ;;  %6384 = vmatprep.subr.bf16.mxu0 %v9610_v38  ;;  %v9723_v47 = vld [vmem:[#allocation92_spill] sm:$0xff] }
 0x916   :  { %6297 = vmatpush1.bf16.msra.mxu1 %v9716_v33  ;;  %6386 = vmatpush3.bf16.msra.mxu0 %v9717_v5  ;;  %v9725_v33 = vld [vmem:[#allocation94_spill] sm:$0xff]  ;;  %v9726_v5 = vld [vmem:[#allocation95_spill] sm:$0xff] }
 0x917   :  { %6299 = vmatprep.subr.bf16.mxu1 %v9718_v6  ;;  %6387 = vmatprep.subr.bf16.mxu0 %v9610_v38  ;;  %v9727_v6 = vld [vmem:[#allocation97_spill] sm:$0xff] }
 0x91a   :  { %6301 = vmatpush1.bf16.msra.mxu1 %v9719_v3  ;;  %6389 = vmatpush3.bf16.msra.mxu0 %v9720_v26  ;;  %v9729_v3 = vld [vmem:[#allocation100_spill] sm:$0xff]  ;;  %v9730_v26 = vld [vmem:[#allocation38_spill] sm:$0xff] }
 0x91b   :  { %6335 = vmatprep.subr.bf16.mxu1 %v9721_v21  ;;  %6455 = vmatprep.subr.bf16.mxu0 %v9722_v13  ;;  %v9731_v21 = vld [vmem:[#allocation33_spill] sm:$0xff]  ;;  %v9732_v13 = vld [vmem:[#allocation35_spill] sm:$0xff] }
 0x91d   :  { %3080 = vmatmul.mubr.f32.vlgmr.msra.gmra.mrb[20].mxu1 %v8886_v7 }
 0x91e   :  { %6337 = vmatpush1.bf16.msra.mxu1 %v9723_v47  ;;  %v9734_v47 = vld [vmem:[#allocation46_spill] sm:$0xff] }
 0x91f   :  { %6339 = vmatprep.subr.bf16.mxu1 %v9724_v43  ;;  %v9735_v43 = vld [vmem:[#allocation39_spill] sm:$0xff] }
 0x922   :  { %6341 = vmatpush1.bf16.msra.mxu1 %v9725_v33  ;;  %v9736_v33 = vld [vmem:[#allocation43_spill] sm:$0xff] }
 0x923   :  { %6343 = vmatprep.subr.bf16.mxu1 %v9726_v5  ;;  %v9737_v5 = vld [vmem:[#allocation49_spill] sm:$0xff] }
 0x926   :  { %6345 = vmatpush1.bf16.msra.mxu1 %v9727_v6  ;;  %v9738_v6 = vld [vmem:[#allocation54_spill] sm:$0xff] }
 0x927   :  { %6347 = vmatprep.subr.bf16.mxu1 %v9728_v49 }
 0x92a   :  { %6349 = vmatpush1.bf16.msra.mxu1 %v9729_v3 }
 0x92b   :  { %6351 = vmatprep.subr.bf16.mxu1 %v9730_v26 }
 0x92e   :  { %6353 = vmatpush1.bf16.msra.mxu1 %v9731_v21 }
 0x92f   :  { %6355 = vmatprep.subr.bf16.mxu1 %v9732_v13 }
 0x932   :  { %6357 = vmatpush1.bf16.msra.mxu1 %v9733_v25 }
 0x933   :  { %6359 = vmatprep.subr.bf16.mxu1 %v9734_v47 }
 0x936   :  { %6361 = vmatpush1.bf16.msra.mxu1 %v9735_v43 }
 0x937   :  { %6363 = vmatprep.subr.bf16.mxu1 %v9736_v33 }
 0x93a   :  { %6365 = vmatpush1.bf16.msra.mxu1 %v9737_v5 }
 0x93b   :  { %6391 = vmatprep.subr.bf16.mxu1 %v9738_v6 }
 0x971   :  { %v4770_v49 = vpop.f32.mrb[64].mxu0 }
 0x972   :  { %v4771_v3 = vpop.f32.mrb[65].mxu0 }
 0x973   :  { %v4772_v50 = vadd.f32 %v4771_v3, %v4770_v49 }
 0x975   :  { %v3007_v6 = vadd.f32 %v4772_v50, %v9625_v34 }
 0x9b0   :  { %v2918_v26 = vpop.f32.mrb[18].mxu1  ;;  %v2989_v18 = vpop.f32.mrb[66].mxu0 }
 0x9b1   :  { %v2919_v21 = vadd.f32 %v2918_v26, %v9662_v60  ;;  %v2920_v13 = vpop.f32.mrb[19].mxu1  ;;  %v5166_v32 = vpop.f32.mrb[67].mxu0  ;;  %v2990_v3 = vadd.f32 %v2989_v18, %v9626_v10 }
 0x9b2   :  { %v2921_v47 = vadd.f32 %v2920_v13, %v9739_v0 }
 0x9b3   :  { %v4494_v25 = vmul.f32 -1.442695, %v2919_v21 }
 0x9b4   :  { %v4495_v43 = vmul.f32 -1.442695, %v2921_v47 }
 0x9b5   :  { %7081 = vpow2.f32 %v4494_v25 }
 0x9b6   :  { %7083 = vpow2.f32 %v4495_v43 }
 0x9bf   :  { %v7082_v33 = vpop.eup %7081 }
 0x9c0   :  { %v2997_v1 = vadd.f32 1.0, %v7082_v33  ;;  %v7084_v5 = vpop.eup %7083 }
 0x9c1   :  { %v3004_v9 = vadd.f32 1.0, %v7084_v5 }
 0x9c2   :  { %7085 = vrcp.f32 %v2997_v1 }
 0x9c3   :  { %7087 = vrcp.f32 %v3004_v9  ;;  %v9740_v9 = vld [vmem:[#allocation77_spill] sm:$0xff] }
 0x9cc   :  { %v7086_v49 = vpop.eup %7085 }
 0x9cd   :  { %v3008_v51 = vmul.f32 %v7086_v49, %v3007_v6  ;;  %v7088_v25 = vpop.eup %7087 }
 0x9ce   :  { %v3011_v47 = vsub.f32 1.0, %v7088_v25  ;;  %v3013_v1 = vmul.f32 %v7088_v25, %v8872_v27 }
 0x9cf   :  { %v3009_v26 = vadd.f32 %v3008_v51, %v2990_v3 }
 0x9d0   :  { %v4822_v32 = vpop.f32.mrb[68].mxu0 }
 0x9d1   :  { %7089 = vtanh.f32 %v3009_v26  ;;  %v4823_v21 = vpop.f32.mrb[69].mxu0 }
 0x9d2   :  { %v4824_v13 = vadd.f32 %v4823_v21, %v4822_v32 }
 0x9d4   :  { %v3181_v21 = vadd.f32 %v4824_v13, %v8293_v45  ;;  %v9744_v13 = vld [vmem:[#allocation109_spill] sm:$0xff] }
 0x9db   :  { %v7090_v43 = vpop.eup %7089 }
 0x9dc   :  { %v3012_v0 = vmul.f32 %v7090_v43, %v3011_v47  ;;  %v9742_v43 = vld [vmem:[#allocation87_spill] sm:$0xff] }
 0x9de   :  { %v8979_v33 = vadd.f32 %v3013_v1, %v3012_v0  ;;  %v9741_v0 = vld [vmem:[#allocation78_spill] sm:$0xff] }
 0x9e0   :  { %3085 = vmatprep.mubr.f32.mxu1 %v8979_v33  ;;  %3161 = vmatprep.mubr.f32.mxu0 %v8979_v33 }
 0x9e1   :  { %3086 = vmatmul.mubr.f32.gmra.mrb[22].mxu1 %v9523_v61  ;;  %3162 = vmatmul.mubr.f32.gmra.mrb[70].mxu0 %v9523_v61 }
 0x9e2   :  { %3253 = vmatprep.mubr.f32.mxu1 %v9523_v61  ;;  %5199 = vmatprep.mubr.msk.f32.mxu0 %vm7371_vm0, %v9523_v61 }
 0x9f0   :  { %v3081_v51 = vpop.f32.mrb[20].mxu1 }
 0x9f1   :  { %v3167_v18 = vadd.f32 %v3081_v51, %v9740_v9  ;;  %v3083_v50 = vpop.f32.mrb[21].mxu1 }
 0x9f2   :  { %v3174_v5 = vadd.f32 %v3083_v50, %v9741_v0 }
 0x9f3   :  { %v4496_v27 = vmul.f32 -1.442695, %v3167_v18 }
 0x9f4   :  { %v4497_v6 = vmul.f32 -1.442695, %v3174_v5  ;;  %v9745_v5 = vld [vmem:[#allocation110_spill] sm:$0xff] }
 0x9f5   :  { %7091 = vpow2.f32 %v4496_v27 }
 0x9f6   :  { %7093 = vpow2.f32 %v4497_v6  ;;  %v9746_v6 = vld [vmem:[#allocation42_spill] sm:$0xff] }
 0x9ff   :  { %v7092_v49 = vpop.eup %7091 }
 0xa00   :  { %v3171_v3 = vadd.f32 1.0, %v7092_v49  ;;  %v7094_v26 = vpop.eup %7093  ;;  %v9747_v49 = vld [vmem:[#allocation111_spill] sm:$0xff] }
 0xa01   :  { %v3178_v32 = vadd.f32 1.0, %v7094_v26  ;;  %v9749_v26 = vld [vmem:[#allocation37_spill] sm:$0xff] }
 0xa02   :  { %7095 = vrcp.f32 %v3171_v3  ;;  %v9748_v3 = vld [vmem:[#allocation112_spill] sm:$0xff] }
 0xa03   :  { %7097 = vrcp.f32 %v3178_v32  ;;  %v9750_v32 = vld [vmem:[#allocation113_spill] sm:$0xff] }
 0xa0c   :  { %v7096_v25 = vpop.eup %7095 }
 0xa0d   :  { %v3182_v47 = vmul.f32 %v7096_v25, %v3181_v21  ;;  %v7098_v51 = vpop.eup %7097  ;;  %v9751_v21 = vld [vmem:[#allocation114_spill] sm:$0xff] }
 0xa0e   :  { %v3185_v9 = vsub.f32 1.0, %v7098_v51  ;;  %v3187_v27 = vmul.f32 %v7098_v51, %v8886_v7  ;;  %v9743_v7 = vld [vmem:[#allocation99_spill] sm:$0xff]  ;;  %v9752_v25 = vld [vmem:[#allocation50_spill] sm:$0xff]  ;;  %v9756_v51 = vld [vmem:[#allocation117_spill] sm:$0xff] }
 0xa0f   :  { %v3183_v1 = vadd.f32 %v3182_v47, %v9742_v43  ;;  %v9753_v47 = vld [vmem:[#allocation115_spill] sm:$0xff]  ;;  %v9754_v43 = vld [vmem:[#allocation116_spill] sm:$0xff] }
 0xa11   :  { %7099 = vtanh.f32 %v3183_v1  ;;  %v9755_v1 = vld [vmem:[#allocation45_spill] sm:$0xff] }
 0xa1b   :  { %v7100_v18 = vpop.eup %7099 }
 0xa1c   :  { %v3186_v50 = vmul.f32 %v7100_v18, %v3185_v9  ;;  %v9757_v9 = vld [vmem:[#allocation118_spill] sm:$0xff] }
 0xa1d   :  { %v9758_v18 = vld [vmem:[#allocation58_spill] sm:$0xff] }
 0xa1e   :  { %v8993_v0 = vadd.f32 %v3187_v27, %v3186_v50  ;;  %v9759_v50 = vld [vmem:[#allocation91_spill] sm:$0xff] }
 0xa1f   :  { %v9760_v27 = vld [vmem:[#allocation47_spill] sm:$0xff] }
 0xa20   :  { %3254 = vmatmul.mubr.f32.vlgmr.msra.gmra.mrb[22].mxu1 %v8993_v0  ;;  %5200 = vmatmul.mubr.f32.vlgmr.msra.gmra.mrb[72].mxu0 %v8993_v0 }
 0xa21   :  { %6393 = vmatpush1.bf16.msra.mxu1 %v8469_v24  ;;  %6457 = vmatpush3.bf16.msra.mxu0 %v8479_v35 }
 0xa22   :  { %6395 = vmatprep.subr.bf16.mxu1 %v8475_v40  ;;  %6459 = vmatprep.subr.bf16.mxu0 %v8485_v42 }
 0xa23   :  { %3493 = vmatprep.mubr.f32.mxu0 %v9523_v61  ;;  %3416 = vmatprep.mubr.f32.mxu1 %v9523_v61 }
 0xa25   :  { %6397 = vmatpush1.bf16.msra.mxu1 %v8482_v56  ;;  %6461 = vmatpush3.bf16.msra.mxu0 %v8493_v62 }
 0xa26   :  { %6399 = vmatprep.subr.bf16.mxu1 %v8488_v4  ;;  %6463 = vmatprep.subr.bf16.mxu0 %v8500_v29 }
 0xa29   :  { %6401 = vmatpush1.bf16.msra.mxu1 %v8497_v19  ;;  %6465 = vmatpush3.bf16.msra.mxu0 %v8506_v58 }
 0xa2a   :  { %6403 = vmatprep.subr.bf16.mxu1 %v9627_v44  ;;  %6467 = vmatprep.subr.bf16.mxu0 %v9628_v31 }
 0xa2d   :  { %6405 = vmatpush1.bf16.msra.mxu1 %v9629_v57  ;;  %6469 = vmatpush3.bf16.msra.mxu0 %v9630_v14 }
 0xa2e   :  { %6407 = vmatprep.subr.bf16.mxu1 %v9631_v16  ;;  %6471 = vmatprep.subr.bf16.mxu0 %v9632_v46 }
 0xa31   :  { %6409 = vmatpush1.bf16.msra.mxu1 %v9633_v37  ;;  %6473 = vmatpush3.bf16.msra.mxu0 %v9634_v15 }
 0xa32   :  { %6411 = vmatprep.subr.bf16.mxu1 %v9635_v48  ;;  %6475 = vmatprep.subr.bf16.mxu0 %v9636_v39 }
 0xa35   :  { %6413 = vmatpush1.bf16.msra.mxu1 %v9637_v12  ;;  %6477 = vmatpush3.bf16.msra.mxu0 %v9638_v36 }
 0xa36   :  { %6415 = vmatprep.subr.bf16.mxu1 %v9639_v22  ;;  %6479 = vmatprep.subr.bf16.mxu0 %v8548_v59 }
 0xa39   :  { %6417 = vmatpush1.bf16.msra.mxu1 %v8545_v55  ;;  %6481 = vmatpush3.bf16.msra.mxu0 %v8554_v53 }
 0xa3a   :  { %6419 = vmatprep.subr.bf16.mxu1 %v8551_v52  ;;  %6483 = vmatprep.subr.bf16.mxu0 %v8560_v11 }
 0xa3d   :  { %6421 = vmatpush1.bf16.msra.mxu1 %v8557_v41  ;;  %6485 = vmatpush3.bf16.msra.mxu0 %v8566_v20 }
 0xa3e   :  { %6423 = vmatprep.subr.bf16.mxu1 %v9640_v28  ;;  %6518 = vmatprep.subr.bf16.mxu0 %v9610_v38 }
 0xa40   :  { %3494 = vmatmul.mubr.f32.vlgmr.msra.gmra.mrb[74].mxu0 %v8993_v0 }
 0xa41   :  { %6425 = vmatpush1.bf16.msra.mxu1 %v9641_v63  ;;  %6520 = vmatpush3.bf16.msra.mxu0 %v9667_v2 }
 0xa42   :  { %6427 = vmatprep.subr.bf16.mxu1 %v9668_v17  ;;  %6521 = vmatprep.subr.bf16.mxu0 %v9610_v38 }
 0xa45   :  { %6429 = vmatpush1.bf16.msra.mxu1 %v9643_v54  ;;  %6523 = vmatpush3.bf16.msra.mxu0 %v8372_v8 }
 0xa46   :  { %6431 = vmatprep.subr.bf16.mxu1 %v9669_v23  ;;  %6524 = vmatprep.subr.bf16.mxu0 %v9610_v38 }
 0xa49   :  { %6433 = vmatpush1.bf16.msra.mxu1 %v9645_v30  ;;  %6526 = vmatpush3.bf16.msra.mxu0 %v9743_v7 }
 0xa4a   :  { %6435 = vmatprep.subr.bf16.mxu1 %v9744_v13  ;;  %6527 = vmatprep.subr.bf16.mxu0 %v9610_v38 }
 0xa4d   :  { %6437 = vmatpush1.bf16.msra.mxu1 %v9745_v5  ;;  %6529 = vmatpush3.bf16.msra.mxu0 %v9746_v6  ;;  %v9777_v6 = vld [vmem:[#allocation70_spill] sm:$0xff] }
 0xa4e   :  { %6439 = vmatprep.subr.bf16.mxu1 %v9747_v49  ;;  %6530 = vmatprep.subr.bf16.mxu0 %v9610_v38 }
 0xa51   :  { %6441 = vmatpush1.bf16.msra.mxu1 %v9748_v3  ;;  %6532 = vmatpush3.bf16.msra.mxu0 %v9749_v26 }
 0xa52   :  { %6443 = vmatprep.subr.bf16.mxu1 %v9750_v32  ;;  %6533 = vmatprep.subr.bf16.mxu0 %v9610_v38  ;;  %v9771_v32 = vld [vmem:[#allocation41_spill] sm:$0xff] }
 0xa55   :  { %6445 = vmatpush1.bf16.msra.mxu1 %v9751_v21  ;;  %6535 = vmatpush3.bf16.msra.mxu0 %v9752_v25  ;;  %v9762_v25 = vld [vmem:[#allocation93_spill] sm:$0xff]  ;;  %v9766_v21 = vld [vmem:[#allocation98_spill] sm:$0xff] }
 0xa56   :  { %6447 = vmatprep.subr.bf16.mxu1 %v9753_v47  ;;  %6536 = vmatprep.subr.bf16.mxu0 %v9610_v38  ;;  %v9761_v47 = vld [vmem:[#allocation92_spill] sm:$0xff] }
 0xa59   :  { %6449 = vmatpush1.bf16.msra.mxu1 %v9754_v43  ;;  %6538 = vmatpush3.bf16.msra.mxu0 %v9755_v1  ;;  %v9763_v43 = vld [vmem:[#allocation94_spill] sm:$0xff]  ;;  %v9764_v1 = vld [vmem:[#allocation95_spill] sm:$0xff] }
 0xa5a   :  { %6451 = vmatprep.subr.bf16.mxu1 %v9756_v51  ;;  %6539 = vmatprep.subr.bf16.mxu0 %v9610_v38  ;;  %v9765_v51 = vld [vmem:[#allocation97_spill] sm:$0xff] }
 0xa5d   :  { %6453 = vmatpush1.bf16.msra.mxu1 %v9757_v9  ;;  %6541 = vmatpush3.bf16.msra.mxu0 %v9758_v18  ;;  %v9767_v9 = vld [vmem:[#allocation100_spill] sm:$0xff]  ;;  %v9768_v18 = vld [vmem:[#allocation38_spill] sm:$0xff] }
 0xa5e   :  { %6487 = vmatprep.subr.bf16.mxu1 %v9759_v50  ;;  %6607 = vmatprep.subr.bf16.mxu0 %v9760_v27  ;;  %v9769_v50 = vld [vmem:[#allocation33_spill] sm:$0xff]  ;;  %v9770_v27 = vld [vmem:[#allocation35_spill] sm:$0xff] }
 0xa60   :  { %3417 = vmatmul.mubr.f32.vlgmr.msra.gmra.mrb[24].mxu1 %v8993_v0 }
 0xa61   :  { %6489 = vmatpush1.bf16.msra.mxu1 %v9761_v47  ;;  %v9772_v47 = vld [vmem:[#allocation46_spill] sm:$0xff] }
 0xa62   :  { %6491 = vmatprep.subr.bf16.mxu1 %v9762_v25  ;;  %v9773_v25 = vld [vmem:[#allocation39_spill] sm:$0xff] }
 0xa65   :  { %6493 = vmatpush1.bf16.msra.mxu1 %v9763_v43  ;;  %v9774_v43 = vld [vmem:[#allocation43_spill] sm:$0xff] }
 0xa66   :  { %6495 = vmatprep.subr.bf16.mxu1 %v9764_v1  ;;  %v9775_v1 = vld [vmem:[#allocation49_spill] sm:$0xff] }
 0xa69   :  { %6497 = vmatpush1.bf16.msra.mxu1 %v9765_v51  ;;  %v9776_v51 = vld [vmem:[#allocation54_spill] sm:$0xff] }
 0xa6a   :  { %6499 = vmatprep.subr.bf16.mxu1 %v9766_v21 }
 0xa6d   :  { %6501 = vmatpush1.bf16.msra.mxu1 %v9767_v9 }
 0xa6e   :  { %6503 = vmatprep.subr.bf16.mxu1 %v9768_v18 }
 0xa71   :  { %6505 = vmatpush1.bf16.msra.mxu1 %v9769_v50 }
 0xa72   :  { %6507 = vmatprep.subr.bf16.mxu1 %v9770_v27 }
 0xa75   :  { %6509 = vmatpush1.bf16.msra.mxu1 %v9771_v32 }
 0xa76   :  { %6511 = vmatprep.subr.bf16.mxu1 %v9772_v47 }
 0xa79   :  { %6513 = vmatpush1.bf16.msra.mxu1 %v9773_v25 }
 0xa7a   :  { %6515 = vmatprep.subr.bf16.mxu1 %v9774_v43 }
 0xa7d   :  { %6517 = vmatpush1.bf16.msra.mxu1 %v9775_v1 }
 0xa7e   :  { %6543 = vmatprep.subr.bf16.mxu1 %v9776_v51 }
 0xab4   :  { %v4825_v21 = vpop.f32.mrb[70].mxu0 }
 0xab5   :  { %v4826_v9 = vpop.f32.mrb[71].mxu0 }
 0xab6   :  { %v4827_v26 = vadd.f32 %v4826_v9, %v4825_v21 }
 0xab8   :  { %v3344_v51 = vadd.f32 %v4827_v26, %v9625_v34 }
 0xaf3   :  { %v3255_v18 = vpop.f32.mrb[22].mxu1  ;;  %v3326_v3 = vpop.f32.mrb[72].mxu0 }
 0xaf4   :  { %v3256_v50 = vadd.f32 %v3255_v18, %v9662_v60  ;;  %v3257_v27 = vpop.f32.mrb[23].mxu1  ;;  %v5201_v49 = vpop.f32.mrb[73].mxu0  ;;  %v3327_v9 = vadd.f32 %v3326_v3, %v9626_v10 }
 0xaf5   :  { %v3258_v47 = vadd.f32 %v3257_v27, %v9777_v6 }
 0xaf6   :  { %v4498_v32 = vmul.f32 -1.442695, %v3256_v50 }
 0xaf7   :  { %v4499_v25 = vmul.f32 -1.442695, %v3258_v47 }
 0xaf8   :  { %7101 = vpow2.f32 %v4498_v32 }
 0xaf9   :  { %7103 = vpow2.f32 %v4499_v25 }
 0xb02   :  { %v7102_v43 = vpop.eup %7101 }
 0xb03   :  { %v3334_v5 = vadd.f32 1.0, %v7102_v43  ;;  %v7104_v1 = vpop.eup %7103 }
 0xb04   :  { %v3341_v13 = vadd.f32 1.0, %v7104_v1 }
 0xb05   :  { %7105 = vrcp.f32 %v3334_v5 }
 0xb06   :  { %7107 = vrcp.f32 %v3341_v13  ;;  %v9778_v13 = vld [vmem:[#allocation79_spill] sm:$0xff] }
 0xb0f   :  { %v7106_v21 = vpop.eup %7105 }
 0xb10   :  { %v3345_v7 = vmul.f32 %v7106_v21, %v3344_v51  ;;  %v7108_v32 = vpop.eup %7107 }
 0xb11   :  { %v3348_v47 = vsub.f32 1.0, %v7108_v32  ;;  %v3350_v5 = vmul.f32 %v7108_v32, %v8979_v33 }
 0xb12   :  { %v3346_v18 = vadd.f32 %v3345_v7, %v3327_v9 }
 0xb13   :  { %v4877_v49 = vpop.f32.mrb[74].mxu0 }
 0xb14   :  { %7109 = vtanh.f32 %v3346_v18  ;;  %v4878_v50 = vpop.f32.mrb[75].mxu0 }
 0xb15   :  { %v4879_v27 = vadd.f32 %v4878_v50, %v4877_v49 }
 0xb17   :  { %v3518_v50 = vadd.f32 %v4879_v27, %v8293_v45  ;;  %v9782_v27 = vld [vmem:[#allocation109_spill] sm:$0xff] }
 0xb1e   :  { %v7110_v25 = vpop.eup %7109 }
 0xb1f   :  { %v3349_v6 = vmul.f32 %v7110_v25, %v3348_v47  ;;  %v9780_v25 = vld [vmem:[#allocation88_spill] sm:$0xff] }
 0xb21   :  { %v9086_v43 = vadd.f32 %v3350_v5, %v3349_v6  ;;  %v9779_v6 = vld [vmem:[#allocation80_spill] sm:$0xff] }
 0xb23   :  { %3422 = vmatprep.mubr.f32.mxu1 %v9086_v43  ;;  %3498 = vmatprep.mubr.f32.mxu0 %v9086_v43 }
 0xb24   :  { %3423 = vmatmul.mubr.f32.gmra.mrb[26].mxu1 %v9523_v61  ;;  %3499 = vmatmul.mubr.f32.gmra.mrb[76].mxu0 %v9523_v61 }
 0xb25   :  { %3590 = vmatprep.mubr.f32.mxu1 %v9523_v61  ;;  %5234 = vmatprep.mubr.msk.f32.mxu0 %vm7371_vm0, %v9523_v61 }
 0xb33   :  { %v3418_v7 = vpop.f32.mrb[24].mxu1 }
 0xb34   :  { %v3504_v3 = vadd.f32 %v3418_v7, %v9778_v13  ;;  %v3420_v26 = vpop.f32.mrb[25].mxu1 }
 0xb35   :  { %v3511_v1 = vadd.f32 %v3420_v26, %v9779_v6 }
 0xb36   :  { %v4500_v33 = vmul.f32 -1.442695, %v3504_v3 }
 0xb37   :  { %v4501_v51 = vmul.f32 -1.442695, %v3511_v1  ;;  %v9783_v1 = vld [vmem:[#allocation110_spill] sm:$0xff] }
 0xb38   :  { %7111 = vpow2.f32 %v4500_v33 }
 0xb39   :  { %7113 = vpow2.f32 %v4501_v51  ;;  %v9784_v51 = vld [vmem:[#allocation42_spill] sm:$0xff] }
 0xb42   :  { %v7112_v21 = vpop.eup %7111 }
 0xb43   :  { %v3508_v9 = vadd.f32 1.0, %v7112_v21  ;;  %v7114_v18 = vpop.eup %7113  ;;  %v9785_v21 = vld [vmem:[#allocation111_spill] sm:$0xff] }
 0xb44   :  { %v3515_v49 = vadd.f32 1.0, %v7114_v18  ;;  %v9787_v18 = vld [vmem:[#allocation37_spill] sm:$0xff] }
 0xb45   :  { %7115 = vrcp.f32 %v3508_v9  ;;  %v9786_v9 = vld [vmem:[#allocation112_spill] sm:$0xff] }
 0xb46   :  { %7117 = vrcp.f32 %v3515_v49  ;;  %v9788_v49 = vld [vmem:[#allocation113_spill] sm:$0xff] }
 0xb4f   :  { %v7116_v32 = vpop.eup %7115 }
 0xb50   :  { %v3519_v47 = vmul.f32 %v7116_v32, %v3518_v50  ;;  %v7118_v7 = vpop.eup %7117  ;;  %v9789_v50 = vld [vmem:[#allocation114_spill] sm:$0xff] }
 0xb51   :  { %v3522_v13 = vsub.f32 1.0, %v7118_v7  ;;  %v3524_v33 = vmul.f32 %v7118_v7, %v8993_v0  ;;  %v9781_v0 = vld [vmem:[#allocation99_spill] sm:$0xff]  ;;  %v9790_v32 = vld [vmem:[#allocation50_spill] sm:$0xff]  ;;  %v9794_v7 = vld [vmem:[#allocation117_spill] sm:$0xff] }
 0xb52   :  { %v3520_v5 = vadd.f32 %v3519_v47, %v9780_v25  ;;  %v9791_v47 = vld [vmem:[#allocation115_spill] sm:$0xff]  ;;  %v9792_v25 = vld [vmem:[#allocation116_spill] sm:$0xff] }
 0xb54   :  { %7119 = vtanh.f32 %v3520_v5  ;;  %v9793_v5 = vld [vmem:[#allocation45_spill] sm:$0xff] }
 0xb5e   :  { %v7120_v3 = vpop.eup %7119 }
 0xb5f   :  { %v3523_v26 = vmul.f32 %v7120_v3, %v3522_v13  ;;  %v9795_v13 = vld [vmem:[#allocation118_spill] sm:$0xff] }
 0xb60   :  { %v9796_v3 = vld [vmem:[#allocation58_spill] sm:$0xff] }
 0xb61   :  { %v9100_v6 = vadd.f32 %v3524_v33, %v3523_v26  ;;  %v9797_v26 = vld [vmem:[#allocation91_spill] sm:$0xff] }
 0xb62   :  { %v9798_v33 = vld [vmem:[#allocation47_spill] sm:$0xff] }
 0xb63   :  { %3591 = vmatmul.mubr.f32.vlgmr.msra.gmra.mrb[26].mxu1 %v9100_v6  ;;  %5235 = vmatmul.mubr.f32.vlgmr.msra.gmra.mrb[78].mxu0 %v9100_v6 }
 0xb64   :  { %6545 = vmatpush1.bf16.msra.mxu1 %v8469_v24  ;;  %6609 = vmatpush3.bf16.msra.mxu0 %v8479_v35 }
 0xb65   :  { %6547 = vmatprep.subr.bf16.mxu1 %v8475_v40  ;;  %6611 = vmatprep.subr.bf16.mxu0 %v8485_v42 }
 0xb66   :  { %3830 = vmatprep.mubr.f32.mxu0 %v9523_v61  ;;  %3753 = vmatprep.mubr.f32.mxu1 %v9523_v61 }
 0xb68   :  { %6549 = vmatpush1.bf16.msra.mxu1 %v8482_v56  ;;  %6613 = vmatpush3.bf16.msra.mxu0 %v8493_v62 }
 0xb69   :  { %6551 = vmatprep.subr.bf16.mxu1 %v8488_v4  ;;  %6615 = vmatprep.subr.bf16.mxu0 %v8500_v29 }
 0xb6c   :  { %6553 = vmatpush1.bf16.msra.mxu1 %v8497_v19  ;;  %6617 = vmatpush3.bf16.msra.mxu0 %v8506_v58 }
 0xb6d   :  { %6555 = vmatprep.subr.bf16.mxu1 %v9627_v44  ;;  %6619 = vmatprep.subr.bf16.mxu0 %v9628_v31 }
 0xb70   :  { %6557 = vmatpush1.bf16.msra.mxu1 %v9629_v57  ;;  %6621 = vmatpush3.bf16.msra.mxu0 %v9630_v14 }
 0xb71   :  { %6559 = vmatprep.subr.bf16.mxu1 %v9631_v16  ;;  %6623 = vmatprep.subr.bf16.mxu0 %v9632_v46 }
 0xb74   :  { %6561 = vmatpush1.bf16.msra.mxu1 %v9633_v37  ;;  %6625 = vmatpush3.bf16.msra.mxu0 %v9634_v15 }
 0xb75   :  { %6563 = vmatprep.subr.bf16.mxu1 %v9635_v48  ;;  %6627 = vmatprep.subr.bf16.mxu0 %v9636_v39 }
 0xb78   :  { %6565 = vmatpush1.bf16.msra.mxu1 %v9637_v12  ;;  %6629 = vmatpush3.bf16.msra.mxu0 %v9638_v36 }
 0xb79   :  { %6567 = vmatprep.subr.bf16.mxu1 %v9639_v22  ;;  %6631 = vmatprep.subr.bf16.mxu0 %v8548_v59 }
 0xb7c   :  { %6569 = vmatpush1.bf16.msra.mxu1 %v8545_v55  ;;  %6633 = vmatpush3.bf16.msra.mxu0 %v8554_v53 }
 0xb7d   :  { %6571 = vmatprep.subr.bf16.mxu1 %v8551_v52  ;;  %6635 = vmatprep.subr.bf16.mxu0 %v8560_v11 }
 0xb80   :  { %6573 = vmatpush1.bf16.msra.mxu1 %v8557_v41  ;;  %6637 = vmatpush3.bf16.msra.mxu0 %v8566_v20 }
 0xb81   :  { %6575 = vmatprep.subr.bf16.mxu1 %v9640_v28  ;;  %6670 = vmatprep.subr.bf16.mxu0 %v9610_v38 }
 0xb83   :  { %3831 = vmatmul.mubr.f32.vlgmr.msra.gmra.mrb[80].mxu0 %v9100_v6 }
 0xb84   :  { %6577 = vmatpush1.bf16.msra.mxu1 %v9641_v63  ;;  %6672 = vmatpush3.bf16.msra.mxu0 %v9667_v2 }
 0xb85   :  { %6579 = vmatprep.subr.bf16.mxu1 %v9668_v17  ;;  %6673 = vmatprep.subr.bf16.mxu0 %v9610_v38 }
 0xb88   :  { %6581 = vmatpush1.bf16.msra.mxu1 %v9643_v54  ;;  %6675 = vmatpush3.bf16.msra.mxu0 %v8372_v8 }
 0xb89   :  { %6583 = vmatprep.subr.bf16.mxu1 %v9669_v23  ;;  %6676 = vmatprep.subr.bf16.mxu0 %v9610_v38 }
 0xb8c   :  { %6585 = vmatpush1.bf16.msra.mxu1 %v9645_v30  ;;  %6678 = vmatpush3.bf16.msra.mxu0 %v9781_v0 }
 0xb8d   :  { %6587 = vmatprep.subr.bf16.mxu1 %v9782_v27  ;;  %6679 = vmatprep.subr.bf16.mxu0 %v9610_v38 }
 0xb90   :  { %6589 = vmatpush1.bf16.msra.mxu1 %v9783_v1  ;;  %6681 = vmatpush3.bf16.msra.mxu0 %v9784_v51  ;;  %v9815_v51 = vld [vmem:[#allocation70_spill] sm:$0xff] }
 0xb91   :  { %6591 = vmatprep.subr.bf16.mxu1 %v9785_v21  ;;  %6682 = vmatprep.subr.bf16.mxu0 %v9610_v38 }
 0xb94   :  { %6593 = vmatpush1.bf16.msra.mxu1 %v9786_v9  ;;  %6684 = vmatpush3.bf16.msra.mxu0 %v9787_v18 }
 0xb95   :  { %6595 = vmatprep.subr.bf16.mxu1 %v9788_v49  ;;  %6685 = vmatprep.subr.bf16.mxu0 %v9610_v38  ;;  %v9809_v49 = vld [vmem:[#allocation41_spill] sm:$0xff] }
 0xb98   :  { %6597 = vmatpush1.bf16.msra.mxu1 %v9789_v50  ;;  %6687 = vmatpush3.bf16.msra.mxu0 %v9790_v32  ;;  %v9800_v32 = vld [vmem:[#allocation93_spill] sm:$0xff]  ;;  %v9804_v50 = vld [vmem:[#allocation98_spill] sm:$0xff] }
 0xb99   :  { %6599 = vmatprep.subr.bf16.mxu1 %v9791_v47  ;;  %6688 = vmatprep.subr.bf16.mxu0 %v9610_v38  ;;  %v9799_v47 = vld [vmem:[#allocation92_spill] sm:$0xff] }
 0xb9c   :  { %6601 = vmatpush1.bf16.msra.mxu1 %v9792_v25  ;;  %6690 = vmatpush3.bf16.msra.mxu0 %v9793_v5  ;;  %v9801_v25 = vld [vmem:[#allocation94_spill] sm:$0xff]  ;;  %v9802_v5 = vld [vmem:[#allocation95_spill] sm:$0xff] }
 0xb9d   :  { %6603 = vmatprep.subr.bf16.mxu1 %v9794_v7  ;;  %6691 = vmatprep.subr.bf16.mxu0 %v9610_v38  ;;  %v9803_v7 = vld [vmem:[#allocation97_spill] sm:$0xff] }
 0xba0   :  { %6605 = vmatpush1.bf16.msra.mxu1 %v9795_v13  ;;  %6693 = vmatpush3.bf16.msra.mxu0 %v9796_v3  ;;  %v9805_v13 = vld [vmem:[#allocation100_spill] sm:$0xff]  ;;  %v9806_v3 = vld [vmem:[#allocation38_spill] sm:$0xff] }
 0xba1   :  { %6639 = vmatprep.subr.bf16.mxu1 %v9797_v26  ;;  %6759 = vmatprep.subr.bf16.mxu0 %v9798_v33  ;;  %v9807_v26 = vld [vmem:[#allocation33_spill] sm:$0xff]  ;;  %v9808_v33 = vld [vmem:[#allocation35_spill] sm:$0xff] }
 0xba3   :  { %3754 = vmatmul.mubr.f32.vlgmr.msra.gmra.mrb[28].mxu1 %v9100_v6 }
 0xba4   :  { %6641 = vmatpush1.bf16.msra.mxu1 %v9799_v47  ;;  %v9810_v47 = vld [vmem:[#allocation46_spill] sm:$0xff] }
 0xba5   :  { %6643 = vmatprep.subr.bf16.mxu1 %v9800_v32  ;;  %v9811_v32 = vld [vmem:[#allocation39_spill] sm:$0xff] }
 0xba8   :  { %6645 = vmatpush1.bf16.msra.mxu1 %v9801_v25  ;;  %v9812_v25 = vld [vmem:[#allocation43_spill] sm:$0xff] }
 0xba9   :  { %6647 = vmatprep.subr.bf16.mxu1 %v9802_v5  ;;  %v9813_v5 = vld [vmem:[#allocation49_spill] sm:$0xff] }
 0xbac   :  { %6649 = vmatpush1.bf16.msra.mxu1 %v9803_v7  ;;  %v9814_v7 = vld [vmem:[#allocation54_spill] sm:$0xff] }
 0xbad   :  { %6651 = vmatprep.subr.bf16.mxu1 %v9804_v50 }
 0xbb0   :  { %6653 = vmatpush1.bf16.msra.mxu1 %v9805_v13 }
 0xbb1   :  { %6655 = vmatprep.subr.bf16.mxu1 %v9806_v3 }
 0xbb4   :  { %6657 = vmatpush1.bf16.msra.mxu1 %v9807_v26 }
 0xbb5   :  { %6659 = vmatprep.subr.bf16.mxu1 %v9808_v33 }
 0xbb8   :  { %6661 = vmatpush1.bf16.msra.mxu1 %v9809_v49 }
 0xbb9   :  { %6663 = vmatprep.subr.bf16.mxu1 %v9810_v47 }
 0xbbc   :  { %6665 = vmatpush1.bf16.msra.mxu1 %v9811_v32 }
 0xbbd   :  { %6667 = vmatprep.subr.bf16.mxu1 %v9812_v25 }
 0xbc0   :  { %6669 = vmatpush1.bf16.msra.mxu1 %v9813_v5 }
 0xbc1   :  { %6695 = vmatprep.subr.bf16.mxu1 %v9814_v7 }
 0xbf7   :  { %v4880_v50 = vpop.f32.mrb[76].mxu0 }
 0xbf8   :  { %v4881_v13 = vpop.f32.mrb[77].mxu0 }
 0xbf9   :  { %v4882_v18 = vadd.f32 %v4881_v13, %v4880_v50 }
 0xbfb   :  { %v3681_v7 = vadd.f32 %v4882_v18, %v9625_v34 }
 0xc36   :  { %v3592_v3 = vpop.f32.mrb[26].mxu1  ;;  %v3663_v9 = vpop.f32.mrb[78].mxu0 }
 0xc37   :  { %v3593_v26 = vadd.f32 %v3592_v3, %v9662_v60  ;;  %v3594_v33 = vpop.f32.mrb[27].mxu1  ;;  %v5236_v21 = vpop.f32.mrb[79].mxu0  ;;  %v3664_v13 = vadd.f32 %v3663_v9, %v9626_v10 }
 0xc38   :  { %v3595_v47 = vadd.f32 %v3594_v33, %v9815_v51 }
 0xc39   :  { %v4502_v49 = vmul.f32 -1.442695, %v3593_v26 }
 0xc3a   :  { %v4503_v32 = vmul.f32 -1.442695, %v3595_v47 }
 0xc3b   :  { %7121 = vpow2.f32 %v4502_v49 }
 0xc3c   :  { %7123 = vpow2.f32 %v4503_v32 }
 0xc45   :  { %v7122_v25 = vpop.eup %7121 }
 0xc46   :  { %v3671_v1 = vadd.f32 1.0, %v7122_v25  ;;  %v7124_v5 = vpop.eup %7123 }
 0xc47   :  { %v3678_v27 = vadd.f32 1.0, %v7124_v5 }
 0xc48   :  { %7125 = vrcp.f32 %v3671_v1 }
 0xc49   :  { %7127 = vrcp.f32 %v3678_v27  ;;  %v9816_v27 = vld [vmem:[#allocation81_spill] sm:$0xff] }
 0xc52   :  { %v7126_v50 = vpop.eup %7125 }
 0xc53   :  { %v3682_v0 = vmul.f32 %v7126_v50, %v3681_v7  ;;  %v7128_v49 = vpop.eup %7127 }
 0xc54   :  { %v3685_v47 = vsub.f32 1.0, %v7128_v49  ;;  %v3687_v1 = vmul.f32 %v7128_v49, %v9086_v43 }
 0xc55   :  { %v3683_v3 = vadd.f32 %v3682_v0, %v3664_v13 }
 0xc56   :  { %v4932_v21 = vpop.f32.mrb[80].mxu0 }
 0xc57   :  { %7129 = vtanh.f32 %v3683_v3  ;;  %v4933_v26 = vpop.f32.mrb[81].mxu0 }
 0xc58   :  { %v4934_v33 = vadd.f32 %v4933_v26, %v4932_v21 }
 0xc5a   :  { %v3855_v26 = vadd.f32 %v4934_v33, %v8293_v45 }
 0xc61   :  { %v7130_v32 = vpop.eup %7129 }
 0xc62   :  { %v3686_v51 = vmul.f32 %v7130_v32, %v3685_v47  ;;  %v9818_v32 = vld [vmem:[#allocation89_spill] sm:$0xff] }
 0xc64   :  { %v9193_v25 = vadd.f32 %v3687_v1, %v3686_v51  ;;  %v9817_v51 = vld [vmem:[#allocation82_spill] sm:$0xff] }
 0xc66   :  { %3759 = vmatprep.mubr.f32.mxu1 %v9193_v25  ;;  %3835 = vmatprep.mubr.f32.mxu0 %v9193_v25 }
 0xc67   :  { %3760 = vmatmul.mubr.f32.gmra.mrb[30].mxu1 %v9523_v61  ;;  %3836 = vmatmul.mubr.f32.gmra.mrb[82].mxu0 %v9523_v61 }
 0xc68   :  { %3927 = vmatprep.mubr.f32.mxu1 %v9523_v61  ;;  %5269 = vmatprep.mubr.msk.f32.mxu0 %vm7371_vm0, %v9523_v61 }
 0xc76   :  { %v3755_v0 = vpop.f32.mrb[28].mxu1 }
 0xc77   :  { %v3841_v9 = vadd.f32 %v3755_v0, %v9816_v27  ;;  %v3757_v18 = vpop.f32.mrb[29].mxu1 }
 0xc78   :  { %v3848_v5 = vadd.f32 %v3757_v18, %v9817_v51 }
 0xc79   :  { %v4504_v43 = vmul.f32 -1.442695, %v3841_v9 }
 0xc7a   :  { %v4505_v7 = vmul.f32 -1.442695, %v3848_v5 }
 0xc7b   :  { %7131 = vpow2.f32 %v4504_v43 }
 0xc7c   :  { %7133 = vpow2.f32 %v4505_v7  ;;  %v9851_v7 = vld [vmem:[#allocation70_spill] sm:$0xff] }
 0xc85   :  { %v7132_v50 = vpop.eup %7131 }
 0xc86   :  { %v3845_v13 = vadd.f32 1.0, %v7132_v50  ;;  %v7134_v3 = vpop.eup %7133 }
 0xc87   :  { %v3852_v21 = vadd.f32 1.0, %v7134_v3 }
 0xc88   :  { %7135 = vrcp.f32 %v3845_v13 }
 0xc89   :  { %7137 = vrcp.f32 %v3852_v21 }
 0xc92   :  { %v7136_v49 = vpop.eup %7135 }
 0xc93   :  { %v3856_v47 = vmul.f32 %v7136_v49, %v3855_v26  ;;  %v7138_v0 = vpop.eup %7137 }
 0xc94   :  { %v3859_v27 = vsub.f32 1.0, %v7138_v0  ;;  %v3861_v43 = vmul.f32 %v7138_v0, %v9100_v6 }
 0xc95   :  { %v3857_v1 = vadd.f32 %v3856_v47, %v9818_v32 }
 0xc97   :  { %7139 = vtanh.f32 %v3857_v1 }
 0xca1   :  { %v7140_v9 = vpop.eup %7139 }
 0xca2   :  { %v3860_v18 = vmul.f32 %v7140_v9, %v3859_v27 }
 0xca4   :  { %v9207_v51 = vadd.f32 %v3861_v43, %v3860_v18 }
 0xca6   :  { %3928 = vmatmul.mubr.f32.vlgmr.msra.gmra.mrb[30].mxu1 %v9207_v51  ;;  %5270 = vmatmul.mubr.f32.vlgmr.msra.gmra.mrb[84].mxu0 %v9207_v51 }
 0xca7   :  { %6697 = vmatpush1.bf16.msra.mxu1 %v8469_v24  ;;  %6761 = vmatpush3.bf16.msra.mxu0 %v8479_v35  ;;  %v9822_v24 = vld [vmem:[#allocation42_spill] sm:$0xff]  ;;  %v9823_v35 = vld [vmem:[#allocation111_spill] sm:$0xff] }
 0xca8   :  { %6699 = vmatprep.subr.bf16.mxu1 %v8475_v40  ;;  %6763 = vmatprep.subr.bf16.mxu0 %v8485_v42  ;;  %v9820_v40 = vld [vmem:[#allocation109_spill] sm:$0xff] }
 0xca9   :  { %4167 = vmatprep.mubr.f32.mxu0 %v9523_v61  ;;  %4090 = vmatprep.mubr.f32.mxu1 %v9523_v61  ;;  %v9826_v42 = vld [vmem:[#allocation113_spill] sm:$0xff] }
 0xcab   :  { %6701 = vmatpush1.bf16.msra.mxu1 %v8482_v56  ;;  %6765 = vmatpush3.bf16.msra.mxu0 %v8493_v62  ;;  %v9825_v56 = vld [vmem:[#allocation37_spill] sm:$0xff]  ;;  %v9827_v62 = vld [vmem:[#allocation114_spill] sm:$0xff] }
 0xcac   :  { %6703 = vmatprep.subr.bf16.mxu1 %v8488_v4  ;;  %6767 = vmatprep.subr.bf16.mxu0 %v8500_v29  ;;  %v9821_v4 = vld [vmem:[#allocation110_spill] sm:$0xff]  ;;  %v9829_v29 = vld [vmem:[#allocation115_spill] sm:$0xff] }
 0xcaf   :  { %6705 = vmatpush1.bf16.msra.mxu1 %v8497_v19  ;;  %6769 = vmatpush3.bf16.msra.mxu0 %v8506_v58  ;;  %v9828_v19 = vld [vmem:[#allocation50_spill] sm:$0xff]  ;;  %v9830_v58 = vld [vmem:[#allocation116_spill] sm:$0xff] }
 0xcb0   :  { %6707 = vmatprep.subr.bf16.mxu1 %v9627_v44  ;;  %6771 = vmatprep.subr.bf16.mxu0 %v9628_v31  ;;  %v9837_v44 = vld [vmem:[#allocation93_spill] sm:$0xff]  ;;  %v9838_v31 = vld [vmem:[#allocation94_spill] sm:$0xff] }
 0xcb3   :  { %6709 = vmatpush1.bf16.msra.mxu1 %v9629_v57  ;;  %6773 = vmatpush3.bf16.msra.mxu0 %v9630_v14  ;;  %v9839_v57 = vld [vmem:[#allocation95_spill] sm:$0xff]  ;;  %v9840_v14 = vld [vmem:[#allocation97_spill] sm:$0xff] }
 0xcb4   :  { %6711 = vmatprep.subr.bf16.mxu1 %v9631_v16  ;;  %6775 = vmatprep.subr.bf16.mxu0 %v9632_v46  ;;  %v9841_v16 = vld [vmem:[#allocation98_spill] sm:$0xff]  ;;  %v9842_v46 = vld [vmem:[#allocation100_spill] sm:$0xff] }
 0xcb7   :  { %6713 = vmatpush1.bf16.msra.mxu1 %v9633_v37  ;;  %6777 = vmatpush3.bf16.msra.mxu0 %v9634_v15  ;;  %v9843_v37 = vld [vmem:[#allocation38_spill] sm:$0xff]  ;;  %v9844_v15 = vld [vmem:[#allocation33_spill] sm:$0xff] }
 0xcb8   :  { %6715 = vmatprep.subr.bf16.mxu1 %v9635_v48  ;;  %6779 = vmatprep.subr.bf16.mxu0 %v9636_v39  ;;  %v9845_v48 = vld [vmem:[#allocation35_spill] sm:$0xff]  ;;  %v9846_v39 = vld [vmem:[#allocation41_spill] sm:$0xff] }
 0xcbb   :  { %6717 = vmatpush1.bf16.msra.mxu1 %v9637_v12  ;;  %6781 = vmatpush3.bf16.msra.mxu0 %v9638_v36  ;;  %v9847_v12 = vld [vmem:[#allocation46_spill] sm:$0xff]  ;;  %v9848_v36 = vld [vmem:[#allocation39_spill] sm:$0xff] }
 0xcbc   :  { %6719 = vmatprep.subr.bf16.mxu1 %v9639_v22  ;;  %6783 = vmatprep.subr.bf16.mxu0 %v8548_v59  ;;  %v9832_v59 = vld [vmem:[#allocation117_spill] sm:$0xff]  ;;  %v9849_v22 = vld [vmem:[#allocation43_spill] sm:$0xff] }
 0xcbf   :  { %6721 = vmatpush1.bf16.msra.mxu1 %v8545_v55  ;;  %6785 = vmatpush3.bf16.msra.mxu0 %v8554_v53  ;;  %v9831_v55 = vld [vmem:[#allocation45_spill] sm:$0xff]  ;;  %v9833_v53 = vld [vmem:[#allocation118_spill] sm:$0xff] }
 0xcc0   :  { %6723 = vmatprep.subr.bf16.mxu1 %v8551_v52  ;;  %6787 = vmatprep.subr.bf16.mxu0 %v8560_v11  ;;  %v9819_v52 = vld [vmem:[#allocation99_spill] sm:$0xff] }
 0xcc1   :  { %v9835_v11 = vld [vmem:[#allocation91_spill] sm:$0xff] }
 0xcc3   :  { %6725 = vmatpush1.bf16.msra.mxu1 %v8557_v41  ;;  %6789 = vmatpush3.bf16.msra.mxu0 %v8566_v20  ;;  %v9834_v41 = vld [vmem:[#allocation58_spill] sm:$0xff]  ;;  %v9836_v20 = vld [vmem:[#allocation92_spill] sm:$0xff] }
 0xcc4   :  { %6727 = vmatprep.subr.bf16.mxu1 %v9640_v28  ;;  %6822 = vmatprep.subr.bf16.mxu0 %v9610_v38  ;;  %v9850_v28 = vld [vmem:[#allocation49_spill] sm:$0xff] }
 0xcc6   :  { %4168 = vmatmul.mubr.f32.vlgmr.msra.gmra.mrb[86].mxu0 %v9207_v51 }
 0xcc7   :  { %6729 = vmatpush1.bf16.msra.mxu1 %v9641_v63  ;;  %6824 = vmatpush3.bf16.msra.mxu0 %v9667_v2 }
 0xcc8   :  { %6731 = vmatprep.subr.bf16.mxu1 %v9668_v17  ;;  %6825 = vmatprep.subr.bf16.mxu0 %v9610_v38 }
 0xccb   :  { %6733 = vmatpush1.bf16.msra.mxu1 %v9643_v54  ;;  %6827 = vmatpush3.bf16.msra.mxu0 %v8372_v8  ;;  %v9824_v8 = vld [vmem:[#allocation112_spill] sm:$0xff] }
 0xccc   :  { %6735 = vmatprep.subr.bf16.mxu1 %v9669_v23  ;;  %6828 = vmatprep.subr.bf16.mxu0 %v9610_v38 }
 0xccf   :  { %6737 = vmatpush1.bf16.msra.mxu1 %v9645_v30  ;;  %6830 = vmatpush3.bf16.msra.mxu0 %v9819_v52 }
 0xcd0   :  { %6739 = vmatprep.subr.bf16.mxu1 %v9820_v40  ;;  %6831 = vmatprep.subr.bf16.mxu0 %v9610_v38 }
 0xcd3   :  { %6741 = vmatpush1.bf16.msra.mxu1 %v9821_v4  ;;  %6833 = vmatpush3.bf16.msra.mxu0 %v9822_v24 }
 0xcd4   :  { %6743 = vmatprep.subr.bf16.mxu1 %v9823_v35  ;;  %6834 = vmatprep.subr.bf16.mxu0 %v9610_v38 }
 0xcd7   :  { %6745 = vmatpush1.bf16.msra.mxu1 %v9824_v8  ;;  %6836 = vmatpush3.bf16.msra.mxu0 %v9825_v56 }
 0xcd8   :  { %6747 = vmatprep.subr.bf16.mxu1 %v9826_v42  ;;  %6837 = vmatprep.subr.bf16.mxu0 %v9610_v38  ;;  %v9852_v42 = vld [vmem:[#allocation83_spill] sm:$0xff] }
 0xcdb   :  { %6749 = vmatpush1.bf16.msra.mxu1 %v9827_v62  ;;  %6839 = vmatpush3.bf16.msra.mxu0 %v9828_v19 }
 0xcdc   :  { %6751 = vmatprep.subr.bf16.mxu1 %v9829_v29  ;;  %6840 = vmatprep.subr.bf16.mxu0 %v9610_v38  ;;  %v9853_v29 = vld [vmem:[#allocation84_spill] sm:$0xff] }
 0xcdf   :  { %6753 = vmatpush1.bf16.msra.mxu1 %v9830_v58  ;;  %6842 = vmatpush3.bf16.msra.mxu0 %v9831_v55 }
 0xce0   :  { %6755 = vmatprep.subr.bf16.mxu1 %v9832_v59  ;;  %6843 = vmatprep.subr.bf16.mxu0 %v9610_v38 }
 0xce3   :  { %6757 = vmatpush1.bf16.msra.mxu1 %v9833_v53  ;;  %6845 = vmatpush3.bf16.msra.mxu0 %v9834_v41 }
 0xce4   :  { %6791 = vmatprep.subr.bf16.mxu1 %v9835_v11  ;;  %6846 = vmatprep.subr.bf16.mxu0 %v9610_v38 }
 0xce6   :  { %4091 = vmatmul.mubr.f32.vlgmr.msra.gmra.mrb[32].mxu1 %v9207_v51 }
 0xce7   :  { %6793 = vmatpush1.bf16.msra.mxu1 %v9836_v20 }
 0xce8   :  { %6795 = vmatprep.subr.bf16.mxu1 %v9837_v44 }
 0xceb   :  { %6797 = vmatpush1.bf16.msra.mxu1 %v9838_v31 }
 0xcec   :  { %6799 = vmatprep.subr.bf16.mxu1 %v9839_v57  ;;  %v9854_v57 = vld [vmem:[#allocation90_spill] sm:$0xff] }
 0xcef   :  { %6801 = vmatpush1.bf16.msra.mxu1 %v9840_v14 }
 0xcf0   :  { %6803 = vmatprep.subr.bf16.mxu1 %v9841_v16 }
 0xcf3   :  { %6805 = vmatpush1.bf16.msra.mxu1 %v9842_v46 }
 0xcf4   :  { %6807 = vmatprep.subr.bf16.mxu1 %v9843_v37 }
 0xcf7   :  { %6809 = vmatpush1.bf16.msra.mxu1 %v9844_v15 }
 0xcf8   :  { %6811 = vmatprep.subr.bf16.mxu1 %v9845_v48 }
 0xcfb   :  { %6813 = vmatpush1.bf16.msra.mxu1 %v9846_v39 }
 0xcfc   :  { %6815 = vmatprep.subr.bf16.mxu1 %v9847_v12  ;;  %v9855_v12 = vld [vmem:[#allocation27_spill] sm:$0xff] }
 0xcff   :  { %6817 = vmatpush1.bf16.msra.mxu1 %v9848_v36 }
 0xd00   :  { %6819 = vmatprep.subr.bf16.mxu1 %v9849_v22  ;;  %v9857_v22 = vld [vmem:[#allocation29_spill] sm:$0xff] }
 0xd03   :  { %6821 = vmatpush1.bf16.msra.mxu1 %v9850_v28  ;;  %v9858_v28 = vld [vmem:[#allocation30_spill] sm:$0xff] }
 0xd3a   :  { %v4935_v63 = vpop.f32.mrb[82].mxu0 }
 0xd3b   :  { %v4936_v54 = vpop.f32.mrb[83].mxu0 }
 0xd3c   :  { %v4937_v30 = vadd.f32 %v4936_v54, %v4935_v63  ;;  %v6850_v63 = vpack.c.bf16 %v9858_v28, %v9857_v22  ;;  %v9859_v54 = vld [vmem:[#allocation31_spill] sm:$0xff] }
 0xd3e   :  { %v4018_v49 = vadd.f32 %v4937_v30, %v9625_v34 }
 0xd79   :  { %v3929_v2 = vpop.f32.mrb[30].mxu1  ;;  %v4000_v17 = vpop.f32.mrb[84].mxu0 }
 0xd7a   :  { %v3930_v23 = vadd.f32 %v3929_v2, %v9662_v60  ;;  %v3931_v6 = vpop.f32.mrb[31].mxu1  ;;  %v5271_v33 = vpop.f32.mrb[85].mxu0  ;;  %v4001_v1 = vadd.f32 %v4000_v17, %v9626_v10  ;;  %v9861_v2 = vld [vmem:[#allocation34_spill] sm:$0xff] }
 0xd7b   :  { %v3932_v50 = vadd.f32 %v3931_v6, %v9851_v7  ;;  %v9864_v6 = vld [vmem:[#allocation44_spill] sm:$0xff] }
 0xd7c   :  { %v4506_v5 = vmul.f32 -1.442695, %v3930_v23  ;;  %v9863_v23 = vld [vmem:[#allocation40_spill] sm:$0xff] }
 0xd7d   :  { %v4507_v13 = vmul.f32 -1.442695, %v3932_v50  ;;  %v6859_v33 = vpack.c.bf16 %v9864_v6, %v9863_v23  ;;  %v9866_v50 = vld [vmem:[#allocation52_spill] sm:$0xff] }
 0xd7e   :  { %7141 = vpow2.f32 %v4506_v5  ;;  %v9865_v5 = vld [vmem:[#allocation48_spill] sm:$0xff] }
 0xd7f   :  { %7143 = vpow2.f32 %v4507_v13  ;;  %v6862_v13 = vpack.c.bf16 %v9866_v50, %v9865_v5 }
 0xd88   :  { %v7142_v3 = vpop.eup %7141 }
 0xd89   :  { %v4008_v21 = vadd.f32 1.0, %v7142_v3  ;;  %v7144_v26 = vpop.eup %7143  ;;  %v9867_v3 = vld [vmem:[#allocation56_spill] sm:$0xff] }
 0xd8a   :  { %v4015_v47 = vadd.f32 1.0, %v7144_v26 }
 0xd8b   :  { %7145 = vrcp.f32 %v4008_v21  ;;  %v9868_v21 = vld [vmem:[#allocation60_spill] sm:$0xff] }
 0xd8c   :  { %7147 = vrcp.f32 %v4015_v47  ;;  %v6865_v26 = vpack.c.bf16 %v9868_v21, %v9867_v3  ;;  %v9870_v47 = vld [vmem:[#allocation68_spill] sm:$0xff] }
 0xd95   :  { %v7146_v32 = vpop.eup %7145 }
 0xd96   :  { %v4019_v0 = vmul.f32 %v7146_v32, %v4018_v49  ;;  %v7148_v52 = vpop.eup %7147  ;;  %v9869_v49 = vld [vmem:[#allocation64_spill] sm:$0xff] }
 0xd97   :  { %v4022_v40 = vsub.f32 1.0, %v7148_v52  ;;  %v4024_v35 = vmul.f32 %v7148_v52, %v9193_v25  ;;  %v6868_v32 = vpack.c.bf16 %v9870_v47, %v9869_v49 }
 0xd98   :  { %v4020_v27 = vadd.f32 %v4019_v0, %v4001_v1 }
 0xd99   :  { %v4987_v9 = vpop.f32.mrb[86].mxu0 }
 0xd9a   :  { %7149 = vtanh.f32 %v4020_v27  ;;  %v4988_v18 = vpop.f32.mrb[87].mxu0 }
 0xd9b   :  { %v4989_v43 = vadd.f32 %v4988_v18, %v4987_v9 }
 0xd9d   :  { %v4192_v20 = vadd.f32 %v4989_v43, %v8293_v45  ;;  %v9856_v45 = vld [vmem:[#allocation28_spill] sm:$0xff] }
 0xd9e   :  { %v6847_v36 = vpack.c.bf16 %v9856_v45, %v9855_v12 }
 0xda4   :  { %v7150_v4 = vpop.eup %7149 }
 0xda5   :  { %v4023_v24 = vmul.f32 %v7150_v4, %v4022_v40 }
 0xda7   :  { %v9299_v8 = vadd.f32 %v4024_v35, %v4023_v24 }
 0xda9   :  { %4096 = vmatprep.mubr.f32.mxu1 %v9299_v8  ;;  %4172 = vmatprep.mubr.f32.mxu0 %v9299_v8 }
 0xdaa   :  { %4097 = vmatmul.mubr.f32.gmra.mrb[34].mxu1 %v9523_v61  ;;  %4173 = vmatmul.mubr.f32.gmra.mrb[88].mxu0 %v9523_v61 }
 0xdab   :  { %4264 = vmatprep.mubr.f32.mxu1 %v9523_v61  ;;  %5304 = vmatprep.mubr.msk.f32.mxu0 %vm7371_vm0, %v9523_v61 }
 0xdb9   :  { %v4092_v56 = vpop.f32.mrb[32].mxu1 }
 0xdba   :  { %v4178_v62 = vadd.f32 %v4092_v56, %v9852_v42  ;;  %v4094_v19 = vpop.f32.mrb[33].mxu1 }
 0xdbb   :  { %v4185_v58 = vadd.f32 %v4094_v19, %v9853_v29 }
 0xdbc   :  { %v4508_v25 = vmul.f32 -1.442695, %v4178_v62 }
 0xdbd   :  { %v4509_v55 = vmul.f32 -1.442695, %v4185_v58 }
 0xdbe   :  { %7151 = vpow2.f32 %v4508_v25 }
 0xdbf   :  { %7153 = vpow2.f32 %v4509_v55 }
 0xdc8   :  { %v7152_v59 = vpop.eup %7151 }
 0xdc9   :  { %v4182_v53 = vadd.f32 1.0, %v7152_v59  ;;  %v7154_v41 = vpop.eup %7153 }
 0xdca   :  { %v4189_v11 = vadd.f32 1.0, %v7154_v41 }
 0xdcb   :  { %7155 = vrcp.f32 %v4182_v53 }
 0xdcc   :  { %7157 = vrcp.f32 %v4189_v11 }
 0xdd5   :  { %v7156_v44 = vpop.eup %7155 }
 0xdd6   :  { %v4193_v31 = vmul.f32 %v7156_v44, %v4192_v20  ;;  %v7158_v16 = vpop.eup %7157  ;;  %v4379_v20 = vld [vmem:[#allocation15] sm:$0xff] }
 0xdd7   :  { %v4196_v46 = vsub.f32 1.0, %v7158_v16  ;;  %v4198_v48 = vmul.f32 %v7158_v16, %v9207_v51  ;;  %v9860_v51 = vld [vmem:[#allocation32_spill] sm:$0xff] }
 0xdd8   :  { %v4194_v14 = vadd.f32 %v4193_v31, %v9854_v57  ;;  %v6853_v30 = vpack.c.bf16 %v9860_v51, %v9859_v54 }
 0xdda   :  { %7159 = vtanh.f32 %v4194_v14 }
 0xde4   :  { %v7160_v37 = vpop.eup %7159 }
 0xde5   :  { %v4197_v15 = vmul.f32 %v7160_v37, %v4196_v46 }
 0xde7   :  { %v4199_v39 = vadd.f32 %v4198_v48, %v4197_v15 }
 0xde9   :  { %4265 = vmatmul.mubr.f32.vlgmr.msra.gmra.mrb[34].mxu1 %v4199_v39  ;;  %5305 = vmatmul.mubr.f32.vlgmr.msra.gmra.mrb[90].mxu0 %v4199_v39 }
 0xdea   :  { %5339 = vmatprep.mubr.msk.f32.mxu0 %vm7371_vm0, %v9523_v61  ;;  %6848 = vmatpush3.bf16.msra.mxu0 %v6847_v36  ;;  %v9862_v61 = vld [vmem:[#allocation36_spill] sm:$0xff] }
 0xdeb   :  { %6849 = vmatprep.subr.bf16.mxu0 %v9610_v38  ;;  %v6856_v17 = vpack.c.bf16 %v9862_v61, %v9861_v2 }
 0xdee   :  { %6851 = vmatpush3.bf16.msra.mxu0 %v6850_v63 }
 0xdef   :  { %6852 = vmatprep.subr.bf16.mxu0 %v9610_v38 }
 0xdf2   :  { %6854 = vmatpush3.bf16.msra.mxu0 %v6853_v30 }
 0xdf3   :  { %6855 = vmatprep.subr.bf16.mxu0 %v9610_v38 }
 0xdf6   :  { %6857 = vmatpush3.bf16.msra.mxu0 %v6856_v17 }
 0xdf7   :  { %6858 = vmatprep.subr.bf16.mxu0 %v9610_v38 }
 0xdfa   :  { %6860 = vmatpush3.bf16.msra.mxu0 %v6859_v33 }
 0xdfb   :  { %6861 = vmatprep.subr.bf16.mxu0 %v9610_v38 }
 0xdfe   :  { %6863 = vmatpush3.bf16.msra.mxu0 %v6862_v13 }
 0xdff   :  { %6864 = vmatprep.subr.bf16.mxu0 %v9610_v38 }
 0xe02   :  { %6866 = vmatpush3.bf16.msra.mxu0 %v6865_v26 }
 0xe03   :  { %6867 = vmatprep.subr.bf16.mxu0 %v9610_v38 }
 0xe06   :  { %6869 = vmatpush3.bf16.msra.mxu0 %v6868_v32 }
 0xe7d   :  { %v4990_v1 = vpop.f32.mrb[88].mxu0 }
 0xe7e   :  { %v4991_v0 = vpop.f32.mrb[89].mxu0 }
 0xe7f   :  { %v4992_v27 = vadd.f32 %v4991_v0, %v4990_v1 }
 0xe81   :  { %v4355_v62 = vadd.f32 %v4992_v27, %v9625_v34 }
 0xebc   :  { %v4266_v9 = vpop.f32.mrb[34].mxu1  ;;  %v4337_v18 = vpop.f32.mrb[90].mxu0 }
 0xebd   :  { %v4267_v43 = vadd.f32 %v4266_v9, %v9662_v60  ;;  %v4268_v52 = vpop.f32.mrb[35].mxu1  ;;  %v5306_v40 = vpop.f32.mrb[91].mxu0  ;;  %v4338_v29 = vadd.f32 %v4337_v18, %v9626_v10 }
 0xebe   :  { %v4269_v24 = vadd.f32 %v4268_v52, %v9851_v7 }
 0xebf   :  { %v4510_v4 = vmul.f32 -1.442695, %v4267_v43 }
 0xec0   :  { %v4511_v35 = vmul.f32 -1.442695, %v4269_v24 }
 0xec1   :  { %7161 = vpow2.f32 %v4510_v4 }
 0xec2   :  { %7163 = vpow2.f32 %v4511_v35 }
 0xecb   :  { %v7162_v56 = vpop.eup %7161 }
 0xecc   :  { %v4345_v42 = vadd.f32 1.0, %v7162_v56  ;;  %v7164_v38 = vpop.eup %7163 }
 0xecd   :  { %v4352_v19 = vadd.f32 1.0, %v7164_v38 }
 0xece   :  { %7165 = vrcp.f32 %v4345_v42 }
 0xecf   :  { %7167 = vrcp.f32 %v4352_v19 }
 0xed8   :  { %v7166_v25 = vpop.eup %7165 }
 0xed9   :  { %v4356_v58 = vmul.f32 %v7166_v25, %v4355_v62  ;;  %v7168_v55 = vpop.eup %7167 }
 0xeda   :  { %v4359_v59 = vsub.f32 1.0, %v7168_v55  ;;  %v4361_v41 = vmul.f32 %v7168_v55, %v9299_v8 }
 0xedb   :  { %v4357_v60 = vadd.f32 %v4356_v58, %v4338_v29 }
 0xedd   :  { %7169 = vtanh.f32 %v4357_v60 }
 0xee7   :  { %v7170_v7 = vpop.eup %7169 }
 0xee8   :  { %v4360_v53 = vmul.f32 %v7170_v7, %v4359_v59 }
 0xeea   :  { %v4362_v11 = vadd.f32 %v4361_v41, %v4360_v53 }
 0xeec   :  { %5340 = vmatmul.mubr.f32.vlgmr.msra.gmra.mrb[92].mxu0 %v4362_v11 }
 0xfbf   :  { %v4446_v44 = vpop.f32.mrb[92].mxu0 }
 0xfc0   :  { %v4447_v31 = vadd.f32 %v4446_v44, %v4379_v20  ;;  %v5341_v34 = vpop.f32.mrb[93].mxu0 }
 0xfc2   :  { %4450 = vst [vmem:[%s9358_s12] sm:$0xff] %v4447_v31 }
 0xfc3   :  { %4455 = vsyncpa [#allocation6], 1 }
 0xfc4   :  { %4456 = vsyncpa [#allocation8], 1 }
 0xfc5   :  { %4457 = vsyncpa [#allocation11], 1 }
 0xfc6   :  { %4458 = vsyncpa [#allocation14], 1 }
 0xfc7   :  { %4459 = vsyncmov [#allocation4] }
 0xfca   :  { %s4460_s20 = vpop.sfrf %4459 }
 0xfcb   :  { %p4512_p8 = scmp.ne.s32.totalorder %s4460_s20, 0 }
 0xfcd   :  { %4464 = shalt.err (%p4512_p8)  }
 0xfce   :  { %4466 = vsyncmov [#allocation4 + $0x1] }
 0xfd1   :  { %s4467_s21 = vpop.sfrf %4466 }
 0xfd2   :  { %p4513_p9 = scmp.ne.s32.totalorder %s4467_s21, 0 }
 0xfd4   :  { %4471 = shalt.err (%p4513_p9)  }

</bundles_post_ra>
